<compile_context>
chip_gen: v7x
topology: tpu7x:2x2x1
jax: 0.10.0
libtpu: 0.0.40
codegen_flags: <defaults>
</compile_context>

<pallas_src>
import jax
import jax.numpy as jnp
from jax.experimental import pallas as pl
from jax.experimental.pallas import tpu as pltpu

# ----- model dims (small, synthetic stand-ins for 768/3072/12-layer BERT-CNN) -----
B, L, V, H = 2, 8, 128, 32          # batch, seq len, vocab, hidden
NH, DH, FF, NLAYERS = 4, 8, 64, 2   # heads, head dim, FFN dim, encoder layers
CFILT = 64                          # conv out channels (256 in original)
KSIZES = (2, 3, 4)                  # conv kernel heights
KMAX = max(KSIZES)
NK = len(KSIZES)
NCLASS = 2
SCALE = 1.0 / float(DH) ** 0.5


def _layernorm(x, gamma, beta, eps=1e-12):
    mu = jnp.mean(x, axis=-1, keepdims=True)
    var = jnp.mean((x - mu) ** 2, axis=-1, keepdims=True)
    return (x - mu) * jax.lax.rsqrt(var + eps) * gamma + beta


def _erf(x):
    # Abramowitz & Stegun 7.1.26 rational approximation; the 1/(1 + p*z) divide is
    # routed to the EUP via approx reciprocal (review: push divides off the VPU).
    a1, a2, a3, a4, a5 = 0.254829592, -0.284496736, 1.421413741, -1.453152027, 1.061405429
    p = 0.3275911
    s = jnp.where(x < 0.0, -1.0, 1.0)
    z = jnp.abs(x)
    t = pl.reciprocal(1.0 + p * z, approx=True)
    poly = ((((a5 * t + a4) * t + a3) * t + a2) * t + a1) * t
    return s * (1.0 - poly * jnp.exp(-z * z))


def _gelu_exact(x):
    # pytorch_pretrained_bert uses exact erf GELU (not the tanh approximation).
    return 0.5 * x * (1.0 + _erf(x * 0.7071067811865475))


def _softmax_lastdim(x):
    # manual softmax: exp on EUP, denominator divide replaced by EUP vrcp.
    x = x - jnp.max(x, axis=-1, keepdims=True)
    e = jnp.exp(x)
    return e * pl.reciprocal(jnp.sum(e, axis=-1, keepdims=True), approx=True)


# ---------------------------- the fused Pallas kernel ----------------------------

def bert_cnn_kernel(tok_ref, typ_ref, mask_ref,
                    wemb_ref, temb_ref, pemb_ref, embg_ref, embb_ref,
                    wqkv_ref, bqkv_ref, wo_ref, bo_ref,
                    g1_ref, be1_ref, w1_ref, bf1_ref,
                    w2_ref, bf2_ref, g2_ref, be2_ref,
                    cw_ref, cb_ref, pvalid_ref, fcw_ref, fcb_ref,
                    out_ref):
    # ---- fused BERT embedding: word (one-hot matmul) + token-type + position, LN ----
    ids = tok_ref[...].reshape(L, 1)                                          # [L, 1] int32
    one_hot = (jax.lax.broadcasted_iota(jnp.int32, (L, V), 1) == ids).astype(jnp.float32)
    emb = jnp.dot(one_hot, wemb_ref[...], preferred_element_type=jnp.float32)  # [L, H]
    typ = typ_ref[...].reshape(L, 1)
    emb = emb + jnp.where(typ > 0, temb_ref[1], temb_ref[0])                  # token-type emb
    emb = emb + pemb_ref[...]                                                 # position emb
    x = _layernorm(emb, embg_ref[...], embb_ref[...])                         # [L, H], stays 2-D

    # ---- attention-mask preprocessing: hoisted, computed once for all layers ----
    # pytorch_pretrained_bert extended attention mask: (1 - mask) * -10000
    neg = (1.0 - mask_ref[...]) * (-10000.0)                                  # [1, 1, L]

    # ---- encoder layers: stacked weights VMEM-resident, activations stay on-chip ----
    def layer(l, x):
        # fused QKV: ONE head-batched einsum over stacked [3*NH, H, DH] weights
        xb = jnp.broadcast_to(x, (3 * NH, L, H))
        qkv = jnp.einsum('hlk,hkd->hld', xb, wqkv_ref[l],
                         preferred_element_type=jnp.float32) + bqkv_ref[l]    # [3*NH, L, DH]
        q, k, v = qkv[:NH], qkv[NH:2 * NH], qkv[2 * NH:]
        # attention batched over all heads (no per-head loop / lane slices / concat)
        s = jnp.einsum('hld,hmd->hlm', q, k,
                       preferred_element_type=jnp.float32) * SCALE + neg      # [NH, L, L]
        p = _softmax_lastdim(s)
        ctx = jnp.einsum('hlm,hmd->hld', p, v,
                         preferred_element_type=jnp.float32)                  # [NH, L, DH]
        # output projection per head, summed over heads (== concat(heads) @ Wo)
        attn = jnp.sum(jnp.einsum('hld,hdo->hlo', ctx, wo_ref[l],
                                  preferred_element_type=jnp.float32),
                       axis=0) + bo_ref[l]                                    # [L, H]
        x1 = _layernorm(x + attn, g1_ref[l], be1_ref[l])
        # FFN with exact (erf) GELU + residual LayerNorm
        hid = _gelu_exact(jnp.dot(x1, w1_ref[l],
                                  preferred_element_type=jnp.float32) + bf1_ref[l])
        ffn = jnp.dot(hid, w2_ref[l], preferred_element_type=jnp.float32) + bf2_ref[l]
        return _layernorm(x1 + ffn, g2_ref[l], be2_ref[l])

    x = jax.lax.fori_loop(0, NLAYERS, layer, x, unroll=True)

    # ---- CNN head: tap-accumulated conv, all 3 kernel sizes channel-stacked ----
    # conv[i, (k, c)] = sum_{t<k} x[i+t] @ W_k[t]; tail rows are zero-padded and the
    # invalid positions per kernel size are masked below (ReLU >= 0 -> 0 is neutral
    # for the max-pool).
    xpad = jnp.concatenate([x, jnp.zeros((KMAX - 1, H), jnp.float32)], axis=0)
    conv = jnp.dot(x, cw_ref[0], preferred_element_type=jnp.float32)
    for t in range(1, KMAX):                                                  # static, KMAX=4
        conv = conv + jnp.dot(xpad[t:t + L, :], cw_ref[t],
                              preferred_element_type=jnp.float32)
    conv = jnp.maximum(conv + cb_ref[...], 0.0)                               # ReLU [L, NK*CFILT]
    pooled = jnp.max(conv * pvalid_ref[...], axis=0, keepdims=True)           # [1, NK*CFILT]

    # nn.Dropout(0.1) is identity at inference; Linear + Softmax(dim=1)
    logits = (jnp.dot(pooled, fcw_ref[...], preferred_element_type=jnp.float32)
              + fcb_ref[...])
    out_ref[...] = _softmax_lastdim(logits).reshape(1, 1, NCLASS)


# ---------------------------- host-side glue ----------------------------

def init_params(key):
    def nxt():
        nonlocal key
        key, sub = jax.random.split(key)
        return sub

    def dense(shape):
        return (0.02 * jax.random.normal(nxt(), shape)).astype(jnp.float32)

    p = dict(
        word_emb=dense((V, H)),
        type_emb=dense((2, H)),
        pos_emb=dense((L, H)),
        emb_g=jnp.ones((H,), jnp.float32),
        emb_b=jnp.zeros((H,), jnp.float32),
        layers=[],
    )
    for _ in range(NLAYERS):
        p['layers'].append(dict(
            wq=dense((NH, H, DH)), bq=jnp.zeros((NH, DH), jnp.float32),
            wk=dense((NH, H, DH)), bk=jnp.zeros((NH, DH), jnp.float32),
            wv=dense((NH, H, DH)), bv=jnp.zeros((NH, DH), jnp.float32),
            wo=dense((NH, DH, H)), bo=jnp.zeros((H,), jnp.float32),
            g1=jnp.ones((H,), jnp.float32), be1=jnp.zeros((H,), jnp.float32),
            w1=dense((H, FF)), bf1=jnp.zeros((FF,), jnp.float32),
            w2=dense((FF, H)), bf2=jnp.zeros((H,), jnp.float32),
            g2=jnp.ones((H,), jnp.float32), be2=jnp.zeros((H,), jnp.float32),
        ))
    p['conv'] = {k: dict(w=dense((k, H, CFILT)),
                         b=jnp.zeros((CFILT,), jnp.float32)) for k in KSIZES}
    p['fcw'] = dense((NK * CFILT, NCLASS))
    p['fcb'] = jnp.zeros((NCLASS,), jnp.float32)
    return p


def pack_params(p):
    """Repack per-module weights into the stacked / head-batched kernel layout."""
    def stack(fn):
        return jnp.stack([fn(lyr) for lyr in p['layers']])

    packed = dict(
        wemb=p['word_emb'], temb=p['type_emb'], pemb=p['pos_emb'],
        embg=p['emb_g'].reshape(1, H), embb=p['emb_b'].reshape(1, H),
        # head-batched QKV stacks: [NLAYERS, 3*NH, H, DH] / [NLAYERS, 3*NH, 1, DH]
        wqkv=stack(lambda l: jnp.concatenate([l['wq'], l['wk'], l['wv']], axis=0)),
        bqkv=stack(lambda l: jnp.concatenate([l['bq'], l['bk'], l['bv']],
                                             axis=0).reshape(3 * NH, 1, DH)),
        wo=stack(lambda l: l['wo']),                      # [NLAYERS, NH, DH, H]
        bo=stack(lambda l: l['bo']),
        g1=stack(lambda l: l['g1']), be1=stack(lambda l: l['be1']),
        w1=stack(lambda l: l['w1']), bf1=stack(lambda l: l['bf1']),
        w2=stack(lambda l: l['w2']), bf2=stack(lambda l: l['bf2']),
        g2=stack(lambda l: l['g2']), be2=stack(lambda l: l['be2']),
    )
    # conv: zero-pad every kernel to KMAX taps -> per-tap weights [KMAX, H, NK*CFILT];
    # pool-validity mask derived from the actual KSIZES tuple (review correctness fix).
    cw = jnp.zeros((KMAX, H, NK * CFILT), jnp.float32)
    cbs, pvs = [], []
    for j, k in enumerate(KSIZES):
        cw = cw.at[:k, :, j * CFILT:(j + 1) * CFILT].set(p['conv'][k]['w'])
        cbs.append(p['conv'][k]['b'])
        pvs.append(jnp.broadcast_to(
            (jnp.arange(L) <= (L - k)).astype(jnp.float32)[:, None], (L, CFILT)))
    packed['cw'] = cw
    packed['cb'] = jnp.concatenate(cbs).reshape(1, NK * CFILT)
    packed['pool_valid'] = jnp.concatenate(pvs, axis=1)      # [L, NK*CFILT]
    packed['fcw'] = p['fcw']
    packed['fcb'] = p['fcb'].reshape(1, NCLASS)
    return packed


def _full_block(arr):
    nd = arr.ndim
    return pl.BlockSpec(arr.shape, lambda b, _nd=nd: (0,) * _nd)


@jax.jit
def bert_cnn_forward(params, context, types, mask):
    tok = context.reshape(B, L, 1).astype(jnp.int32)
    typ = types.reshape(B, L, 1).astype(jnp.int32)
    msk = mask.astype(jnp.float32).reshape(B, 1, L)

    weights = (params['wemb'], params['temb'], params['pemb'],
               params['embg'], params['embb'],
               params['wqkv'], params['bqkv'], params['wo'], params['bo'],
               params['g1'], params['be1'], params['w1'], params['bf1'],
               params['w2'], params['bf2'], params['g2'], params['be2'],
               params['cw'], params['cb'], params['pool_valid'],
               params['fcw'], params['fcb'])

    in_specs = ([pl.BlockSpec((1, L, 1), lambda b: (b, 0, 0)),
                 pl.BlockSpec((1, L, 1), lambda b: (b, 0, 0)),
                 pl.BlockSpec((1, 1, L), lambda b: (b, 0, 0))]
                + [_full_block(w) for w in weights])

    out = pl.pallas_call(
        bert_cnn_kernel,
        out_shape=jax.ShapeDtypeStruct((B, 1, NCLASS), jnp.float32),
        grid=(B,),
        in_specs=in_specs,
        out_specs=pl.BlockSpec((1, 1, NCLASS), lambda b: (b, 0, 0)),
        compiler_params=pltpu.CompilerParams(
            dimension_semantics=("parallel",)),
    )(tok, typ, msk, *weights)
    return out.reshape(B, NCLASS)


if __name__ == "__main__":
    key = jax.random.PRNGKey(0)
    k_ctx, k_typ = jax.random.split(key)
    context = jax.random.randint(k_ctx, (B, L), 0, V, dtype=jnp.int32)
    types = jax.random.randint(k_typ, (B, L), 0, 2, dtype=jnp.int32)
    mask = jnp.array([[1] * L, [1] * (L - 2) + [0] * 2], dtype=jnp.int32)

    params = pack_params(init_params(jax.random.PRNGKey(1)))
    out = bert_cnn_forward(params, context, types, mask)
    out = jax.block_until_ready(out)
    assert out.shape == (B, NCLASS)
    assert bool(jnp.all(jnp.isfinite(out)))
    print("KERNEL_OK")
</pallas_src>

<mosaic_0001>
module attributes {stable_mosaic.version = 11 : i64} {
  func.func @bert_cnn_kernel(%arg0: i32, %arg1: memref<1x8x1xi32, #tpu.memory_space<vmem>>, %arg2: memref<1x8x1xi32, #tpu.memory_space<vmem>>, %arg3: memref<1x1x8xf32, #tpu.memory_space<vmem>>, %arg4: memref<128x32xf32, #tpu.memory_space<vmem>>, %arg5: memref<2x32xf32, #tpu.memory_space<vmem>>, %arg6: memref<8x32xf32, #tpu.memory_space<vmem>>, %arg7: memref<1x32xf32, #tpu.memory_space<vmem>>, %arg8: memref<1x32xf32, #tpu.memory_space<vmem>>, %arg9: memref<2x12x32x8xf32, #tpu.memory_space<vmem>>, %arg10: memref<2x12x1x8xf32, #tpu.memory_space<vmem>>, %arg11: memref<2x4x8x32xf32, #tpu.memory_space<vmem>>, %arg12: memref<2x32xf32, #tpu.memory_space<vmem>>, %arg13: memref<2x32xf32, #tpu.memory_space<vmem>>, %arg14: memref<2x32xf32, #tpu.memory_space<vmem>>, %arg15: memref<2x32x64xf32, #tpu.memory_space<vmem>>, %arg16: memref<2x64xf32, #tpu.memory_space<vmem>>, %arg17: memref<2x64x32xf32, #tpu.memory_space<vmem>>, %arg18: memref<2x32xf32, #tpu.memory_space<vmem>>, %arg19: memref<2x32xf32, #tpu.memory_space<vmem>>, %arg20: memref<2x32xf32, #tpu.memory_space<vmem>>, %arg21: memref<4x32x192xf32, #tpu.memory_space<vmem>>, %arg22: memref<1x192xf32, #tpu.memory_space<vmem>>, %arg23: memref<8x192xf32, #tpu.memory_space<vmem>>, %arg24: memref<192x2xf32, #tpu.memory_space<vmem>>, %arg25: memref<1x2xf32, #tpu.memory_space<vmem>>, %arg26: memref<1x1x2xf32, #tpu.memory_space<vmem>>) attributes {dimension_semantics = [#tpu.dimension_semantics<parallel>], iteration_bounds = array<i64: 2>, scalar_prefetch = 0 : i64, scratch_operands = 0 : i64, tpu.core_type = #tpu.core_type<tc>, window_params = [{transform_indices = @transform_0, window_bounds = array<i64: 1, 8, 1>}, {transform_indices = @transform_1, window_bounds = array<i64: 1, 8, 1>}, {transform_indices = @transform_2, window_bounds = array<i64: 1, 1, 8>}, {pipeline_mode = #tpu.pipeline_mode<synchronous>, transform_indices = @transform_3, window_bounds = array<i64: 128, 32>}, {pipeline_mode = #tpu.pipeline_mode<synchronous>, transform_indices = @transform_4, window_bounds = array<i64: 2, 32>}, {pipeline_mode = #tpu.pipeline_mode<synchronous>, transform_indices = @transform_5, window_bounds = array<i64: 8, 32>}, {pipeline_mode = #tpu.pipeline_mode<synchronous>, transform_indices = @transform_6, window_bounds = array<i64: 1, 32>}, {pipeline_mode = #tpu.pipeline_mode<synchronous>, transform_indices = @transform_7, window_bounds = array<i64: 1, 32>}, {pipeline_mode = #tpu.pipeline_mode<synchronous>, transform_indices = @transform_8, window_bounds = array<i64: 2, 12, 32, 8>}, {pipeline_mode = #tpu.pipeline_mode<synchronous>, transform_indices = @transform_9, window_bounds = array<i64: 2, 12, 1, 8>}, {pipeline_mode = #tpu.pipeline_mode<synchronous>, transform_indices = @transform_10, window_bounds = array<i64: 2, 4, 8, 32>}, {pipeline_mode = #tpu.pipeline_mode<synchronous>, transform_indices = @transform_11, window_bounds = array<i64: 2, 32>}, {pipeline_mode = #tpu.pipeline_mode<synchronous>, transform_indices = @transform_12, window_bounds = array<i64: 2, 32>}, {pipeline_mode = #tpu.pipeline_mode<synchronous>, transform_indices = @transform_13, window_bounds = array<i64: 2, 32>}, {pipeline_mode = #tpu.pipeline_mode<synchronous>, transform_indices = @transform_14, window_bounds = array<i64: 2, 32, 64>}, {pipeline_mode = #tpu.pipeline_mode<synchronous>, transform_indices = @transform_15, window_bounds = array<i64: 2, 64>}, {pipeline_mode = #tpu.pipeline_mode<synchronous>, transform_indices = @transform_16, window_bounds = array<i64: 2, 64, 32>}, {pipeline_mode = #tpu.pipeline_mode<synchronous>, transform_indices = @transform_17, window_bounds = array<i64: 2, 32>}, {pipeline_mode = #tpu.pipeline_mode<synchronous>, transform_indices = @transform_18, window_bounds = array<i64: 2, 32>}, {pipeline_mode = #tpu.pipeline_mode<synchronous>, transform_indices = @transform_19, window_bounds = array<i64: 2, 32>}, {pipeline_mode = #tpu.pipeline_mode<synchronous>, transform_indices = @transform_20, window_bounds = array<i64: 4, 32, 192>}, {pipeline_mode = #tpu.pipeline_mode<synchronous>, transform_indices = @transform_21, window_bounds = array<i64: 1, 192>}, {pipeline_mode = #tpu.pipeline_mode<synchronous>, transform_indices = @transform_22, window_bounds = array<i64: 8, 192>}, {pipeline_mode = #tpu.pipeline_mode<synchronous>, transform_indices = @transform_23, window_bounds = array<i64: 192, 2>}, {pipeline_mode = #tpu.pipeline_mode<synchronous>, transform_indices = @transform_24, window_bounds = array<i64: 1, 2>}, {transform_indices = @transform_25, window_bounds = array<i64: 1, 1, 2>}]} {
    %c0 = arith.constant 0 : index
    %c0_0 = arith.constant 0 : index
    %c0_1 = arith.constant 0 : index
    %0 = vector.load %arg1[%c0, %c0_0, %c0_1] : memref<1x8x1xi32, #tpu.memory_space<vmem>>, vector<1x8x1xi32>
    %1 = vector.shape_cast %0 : vector<1x8x1xi32> to vector<8x1xi32>
    %2 = tpu.iota {dimensions = array<i32: 1>} : vector<8x128xi32>
    %3 = vector.broadcast %1 : vector<8x1xi32> to vector<8x128xi32>
    %4 = arith.cmpi eq, %2, %3 : vector<8x128xi32>
    %5 = arith.extui %4 : vector<8x128xi1> to vector<8x128xi32>
    %6 = arith.sitofp %5 : vector<8x128xi32> to vector<8x128xf32>
    %c0_2 = arith.constant 0 : index
    %c0_3 = arith.constant 0 : index
    %7 = vector.load %arg4[%c0_2, %c0_3] : memref<128x32xf32, #tpu.memory_space<vmem>>, vector<128x32xf32>
    %cst = arith.constant dense<0.000000e+00> : vector<8x32xf32>
    %8 = tpu.matmul %6, %7, %cst {dimension_numbers = #tpu.dot_dimension_numbers<[1], [0], [0], [1], [0, 0, 1, 1], [], []>} : vector<8x128xf32>, vector<128x32xf32>, vector<8x32xf32> -> vector<8x32xf32>
    %c0_4 = arith.constant 0 : index
    %c0_5 = arith.constant 0 : index
    %c0_6 = arith.constant 0 : index
    %9 = vector.load %arg2[%c0_4, %c0_5, %c0_6] : memref<1x8x1xi32, #tpu.memory_space<vmem>>, vector<1x8x1xi32>
    %10 = vector.shape_cast %9 : vector<1x8x1xi32> to vector<8x1xi32>
    %c0_i32 = arith.constant 0 : i32
    %11 = vector.broadcast %c0_i32 : i32 to vector<8x1xi32>
    %12 = arith.cmpi sgt, %10, %11 : vector<8x1xi32>
    %c1 = arith.constant 1 : index
    %c0_7 = arith.constant 0 : index
    %13 = vector.load %arg5[%c1, %c0_7] : memref<2x32xf32, #tpu.memory_space<vmem>>, vector<1x32xf32>
    %14 = vector.shape_cast %13 : vector<1x32xf32> to vector<32xf32>
    %c0_8 = arith.constant 0 : index
    %c0_9 = arith.constant 0 : index
    %15 = vector.load %arg5[%c0_8, %c0_9] : memref<2x32xf32, #tpu.memory_space<vmem>>, vector<1x32xf32>
    %16 = vector.shape_cast %15 : vector<1x32xf32> to vector<32xf32>
    %17 = vector.shape_cast %12 : vector<8x1xi1> to vector<8x1xi1>
    %18 = vector.broadcast %17 : vector<8x1xi1> to vector<8x32xi1>
    %19 = vector.shape_cast %14 : vector<32xf32> to vector<1x32xf32>
    %20 = vector.broadcast %19 : vector<1x32xf32> to vector<8x32xf32>
    %21 = vector.shape_cast %16 : vector<32xf32> to vector<1x32xf32>
    %22 = vector.broadcast %21 : vector<1x32xf32> to vector<8x32xf32>
    %23 = arith.select %18, %20, %22 : vector<8x32xi1>, vector<8x32xf32>
    %24 = arith.addf %8, %23 : vector<8x32xf32>
    %c0_10 = arith.constant 0 : index
    %c0_11 = arith.constant 0 : index
    %25 = vector.load %arg6[%c0_10, %c0_11] : memref<8x32xf32, #tpu.memory_space<vmem>>, vector<8x32xf32>
    %26 = arith.addf %24, %25 : vector<8x32xf32>
    %c0_12 = arith.constant 0 : index
    %c0_13 = arith.constant 0 : index
    %27 = vector.load %arg7[%c0_12, %c0_13] : memref<1x32xf32, #tpu.memory_space<vmem>>, vector<1x32xf32>
    %c0_14 = arith.constant 0 : index
    %c0_15 = arith.constant 0 : index
    %28 = vector.load %arg8[%c0_14, %c0_15] : memref<1x32xf32, #tpu.memory_space<vmem>>, vector<1x32xf32>
    %cst_16 = arith.constant dense<0.000000e+00> : vector<8xf32>
    %29 = vector.multi_reduction <add>, %26, %cst_16 [1] : vector<8x32xf32> to vector<8xf32>
    %30 = vector.shape_cast %29 : vector<8xf32> to vector<8x1xf32>
    %cst_17 = arith.constant 3.200000e+01 : f32
    %31 = vector.broadcast %cst_17 : f32 to vector<8x1xf32>
    %32 = arith.divf %30, %31 : vector<8x1xf32>
    %33 = vector.broadcast %32 : vector<8x1xf32> to vector<8x32xf32>
    %34 = arith.subf %26, %33 : vector<8x32xf32>
    %35 = arith.mulf %34, %34 : vector<8x32xf32>
    %cst_18 = arith.constant dense<0.000000e+00> : vector<8xf32>
    %36 = vector.multi_reduction <add>, %35, %cst_18 [1] : vector<8x32xf32> to vector<8xf32>
    %37 = vector.shape_cast %36 : vector<8xf32> to vector<8x1xf32>
    %cst_19 = arith.constant 3.200000e+01 : f32
    %38 = vector.broadcast %cst_19 : f32 to vector<8x1xf32>
    %39 = arith.divf %37, %38 : vector<8x1xf32>
    %40 = vector.broadcast %32 : vector<8x1xf32> to vector<8x32xf32>
    %41 = arith.subf %26, %40 : vector<8x32xf32>
    %cst_20 = arith.constant 9.99999996E-13 : f32
    %42 = vector.broadcast %cst_20 : f32 to vector<8x1xf32>
    %43 = arith.addf %39, %42 : vector<8x1xf32>
    %44 = math.rsqrt %43 : vector<8x1xf32>
    %45 = vector.broadcast %44 : vector<8x1xf32> to vector<8x32xf32>
    %46 = arith.mulf %41, %45 : vector<8x32xf32>
    %47 = vector.broadcast %27 : vector<1x32xf32> to vector<8x32xf32>
    %48 = arith.mulf %46, %47 : vector<8x32xf32>
    %49 = vector.broadcast %28 : vector<1x32xf32> to vector<8x32xf32>
    %50 = arith.addf %48, %49 : vector<8x32xf32>
    %c0_21 = arith.constant 0 : index
    %c0_22 = arith.constant 0 : index
    %c0_23 = arith.constant 0 : index
    %51 = vector.load %arg3[%c0_21, %c0_22, %c0_23] : memref<1x1x8xf32, #tpu.memory_space<vmem>>, vector<1x1x8xf32>
    %cst_24 = arith.constant 1.000000e+00 : f32
    %52 = vector.broadcast %cst_24 : f32 to vector<1x1x8xf32>
    %53 = arith.subf %52, %51 : vector<1x1x8xf32>
    %cst_25 = arith.constant -1.000000e+04 : f32
    %54 = vector.broadcast %cst_25 : f32 to vector<1x1x8xf32>
    %55 = arith.mulf %53, %54 : vector<1x1x8xf32>
    %c0_i32_26 = arith.constant 0 : i32
    %56 = vector.shape_cast %50 : vector<8x32xf32> to vector<1x8x32xf32>
    %57 = vector.broadcast %56 : vector<1x8x32xf32> to vector<12x8x32xf32>
    %58 = arith.index_cast %c0_i32_26 : i32 to index
    %c0_27 = arith.constant 0 : index
    %c0_28 = arith.constant 0 : index
    %c0_29 = arith.constant 0 : index
    %59 = vector.load %arg9[%58, %c0_27, %c0_28, %c0_29] : memref<2x12x32x8xf32, #tpu.memory_space<vmem>>, vector<1x12x32x8xf32>
    %60 = vector.shape_cast %59 : vector<1x12x32x8xf32> to vector<12x32x8xf32>
    "tpu.trace_start"() <{level = 10 : i32, message = "hlk,hkd->hld"}> : () -> ()
    %cst_30 = arith.constant dense<0.000000e+00> : vector<12x8x8xf32>
    %61 = tpu.matmul %57, %60, %cst_30 {dimension_numbers = #tpu.dot_dimension_numbers<[2], [1], [1], [2], [0, 0, 0, 1, 1, 2], [0], [0]>} : vector<12x8x32xf32>, vector<12x32x8xf32>, vector<12x8x8xf32> -> vector<12x8x8xf32>
    "tpu.trace_stop"() : () -> ()
    %62 = arith.index_cast %c0_i32_26 : i32 to index
    %c0_31 = arith.constant 0 : index
    %c0_32 = arith.constant 0 : index
    %c0_33 = arith.constant 0 : index
    %63 = vector.load %arg10[%62, %c0_31, %c0_32, %c0_33] : memref<2x12x1x8xf32, #tpu.memory_space<vmem>>, vector<1x12x1x8xf32>
    %64 = vector.shape_cast %63 : vector<1x12x1x8xf32> to vector<12x1x8xf32>
    %65 = vector.broadcast %64 : vector<12x1x8xf32> to vector<12x8x8xf32>
    %66 = arith.addf %61, %65 : vector<12x8x8xf32>
    %67 = vector.extract_strided_slice %66 {offsets = [0, 0, 0], sizes = [4, 8, 8], strides = [1, 1, 1]} : vector<12x8x8xf32> to vector<4x8x8xf32>
    %68 = vector.extract_strided_slice %66 {offsets = [4, 0, 0], sizes = [4, 8, 8], strides = [1, 1, 1]} : vector<12x8x8xf32> to vector<4x8x8xf32>
    %69 = vector.extract_strided_slice %66 {offsets = [8, 0, 0], sizes = [4, 8, 8], strides = [1, 1, 1]} : vector<12x8x8xf32> to vector<4x8x8xf32>
    "tpu.trace_start"() <{level = 10 : i32, message = "hld,hmd->hlm"}> : () -> ()
    %cst_34 = arith.constant dense<0.000000e+00> : vector<4x8x8xf32>
    %70 = tpu.matmul %67, %68, %cst_34 {dimension_numbers = #tpu.dot_dimension_numbers<[2], [2], [1], [1], [0, 0, 0, 1, 1, 1], [0], [0]>} : vector<4x8x8xf32>, vector<4x8x8xf32>, vector<4x8x8xf32> -> vector<4x8x8xf32>
    "tpu.trace_stop"() : () -> ()
    %cst_35 = arith.constant 0.353553385 : f32
    %71 = vector.broadcast %cst_35 : f32 to vector<4x8x8xf32>
    %72 = arith.mulf %70, %71 : vector<4x8x8xf32>
    %73 = vector.broadcast %55 : vector<1x1x8xf32> to vector<4x8x8xf32>
    %74 = arith.addf %72, %73 : vector<4x8x8xf32>
    %cst_36 = arith.constant dense<0xFF800000> : vector<4x8xf32>
    %75 = vector.multi_reduction <maximumf>, %74, %cst_36 [2] : vector<4x8x8xf32> to vector<4x8xf32>
    %76 = vector.shape_cast %75 : vector<4x8xf32> to vector<4x8x1xf32>
    %77 = vector.broadcast %76 : vector<4x8x1xf32> to vector<4x8x8xf32>
    %78 = arith.subf %74, %77 : vector<4x8x8xf32>
    %79 = math.exp %78 : vector<4x8x8xf32>
    %cst_37 = arith.constant dense<0.000000e+00> : vector<4x8xf32>
    %80 = vector.multi_reduction <add>, %79, %cst_37 [2] : vector<4x8x8xf32> to vector<4x8xf32>
    %81 = vector.shape_cast %80 : vector<4x8xf32> to vector<4x8x1xf32>
    %82 = tpu.reciprocal %81 {approx = true} : vector<4x8x1xf32> -> vector<4x8x1xf32>
    %83 = vector.broadcast %82 : vector<4x8x1xf32> to vector<4x8x8xf32>
    %84 = arith.mulf %79, %83 : vector<4x8x8xf32>
    "tpu.trace_start"() <{level = 10 : i32, message = "hlm,hmd->hld"}> : () -> ()
    %cst_38 = arith.constant dense<0.000000e+00> : vector<4x8x8xf32>
    %85 = tpu.matmul %84, %69, %cst_38 {dimension_numbers = #tpu.dot_dimension_numbers<[2], [1], [1], [2], [0, 0, 0, 1, 1, 2], [0], [0]>} : vector<4x8x8xf32>, vector<4x8x8xf32>, vector<4x8x8xf32> -> vector<4x8x8xf32>
    "tpu.trace_stop"() : () -> ()
    %86 = arith.index_cast %c0_i32_26 : i32 to index
    %c0_39 = arith.constant 0 : index
    %c0_40 = arith.constant 0 : index
    %c0_41 = arith.constant 0 : index
    %87 = vector.load %arg11[%86, %c0_39, %c0_40, %c0_41] : memref<2x4x8x32xf32, #tpu.memory_space<vmem>>, vector<1x4x8x32xf32>
    %88 = vector.shape_cast %87 : vector<1x4x8x32xf32> to vector<4x8x32xf32>
    "tpu.trace_start"() <{level = 10 : i32, message = "hld,hdo->hlo"}> : () -> ()
    %cst_42 = arith.constant dense<0.000000e+00> : vector<4x8x32xf32>
    %89 = tpu.matmul %85, %88, %cst_42 {dimension_numbers = #tpu.dot_dimension_numbers<[2], [1], [1], [2], [0, 0, 0, 1, 1, 2], [0], [0]>} : vector<4x8x8xf32>, vector<4x8x32xf32>, vector<4x8x32xf32> -> vector<4x8x32xf32>
    "tpu.trace_stop"() : () -> ()
    %cst_43 = arith.constant dense<0.000000e+00> : vector<8x32xf32>
    %90 = vector.multi_reduction <add>, %89, %cst_43 [0] : vector<4x8x32xf32> to vector<8x32xf32>
    %91 = arith.index_cast %c0_i32_26 : i32 to index
    %c0_44 = arith.constant 0 : index
    %92 = vector.load %arg12[%91, %c0_44] : memref<2x32xf32, #tpu.memory_space<vmem>>, vector<1x32xf32>
    %93 = vector.shape_cast %92 : vector<1x32xf32> to vector<32xf32>
    %94 = vector.shape_cast %93 : vector<32xf32> to vector<1x32xf32>
    %95 = vector.broadcast %94 : vector<1x32xf32> to vector<8x32xf32>
    %96 = arith.addf %90, %95 : vector<8x32xf32>
    %97 = arith.addf %50, %96 : vector<8x32xf32>
    %98 = arith.index_cast %c0_i32_26 : i32 to index
    %c0_45 = arith.constant 0 : index
    %99 = vector.load %arg13[%98, %c0_45] : memref<2x32xf32, #tpu.memory_space<vmem>>, vector<1x32xf32>
    %100 = vector.shape_cast %99 : vector<1x32xf32> to vector<32xf32>
    %101 = arith.index_cast %c0_i32_26 : i32 to index
    %c0_46 = arith.constant 0 : index
    %102 = vector.load %arg14[%101, %c0_46] : memref<2x32xf32, #tpu.memory_space<vmem>>, vector<1x32xf32>
    %103 = vector.shape_cast %102 : vector<1x32xf32> to vector<32xf32>
    %cst_47 = arith.constant dense<0.000000e+00> : vector<8xf32>
    %104 = vector.multi_reduction <add>, %97, %cst_47 [1] : vector<8x32xf32> to vector<8xf32>
    %105 = vector.shape_cast %104 : vector<8xf32> to vector<8x1xf32>
    %cst_48 = arith.constant 3.200000e+01 : f32
    %106 = vector.broadcast %cst_48 : f32 to vector<8x1xf32>
    %107 = arith.divf %105, %106 : vector<8x1xf32>
    %108 = vector.broadcast %107 : vector<8x1xf32> to vector<8x32xf32>
    %109 = arith.subf %97, %108 : vector<8x32xf32>
    %110 = arith.mulf %109, %109 : vector<8x32xf32>
    %cst_49 = arith.constant dense<0.000000e+00> : vector<8xf32>
    %111 = vector.multi_reduction <add>, %110, %cst_49 [1] : vector<8x32xf32> to vector<8xf32>
    %112 = vector.shape_cast %111 : vector<8xf32> to vector<8x1xf32>
    %cst_50 = arith.constant 3.200000e+01 : f32
    %113 = vector.broadcast %cst_50 : f32 to vector<8x1xf32>
    %114 = arith.divf %112, %113 : vector<8x1xf32>
    %115 = vector.broadcast %107 : vector<8x1xf32> to vector<8x32xf32>
    %116 = arith.subf %97, %115 : vector<8x32xf32>
    %cst_51 = arith.constant 9.99999996E-13 : f32
    %117 = vector.broadcast %cst_51 : f32 to vector<8x1xf32>
    %118 = arith.addf %114, %117 : vector<8x1xf32>
    %119 = math.rsqrt %118 : vector<8x1xf32>
    %120 = vector.broadcast %119 : vector<8x1xf32> to vector<8x32xf32>
    %121 = arith.mulf %116, %120 : vector<8x32xf32>
    %122 = vector.shape_cast %100 : vector<32xf32> to vector<1x32xf32>
    %123 = vector.broadcast %122 : vector<1x32xf32> to vector<8x32xf32>
    %124 = arith.mulf %121, %123 : vector<8x32xf32>
    %125 = vector.shape_cast %103 : vector<32xf32> to vector<1x32xf32>
    %126 = vector.broadcast %125 : vector<1x32xf32> to vector<8x32xf32>
    %127 = arith.addf %124, %126 : vector<8x32xf32>
    %128 = arith.index_cast %c0_i32_26 : i32 to index
    %c0_52 = arith.constant 0 : index
    %c0_53 = arith.constant 0 : index
    %129 = vector.load %arg15[%128, %c0_52, %c0_53] : memref<2x32x64xf32, #tpu.memory_space<vmem>>, vector<1x32x64xf32>
    %130 = vector.shape_cast %129 : vector<1x32x64xf32> to vector<32x64xf32>
    %cst_54 = arith.constant dense<0.000000e+00> : vector<8x64xf32>
    %131 = tpu.matmul %127, %130, %cst_54 {dimension_numbers = #tpu.dot_dimension_numbers<[1], [0], [0], [1], [0, 0, 1, 1], [], []>} : vector<8x32xf32>, vector<32x64xf32>, vector<8x64xf32> -> vector<8x64xf32>
    %132 = arith.index_cast %c0_i32_26 : i32 to index
    %c0_55 = arith.constant 0 : index
    %133 = vector.load %arg16[%132, %c0_55] : memref<2x64xf32, #tpu.memory_space<vmem>>, vector<1x64xf32>
    %134 = vector.shape_cast %133 : vector<1x64xf32> to vector<64xf32>
    %135 = vector.shape_cast %134 : vector<64xf32> to vector<1x64xf32>
    %136 = vector.broadcast %135 : vector<1x64xf32> to vector<8x64xf32>
    %137 = arith.addf %131, %136 : vector<8x64xf32>
    %cst_56 = arith.constant 5.000000e-01 : f32
    %138 = vector.broadcast %cst_56 : f32 to vector<8x64xf32>
    %139 = arith.mulf %138, %137 : vector<8x64xf32>
    %cst_57 = arith.constant 0.707106769 : f32
    %140 = vector.broadcast %cst_57 : f32 to vector<8x64xf32>
    %141 = arith.mulf %137, %140 : vector<8x64xf32>
    %cst_58 = arith.constant 0.000000e+00 : f32
    %142 = vector.broadcast %cst_58 : f32 to vector<8x64xf32>
    %143 = arith.cmpf olt, %141, %142 : vector<8x64xf32>
    %cst_59 = arith.constant -1.000000e+00 : f32
    %cst_60 = arith.constant 1.000000e+00 : f32
    %144 = vector.broadcast %cst_59 : f32 to vector<8x64xf32>
    %145 = vector.broadcast %cst_60 : f32 to vector<8x64xf32>
    %146 = arith.select %143, %144, %145 : vector<8x64xi1>, vector<8x64xf32>
    %147 = math.absf %141 : vector<8x64xf32>
    %cst_61 = arith.constant 0.327591091 : f32
    %148 = vector.broadcast %cst_61 : f32 to vector<8x64xf32>
    %149 = arith.mulf %148, %147 : vector<8x64xf32>
    %cst_62 = arith.constant 1.000000e+00 : f32
    %150 = vector.broadcast %cst_62 : f32 to vector<8x64xf32>
    %151 = arith.addf %150, %149 : vector<8x64xf32>
    %152 = tpu.reciprocal %151 {approx = true} : vector<8x64xf32> -> vector<8x64xf32>
    %cst_63 = arith.constant 1.06140542 : f32
    %153 = vector.broadcast %cst_63 : f32 to vector<8x64xf32>
    %154 = arith.mulf %153, %152 : vector<8x64xf32>
    %cst_64 = arith.constant -1.45315206 : f32
    %155 = vector.broadcast %cst_64 : f32 to vector<8x64xf32>
    %156 = arith.addf %154, %155 : vector<8x64xf32>
    %157 = arith.mulf %156, %152 : vector<8x64xf32>
    %cst_65 = arith.constant 1.42141378 : f32
    %158 = vector.broadcast %cst_65 : f32 to vector<8x64xf32>
    %159 = arith.addf %157, %158 : vector<8x64xf32>
    %160 = arith.mulf %159, %152 : vector<8x64xf32>
    %cst_66 = arith.constant -0.284496725 : f32
    %161 = vector.broadcast %cst_66 : f32 to vector<8x64xf32>
    %162 = arith.addf %160, %161 : vector<8x64xf32>
    %163 = arith.mulf %162, %152 : vector<8x64xf32>
    %cst_67 = arith.constant 0.254829586 : f32
    %164 = vector.broadcast %cst_67 : f32 to vector<8x64xf32>
    %165 = arith.addf %163, %164 : vector<8x64xf32>
    %166 = arith.mulf %165, %152 : vector<8x64xf32>
    %cst_68 = arith.constant 0.000000e+00 : f32
    %167 = vector.broadcast %cst_68 : f32 to vector<8x64xf32>
    %168 = arith.subf %167, %147 : vector<8x64xf32>
    %169 = arith.mulf %168, %147 : vector<8x64xf32>
    %170 = math.exp %169 : vector<8x64xf32>
    %171 = arith.mulf %166, %170 : vector<8x64xf32>
    %cst_69 = arith.constant 1.000000e+00 : f32
    %172 = vector.broadcast %cst_69 : f32 to vector<8x64xf32>
    %173 = arith.subf %172, %171 : vector<8x64xf32>
    %174 = arith.mulf %146, %173 : vector<8x64xf32>
    %cst_70 = arith.constant 1.000000e+00 : f32
    %175 = vector.broadcast %cst_70 : f32 to vector<8x64xf32>
    %176 = arith.addf %175, %174 : vector<8x64xf32>
    %177 = arith.mulf %139, %176 : vector<8x64xf32>
    %178 = arith.index_cast %c0_i32_26 : i32 to index
    %c0_71 = arith.constant 0 : index
    %c0_72 = arith.constant 0 : index
    %179 = vector.load %arg17[%178, %c0_71, %c0_72] : memref<2x64x32xf32, #tpu.memory_space<vmem>>, vector<1x64x32xf32>
    %180 = vector.shape_cast %179 : vector<1x64x32xf32> to vector<64x32xf32>
    %cst_73 = arith.constant dense<0.000000e+00> : vector<8x32xf32>
    %181 = tpu.matmul %177, %180, %cst_73 {dimension_numbers = #tpu.dot_dimension_numbers<[1], [0], [0], [1], [0, 0, 1, 1], [], []>} : vector<8x64xf32>, vector<64x32xf32>, vector<8x32xf32> -> vector<8x32xf32>
    %182 = arith.index_cast %c0_i32_26 : i32 to index
    %c0_74 = arith.constant 0 : index
    %183 = vector.load %arg18[%182, %c0_74] : memref<2x32xf32, #tpu.memory_space<vmem>>, vector<1x32xf32>
    %184 = vector.shape_cast %183 : vector<1x32xf32> to vector<32xf32>
    %185 = vector.shape_cast %184 : vector<32xf32> to vector<1x32xf32>
    %186 = vector.broadcast %185 : vector<1x32xf32> to vector<8x32xf32>
    %187 = arith.addf %181, %186 : vector<8x32xf32>
    %188 = arith.addf %127, %187 : vector<8x32xf32>
    %189 = arith.index_cast %c0_i32_26 : i32 to index
    %c0_75 = arith.constant 0 : index
    %190 = vector.load %arg19[%189, %c0_75] : memref<2x32xf32, #tpu.memory_space<vmem>>, vector<1x32xf32>
    %191 = vector.shape_cast %190 : vector<1x32xf32> to vector<32xf32>
    %192 = arith.index_cast %c0_i32_26 : i32 to index
    %c0_76 = arith.constant 0 : index
    %193 = vector.load %arg20[%192, %c0_76] : memref<2x32xf32, #tpu.memory_space<vmem>>, vector<1x32xf32>
    %194 = vector.shape_cast %193 : vector<1x32xf32> to vector<32xf32>
    %cst_77 = arith.constant dense<0.000000e+00> : vector<8xf32>
    %195 = vector.multi_reduction <add>, %188, %cst_77 [1] : vector<8x32xf32> to vector<8xf32>
    %196 = vector.shape_cast %195 : vector<8xf32> to vector<8x1xf32>
    %cst_78 = arith.constant 3.200000e+01 : f32
    %197 = vector.broadcast %cst_78 : f32 to vector<8x1xf32>
    %198 = arith.divf %196, %197 : vector<8x1xf32>
    %199 = vector.broadcast %198 : vector<8x1xf32> to vector<8x32xf32>
    %200 = arith.subf %188, %199 : vector<8x32xf32>
    %201 = arith.mulf %200, %200 : vector<8x32xf32>
    %cst_79 = arith.constant dense<0.000000e+00> : vector<8xf32>
    %202 = vector.multi_reduction <add>, %201, %cst_79 [1] : vector<8x32xf32> to vector<8xf32>
    %203 = vector.shape_cast %202 : vector<8xf32> to vector<8x1xf32>
    %cst_80 = arith.constant 3.200000e+01 : f32
    %204 = vector.broadcast %cst_80 : f32 to vector<8x1xf32>
    %205 = arith.divf %203, %204 : vector<8x1xf32>
    %206 = vector.broadcast %198 : vector<8x1xf32> to vector<8x32xf32>
    %207 = arith.subf %188, %206 : vector<8x32xf32>
    %cst_81 = arith.constant 9.99999996E-13 : f32
    %208 = vector.broadcast %cst_81 : f32 to vector<8x1xf32>
    %209 = arith.addf %205, %208 : vector<8x1xf32>
    %210 = math.rsqrt %209 : vector<8x1xf32>
    %211 = vector.broadcast %210 : vector<8x1xf32> to vector<8x32xf32>
    %212 = arith.mulf %207, %211 : vector<8x32xf32>
    %213 = vector.shape_cast %191 : vector<32xf32> to vector<1x32xf32>
    %214 = vector.broadcast %213 : vector<1x32xf32> to vector<8x32xf32>
    %215 = arith.mulf %212, %214 : vector<8x32xf32>
    %216 = vector.shape_cast %194 : vector<32xf32> to vector<1x32xf32>
    %217 = vector.broadcast %216 : vector<1x32xf32> to vector<8x32xf32>
    %218 = arith.addf %215, %217 : vector<8x32xf32>
    %c1_i32 = arith.constant 1 : i32
    %219 = vector.shape_cast %218 : vector<8x32xf32> to vector<1x8x32xf32>
    %220 = vector.broadcast %219 : vector<1x8x32xf32> to vector<12x8x32xf32>
    %221 = arith.index_cast %c1_i32 : i32 to index
    %c0_82 = arith.constant 0 : index
    %c0_83 = arith.constant 0 : index
    %c0_84 = arith.constant 0 : index
    %222 = vector.load %arg9[%221, %c0_82, %c0_83, %c0_84] : memref<2x12x32x8xf32, #tpu.memory_space<vmem>>, vector<1x12x32x8xf32>
    %223 = vector.shape_cast %222 : vector<1x12x32x8xf32> to vector<12x32x8xf32>
    "tpu.trace_start"() <{level = 10 : i32, message = "hlk,hkd->hld"}> : () -> ()
    %cst_85 = arith.constant dense<0.000000e+00> : vector<12x8x8xf32>
    %224 = tpu.matmul %220, %223, %cst_85 {dimension_numbers = #tpu.dot_dimension_numbers<[2], [1], [1], [2], [0, 0, 0, 1, 1, 2], [0], [0]>} : vector<12x8x32xf32>, vector<12x32x8xf32>, vector<12x8x8xf32> -> vector<12x8x8xf32>
    "tpu.trace_stop"() : () -> ()
    %225 = arith.index_cast %c1_i32 : i32 to index
    %c0_86 = arith.constant 0 : index
    %c0_87 = arith.constant 0 : index
    %c0_88 = arith.constant 0 : index
    %226 = vector.load %arg10[%225, %c0_86, %c0_87, %c0_88] : memref<2x12x1x8xf32, #tpu.memory_space<vmem>>, vector<1x12x1x8xf32>
    %227 = vector.shape_cast %226 : vector<1x12x1x8xf32> to vector<12x1x8xf32>
    %228 = vector.broadcast %227 : vector<12x1x8xf32> to vector<12x8x8xf32>
    %229 = arith.addf %224, %228 : vector<12x8x8xf32>
    %230 = vector.extract_strided_slice %229 {offsets = [0, 0, 0], sizes = [4, 8, 8], strides = [1, 1, 1]} : vector<12x8x8xf32> to vector<4x8x8xf32>
    %231 = vector.extract_strided_slice %229 {offsets = [4, 0, 0], sizes = [4, 8, 8], strides = [1, 1, 1]} : vector<12x8x8xf32> to vector<4x8x8xf32>
    %232 = vector.extract_strided_slice %229 {offsets = [8, 0, 0], sizes = [4, 8, 8], strides = [1, 1, 1]} : vector<12x8x8xf32> to vector<4x8x8xf32>
    "tpu.trace_start"() <{level = 10 : i32, message = "hld,hmd->hlm"}> : () -> ()
    %cst_89 = arith.constant dense<0.000000e+00> : vector<4x8x8xf32>
    %233 = tpu.matmul %230, %231, %cst_89 {dimension_numbers = #tpu.dot_dimension_numbers<[2], [2], [1], [1], [0, 0, 0, 1, 1, 1], [0], [0]>} : vector<4x8x8xf32>, vector<4x8x8xf32>, vector<4x8x8xf32> -> vector<4x8x8xf32>
    "tpu.trace_stop"() : () -> ()
    %cst_90 = arith.constant 0.353553385 : f32
    %234 = vector.broadcast %cst_90 : f32 to vector<4x8x8xf32>
    %235 = arith.mulf %233, %234 : vector<4x8x8xf32>
    %236 = vector.broadcast %55 : vector<1x1x8xf32> to vector<4x8x8xf32>
    %237 = arith.addf %235, %236 : vector<4x8x8xf32>
    %cst_91 = arith.constant dense<0xFF800000> : vector<4x8xf32>
    %238 = vector.multi_reduction <maximumf>, %237, %cst_91 [2] : vector<4x8x8xf32> to vector<4x8xf32>
    %239 = vector.shape_cast %238 : vector<4x8xf32> to vector<4x8x1xf32>
    %240 = vector.broadcast %239 : vector<4x8x1xf32> to vector<4x8x8xf32>
    %241 = arith.subf %237, %240 : vector<4x8x8xf32>
    %242 = math.exp %241 : vector<4x8x8xf32>
    %cst_92 = arith.constant dense<0.000000e+00> : vector<4x8xf32>
    %243 = vector.multi_reduction <add>, %242, %cst_92 [2] : vector<4x8x8xf32> to vector<4x8xf32>
    %244 = vector.shape_cast %243 : vector<4x8xf32> to vector<4x8x1xf32>
    %245 = tpu.reciprocal %244 {approx = true} : vector<4x8x1xf32> -> vector<4x8x1xf32>
    %246 = vector.broadcast %245 : vector<4x8x1xf32> to vector<4x8x8xf32>
    %247 = arith.mulf %242, %246 : vector<4x8x8xf32>
    "tpu.trace_start"() <{level = 10 : i32, message = "hlm,hmd->hld"}> : () -> ()
    %cst_93 = arith.constant dense<0.000000e+00> : vector<4x8x8xf32>
    %248 = tpu.matmul %247, %232, %cst_93 {dimension_numbers = #tpu.dot_dimension_numbers<[2], [1], [1], [2], [0, 0, 0, 1, 1, 2], [0], [0]>} : vector<4x8x8xf32>, vector<4x8x8xf32>, vector<4x8x8xf32> -> vector<4x8x8xf32>
    "tpu.trace_stop"() : () -> ()
    %249 = arith.index_cast %c1_i32 : i32 to index
    %c0_94 = arith.constant 0 : index
    %c0_95 = arith.constant 0 : index
    %c0_96 = arith.constant 0 : index
    %250 = vector.load %arg11[%249, %c0_94, %c0_95, %c0_96] : memref<2x4x8x32xf32, #tpu.memory_space<vmem>>, vector<1x4x8x32xf32>
    %251 = vector.shape_cast %250 : vector<1x4x8x32xf32> to vector<4x8x32xf32>
    "tpu.trace_start"() <{level = 10 : i32, message = "hld,hdo->hlo"}> : () -> ()
    %cst_97 = arith.constant dense<0.000000e+00> : vector<4x8x32xf32>
    %252 = tpu.matmul %248, %251, %cst_97 {dimension_numbers = #tpu.dot_dimension_numbers<[2], [1], [1], [2], [0, 0, 0, 1, 1, 2], [0], [0]>} : vector<4x8x8xf32>, vector<4x8x32xf32>, vector<4x8x32xf32> -> vector<4x8x32xf32>
    "tpu.trace_stop"() : () -> ()
    %cst_98 = arith.constant dense<0.000000e+00> : vector<8x32xf32>
    %253 = vector.multi_reduction <add>, %252, %cst_98 [0] : vector<4x8x32xf32> to vector<8x32xf32>
    %254 = arith.index_cast %c1_i32 : i32 to index
    %c0_99 = arith.constant 0 : index
    %255 = vector.load %arg12[%254, %c0_99] : memref<2x32xf32, #tpu.memory_space<vmem>>, vector<1x32xf32>
    %256 = vector.shape_cast %255 : vector<1x32xf32> to vector<32xf32>
    %257 = vector.shape_cast %256 : vector<32xf32> to vector<1x32xf32>
    %258 = vector.broadcast %257 : vector<1x32xf32> to vector<8x32xf32>
    %259 = arith.addf %253, %258 : vector<8x32xf32>
    %260 = arith.addf %218, %259 : vector<8x32xf32>
    %261 = arith.index_cast %c1_i32 : i32 to index
    %c0_100 = arith.constant 0 : index
    %262 = vector.load %arg13[%261, %c0_100] : memref<2x32xf32, #tpu.memory_space<vmem>>, vector<1x32xf32>
    %263 = vector.shape_cast %262 : vector<1x32xf32> to vector<32xf32>
    %264 = arith.index_cast %c1_i32 : i32 to index
    %c0_101 = arith.constant 0 : index
    %265 = vector.load %arg14[%264, %c0_101] : memref<2x32xf32, #tpu.memory_space<vmem>>, vector<1x32xf32>
    %266 = vector.shape_cast %265 : vector<1x32xf32> to vector<32xf32>
    %cst_102 = arith.constant dense<0.000000e+00> : vector<8xf32>
    %267 = vector.multi_reduction <add>, %260, %cst_102 [1] : vector<8x32xf32> to vector<8xf32>
    %268 = vector.shape_cast %267 : vector<8xf32> to vector<8x1xf32>
    %cst_103 = arith.constant 3.200000e+01 : f32
    %269 = vector.broadcast %cst_103 : f32 to vector<8x1xf32>
    %270 = arith.divf %268, %269 : vector<8x1xf32>
    %271 = vector.broadcast %270 : vector<8x1xf32> to vector<8x32xf32>
    %272 = arith.subf %260, %271 : vector<8x32xf32>
    %273 = arith.mulf %272, %272 : vector<8x32xf32>
    %cst_104 = arith.constant dense<0.000000e+00> : vector<8xf32>
    %274 = vector.multi_reduction <add>, %273, %cst_104 [1] : vector<8x32xf32> to vector<8xf32>
    %275 = vector.shape_cast %274 : vector<8xf32> to vector<8x1xf32>
    %cst_105 = arith.constant 3.200000e+01 : f32
    %276 = vector.broadcast %cst_105 : f32 to vector<8x1xf32>
    %277 = arith.divf %275, %276 : vector<8x1xf32>
    %278 = vector.broadcast %270 : vector<8x1xf32> to vector<8x32xf32>
    %279 = arith.subf %260, %278 : vector<8x32xf32>
    %cst_106 = arith.constant 9.99999996E-13 : f32
    %280 = vector.broadcast %cst_106 : f32 to vector<8x1xf32>
    %281 = arith.addf %277, %280 : vector<8x1xf32>
    %282 = math.rsqrt %281 : vector<8x1xf32>
    %283 = vector.broadcast %282 : vector<8x1xf32> to vector<8x32xf32>
    %284 = arith.mulf %279, %283 : vector<8x32xf32>
    %285 = vector.shape_cast %263 : vector<32xf32> to vector<1x32xf32>
    %286 = vector.broadcast %285 : vector<1x32xf32> to vector<8x32xf32>
    %287 = arith.mulf %284, %286 : vector<8x32xf32>
    %288 = vector.shape_cast %266 : vector<32xf32> to vector<1x32xf32>
    %289 = vector.broadcast %288 : vector<1x32xf32> to vector<8x32xf32>
    %290 = arith.addf %287, %289 : vector<8x32xf32>
    %291 = arith.index_cast %c1_i32 : i32 to index
    %c0_107 = arith.constant 0 : index
    %c0_108 = arith.constant 0 : index
    %292 = vector.load %arg15[%291, %c0_107, %c0_108] : memref<2x32x64xf32, #tpu.memory_space<vmem>>, vector<1x32x64xf32>
    %293 = vector.shape_cast %292 : vector<1x32x64xf32> to vector<32x64xf32>
    %cst_109 = arith.constant dense<0.000000e+00> : vector<8x64xf32>
    %294 = tpu.matmul %290, %293, %cst_109 {dimension_numbers = #tpu.dot_dimension_numbers<[1], [0], [0], [1], [0, 0, 1, 1], [], []>} : vector<8x32xf32>, vector<32x64xf32>, vector<8x64xf32> -> vector<8x64xf32>
    %295 = arith.index_cast %c1_i32 : i32 to index
    %c0_110 = arith.constant 0 : index
    %296 = vector.load %arg16[%295, %c0_110] : memref<2x64xf32, #tpu.memory_space<vmem>>, vector<1x64xf32>
    %297 = vector.shape_cast %296 : vector<1x64xf32> to vector<64xf32>
    %298 = vector.shape_cast %297 : vector<64xf32> to vector<1x64xf32>
    %299 = vector.broadcast %298 : vector<1x64xf32> to vector<8x64xf32>
    %300 = arith.addf %294, %299 : vector<8x64xf32>
    %cst_111 = arith.constant 5.000000e-01 : f32
    %301 = vector.broadcast %cst_111 : f32 to vector<8x64xf32>
    %302 = arith.mulf %301, %300 : vector<8x64xf32>
    %cst_112 = arith.constant 0.707106769 : f32
    %303 = vector.broadcast %cst_112 : f32 to vector<8x64xf32>
    %304 = arith.mulf %300, %303 : vector<8x64xf32>
    %cst_113 = arith.constant 0.000000e+00 : f32
    %305 = vector.broadcast %cst_113 : f32 to vector<8x64xf32>
    %306 = arith.cmpf olt, %304, %305 : vector<8x64xf32>
    %cst_114 = arith.constant -1.000000e+00 : f32
    %cst_115 = arith.constant 1.000000e+00 : f32
    %307 = vector.broadcast %cst_114 : f32 to vector<8x64xf32>
    %308 = vector.broadcast %cst_115 : f32 to vector<8x64xf32>
    %309 = arith.select %306, %307, %308 : vector<8x64xi1>, vector<8x64xf32>
    %310 = math.absf %304 : vector<8x64xf32>
    %cst_116 = arith.constant 0.327591091 : f32
    %311 = vector.broadcast %cst_116 : f32 to vector<8x64xf32>
    %312 = arith.mulf %311, %310 : vector<8x64xf32>
    %cst_117 = arith.constant 1.000000e+00 : f32
    %313 = vector.broadcast %cst_117 : f32 to vector<8x64xf32>
    %314 = arith.addf %313, %312 : vector<8x64xf32>
    %315 = tpu.reciprocal %314 {approx = true} : vector<8x64xf32> -> vector<8x64xf32>
    %cst_118 = arith.constant 1.06140542 : f32
    %316 = vector.broadcast %cst_118 : f32 to vector<8x64xf32>
    %317 = arith.mulf %316, %315 : vector<8x64xf32>
    %cst_119 = arith.constant -1.45315206 : f32
    %318 = vector.broadcast %cst_119 : f32 to vector<8x64xf32>
    %319 = arith.addf %317, %318 : vector<8x64xf32>
    %320 = arith.mulf %319, %315 : vector<8x64xf32>
    %cst_120 = arith.constant 1.42141378 : f32
    %321 = vector.broadcast %cst_120 : f32 to vector<8x64xf32>
    %322 = arith.addf %320, %321 : vector<8x64xf32>
    %323 = arith.mulf %322, %315 : vector<8x64xf32>
    %cst_121 = arith.constant -0.284496725 : f32
    %324 = vector.broadcast %cst_121 : f32 to vector<8x64xf32>
    %325 = arith.addf %323, %324 : vector<8x64xf32>
    %326 = arith.mulf %325, %315 : vector<8x64xf32>
    %cst_122 = arith.constant 0.254829586 : f32
    %327 = vector.broadcast %cst_122 : f32 to vector<8x64xf32>
    %328 = arith.addf %326, %327 : vector<8x64xf32>
    %329 = arith.mulf %328, %315 : vector<8x64xf32>
    %cst_123 = arith.constant 0.000000e+00 : f32
    %330 = vector.broadcast %cst_123 : f32 to vector<8x64xf32>
    %331 = arith.subf %330, %310 : vector<8x64xf32>
    %332 = arith.mulf %331, %310 : vector<8x64xf32>
    %333 = math.exp %332 : vector<8x64xf32>
    %334 = arith.mulf %329, %333 : vector<8x64xf32>
    %cst_124 = arith.constant 1.000000e+00 : f32
    %335 = vector.broadcast %cst_124 : f32 to vector<8x64xf32>
    %336 = arith.subf %335, %334 : vector<8x64xf32>
    %337 = arith.mulf %309, %336 : vector<8x64xf32>
    %cst_125 = arith.constant 1.000000e+00 : f32
    %338 = vector.broadcast %cst_125 : f32 to vector<8x64xf32>
    %339 = arith.addf %338, %337 : vector<8x64xf32>
    %340 = arith.mulf %302, %339 : vector<8x64xf32>
    %341 = arith.index_cast %c1_i32 : i32 to index
    %c0_126 = arith.constant 0 : index
    %c0_127 = arith.constant 0 : index
    %342 = vector.load %arg17[%341, %c0_126, %c0_127] : memref<2x64x32xf32, #tpu.memory_space<vmem>>, vector<1x64x32xf32>
    %343 = vector.shape_cast %342 : vector<1x64x32xf32> to vector<64x32xf32>
    %cst_128 = arith.constant dense<0.000000e+00> : vector<8x32xf32>
    %344 = tpu.matmul %340, %343, %cst_128 {dimension_numbers = #tpu.dot_dimension_numbers<[1], [0], [0], [1], [0, 0, 1, 1], [], []>} : vector<8x64xf32>, vector<64x32xf32>, vector<8x32xf32> -> vector<8x32xf32>
    %345 = arith.index_cast %c1_i32 : i32 to index
    %c0_129 = arith.constant 0 : index
    %346 = vector.load %arg18[%345, %c0_129] : memref<2x32xf32, #tpu.memory_space<vmem>>, vector<1x32xf32>
    %347 = vector.shape_cast %346 : vector<1x32xf32> to vector<32xf32>
    %348 = vector.shape_cast %347 : vector<32xf32> to vector<1x32xf32>
    %349 = vector.broadcast %348 : vector<1x32xf32> to vector<8x32xf32>
    %350 = arith.addf %344, %349 : vector<8x32xf32>
    %351 = arith.addf %290, %350 : vector<8x32xf32>
    %352 = arith.index_cast %c1_i32 : i32 to index
    %c0_130 = arith.constant 0 : index
    %353 = vector.load %arg19[%352, %c0_130] : memref<2x32xf32, #tpu.memory_space<vmem>>, vector<1x32xf32>
    %354 = vector.shape_cast %353 : vector<1x32xf32> to vector<32xf32>
    %355 = arith.index_cast %c1_i32 : i32 to index
    %c0_131 = arith.constant 0 : index
    %356 = vector.load %arg20[%355, %c0_131] : memref<2x32xf32, #tpu.memory_space<vmem>>, vector<1x32xf32>
    %357 = vector.shape_cast %356 : vector<1x32xf32> to vector<32xf32>
    %cst_132 = arith.constant dense<0.000000e+00> : vector<8xf32>
    %358 = vector.multi_reduction <add>, %351, %cst_132 [1] : vector<8x32xf32> to vector<8xf32>
    %359 = vector.shape_cast %358 : vector<8xf32> to vector<8x1xf32>
    %cst_133 = arith.constant 3.200000e+01 : f32
    %360 = vector.broadcast %cst_133 : f32 to vector<8x1xf32>
    %361 = arith.divf %359, %360 : vector<8x1xf32>
    %362 = vector.broadcast %361 : vector<8x1xf32> to vector<8x32xf32>
    %363 = arith.subf %351, %362 : vector<8x32xf32>
    %364 = arith.mulf %363, %363 : vector<8x32xf32>
    %cst_134 = arith.constant dense<0.000000e+00> : vector<8xf32>
    %365 = vector.multi_reduction <add>, %364, %cst_134 [1] : vector<8x32xf32> to vector<8xf32>
    %366 = vector.shape_cast %365 : vector<8xf32> to vector<8x1xf32>
    %cst_135 = arith.constant 3.200000e+01 : f32
    %367 = vector.broadcast %cst_135 : f32 to vector<8x1xf32>
    %368 = arith.divf %366, %367 : vector<8x1xf32>
    %369 = vector.broadcast %361 : vector<8x1xf32> to vector<8x32xf32>
    %370 = arith.subf %351, %369 : vector<8x32xf32>
    %cst_136 = arith.constant 9.99999996E-13 : f32
    %371 = vector.broadcast %cst_136 : f32 to vector<8x1xf32>
    %372 = arith.addf %368, %371 : vector<8x1xf32>
    %373 = math.rsqrt %372 : vector<8x1xf32>
    %374 = vector.broadcast %373 : vector<8x1xf32> to vector<8x32xf32>
    %375 = arith.mulf %370, %374 : vector<8x32xf32>
    %376 = vector.shape_cast %354 : vector<32xf32> to vector<1x32xf32>
    %377 = vector.broadcast %376 : vector<1x32xf32> to vector<8x32xf32>
    %378 = arith.mulf %375, %377 : vector<8x32xf32>
    %379 = vector.shape_cast %357 : vector<32xf32> to vector<1x32xf32>
    %380 = vector.broadcast %379 : vector<1x32xf32> to vector<8x32xf32>
    %381 = arith.addf %378, %380 : vector<8x32xf32>
    %c2_i32 = arith.constant 2 : i32
    %cst_137 = arith.constant 0.000000e+00 : f32
    %382 = vector.broadcast %cst_137 : f32 to vector<3x32xf32>
    %383 = tpu.concatenate %381, %382 in 0 : vector<8x32xf32>, vector<3x32xf32> -> vector<11x32xf32>
    %c0_138 = arith.constant 0 : index
    %c0_139 = arith.constant 0 : index
    %c0_140 = arith.constant 0 : index
    %384 = vector.load %arg21[%c0_138, %c0_139, %c0_140] : memref<4x32x192xf32, #tpu.memory_space<vmem>>, vector<1x32x192xf32>
    %385 = vector.shape_cast %384 : vector<1x32x192xf32> to vector<32x192xf32>
    %cst_141 = arith.constant dense<0.000000e+00> : vector<8x192xf32>
    %386 = tpu.matmul %381, %385, %cst_141 {dimension_numbers = #tpu.dot_dimension_numbers<[1], [0], [0], [1], [0, 0, 1, 1], [], []>} : vector<8x32xf32>, vector<32x192xf32>, vector<8x192xf32> -> vector<8x192xf32>
    %387 = vector.extract_strided_slice %383 {offsets = [1, 0], sizes = [8, 32], strides = [1, 1]} : vector<11x32xf32> to vector<8x32xf32>
    %c1_142 = arith.constant 1 : index
    %c0_143 = arith.constant 0 : index
    %c0_144 = arith.constant 0 : index
    %388 = vector.load %arg21[%c1_142, %c0_143, %c0_144] : memref<4x32x192xf32, #tpu.memory_space<vmem>>, vector<1x32x192xf32>
    %389 = vector.shape_cast %388 : vector<1x32x192xf32> to vector<32x192xf32>
    %cst_145 = arith.constant dense<0.000000e+00> : vector<8x192xf32>
    %390 = tpu.matmul %387, %389, %cst_145 {dimension_numbers = #tpu.dot_dimension_numbers<[1], [0], [0], [1], [0, 0, 1, 1], [], []>} : vector<8x32xf32>, vector<32x192xf32>, vector<8x192xf32> -> vector<8x192xf32>
    %391 = arith.addf %386, %390 : vector<8x192xf32>
    %392 = vector.extract_strided_slice %383 {offsets = [2, 0], sizes = [8, 32], strides = [1, 1]} : vector<11x32xf32> to vector<8x32xf32>
    %c2 = arith.constant 2 : index
    %c0_146 = arith.constant 0 : index
    %c0_147 = arith.constant 0 : index
    %393 = vector.load %arg21[%c2, %c0_146, %c0_147] : memref<4x32x192xf32, #tpu.memory_space<vmem>>, vector<1x32x192xf32>
    %394 = vector.shape_cast %393 : vector<1x32x192xf32> to vector<32x192xf32>
    %cst_148 = arith.constant dense<0.000000e+00> : vector<8x192xf32>
    %395 = tpu.matmul %392, %394, %cst_148 {dimension_numbers = #tpu.dot_dimension_numbers<[1], [0], [0], [1], [0, 0, 1, 1], [], []>} : vector<8x32xf32>, vector<32x192xf32>, vector<8x192xf32> -> vector<8x192xf32>
    %396 = arith.addf %391, %395 : vector<8x192xf32>
    %397 = vector.extract_strided_slice %383 {offsets = [3, 0], sizes = [8, 32], strides = [1, 1]} : vector<11x32xf32> to vector<8x32xf32>
    %c3 = arith.constant 3 : index
    %c0_149 = arith.constant 0 : index
    %c0_150 = arith.constant 0 : index
    %398 = vector.load %arg21[%c3, %c0_149, %c0_150] : memref<4x32x192xf32, #tpu.memory_space<vmem>>, vector<1x32x192xf32>
    %399 = vector.shape_cast %398 : vector<1x32x192xf32> to vector<32x192xf32>
    %cst_151 = arith.constant dense<0.000000e+00> : vector<8x192xf32>
    %400 = tpu.matmul %397, %399, %cst_151 {dimension_numbers = #tpu.dot_dimension_numbers<[1], [0], [0], [1], [0, 0, 1, 1], [], []>} : vector<8x32xf32>, vector<32x192xf32>, vector<8x192xf32> -> vector<8x192xf32>
    %401 = arith.addf %396, %400 : vector<8x192xf32>
    %c0_152 = arith.constant 0 : index
    %c0_153 = arith.constant 0 : index
    %402 = vector.load %arg22[%c0_152, %c0_153] : memref<1x192xf32, #tpu.memory_space<vmem>>, vector<1x192xf32>
    %403 = vector.broadcast %402 : vector<1x192xf32> to vector<8x192xf32>
    %404 = arith.addf %401, %403 : vector<8x192xf32>
    %cst_154 = arith.constant 0.000000e+00 : f32
    %405 = vector.broadcast %cst_154 : f32 to vector<8x192xf32>
    %406 = arith.maximumf %404, %405 : vector<8x192xf32>
    %c0_155 = arith.constant 0 : index
    %c0_156 = arith.constant 0 : index
    %407 = vector.load %arg23[%c0_155, %c0_156] : memref<8x192xf32, #tpu.memory_space<vmem>>, vector<8x192xf32>
    %408 = arith.mulf %406, %407 : vector<8x192xf32>
    %cst_157 = arith.constant dense<0xFF800000> : vector<192xf32>
    %409 = vector.multi_reduction <maximumf>, %408, %cst_157 [0] : vector<8x192xf32> to vector<192xf32>
    %410 = vector.shape_cast %409 : vector<192xf32> to vector<1x192xf32>
    %c0_158 = arith.constant 0 : index
    %c0_159 = arith.constant 0 : index
    %411 = vector.load %arg24[%c0_158, %c0_159] : memref<192x2xf32, #tpu.memory_space<vmem>>, vector<192x2xf32>
    %cst_160 = arith.constant dense<0.000000e+00> : vector<1x2xf32>
    %412 = tpu.matmul %410, %411, %cst_160 {dimension_numbers = #tpu.dot_dimension_numbers<[1], [0], [0], [1], [0, 0, 1, 1], [], []>} : vector<1x192xf32>, vector<192x2xf32>, vector<1x2xf32> -> vector<1x2xf32>
    %c0_161 = arith.constant 0 : index
    %c0_162 = arith.constant 0 : index
    %413 = vector.load %arg25[%c0_161, %c0_162] : memref<1x2xf32, #tpu.memory_space<vmem>>, vector<1x2xf32>
    %414 = arith.addf %412, %413 : vector<1x2xf32>
    %cst_163 = arith.constant dense<0xFF800000> : vector<1xf32>
    %415 = vector.multi_reduction <maximumf>, %414, %cst_163 [1] : vector<1x2xf32> to vector<1xf32>
    %416 = vector.shape_cast %415 : vector<1xf32> to vector<1x1xf32>
    %417 = vector.broadcast %416 : vector<1x1xf32> to vector<1x2xf32>
    %418 = arith.subf %414, %417 : vector<1x2xf32>
    %419 = math.exp %418 : vector<1x2xf32>
    %cst_164 = arith.constant dense<0.000000e+00> : vector<1xf32>
    %420 = vector.multi_reduction <add>, %419, %cst_164 [1] : vector<1x2xf32> to vector<1xf32>
    %421 = vector.shape_cast %420 : vector<1xf32> to vector<1x1xf32>
    %422 = tpu.reciprocal %421 {approx = true} : vector<1x1xf32> -> vector<1x1xf32>
    %423 = vector.broadcast %422 : vector<1x1xf32> to vector<1x2xf32>
    %424 = arith.mulf %419, %423 : vector<1x2xf32>
    %425 = vector.shape_cast %424 : vector<1x2xf32> to vector<1x1x2xf32>
    %c0_165 = arith.constant 0 : index
    %c0_166 = arith.constant 0 : index
    %c0_167 = arith.constant 0 : index
    %426 = vector.load %arg26[%c0_165, %c0_166, %c0_167] : memref<1x1x2xf32, #tpu.memory_space<vmem>>, vector<1x1x2xf32>
    tpu.vector_store %arg26[%c0_165, %c0_166, %c0_167], %425 {strides = array<i32>} : memref<1x1x2xf32, #tpu.memory_space<vmem>>, vector<1x1x2xf32>,
    return
  }
  func.func @transform_0(%arg0: i32) -> (i32, i32, i32) {
    %c0_i32 = arith.constant 0 : i32
    %c0_i32_0 = arith.constant 0 : i32
    %c0_i32_1 = arith.constant 0 : i32
    return %arg0, %c0_i32, %c0_i32_0 : i32, i32, i32
  }
  func.func @transform_1(%arg0: i32) -> (i32, i32, i32) {
    %c0_i32 = arith.constant 0 : i32
    %c0_i32_0 = arith.constant 0 : i32
    %c0_i32_1 = arith.constant 0 : i32
    return %arg0, %c0_i32, %c0_i32_0 : i32, i32, i32
  }
  func.func @transform_2(%arg0: i32) -> (i32, i32, i32) {
    %c0_i32 = arith.constant 0 : i32
    %c0_i32_0 = arith.constant 0 : i32
    %c0_i32_1 = arith.constant 0 : i32
    return %arg0, %c0_i32, %c0_i32_0 : i32, i32, i32
  }
  func.func @transform_3(%arg0: i32) -> (i32, i32) {
    %c0_i32 = arith.constant 0 : i32
    %c0_i32_0 = arith.constant 0 : i32
    %c0_i32_1 = arith.constant 0 : i32
    return %c0_i32, %c0_i32_0 : i32, i32
  }
  func.func @transform_4(%arg0: i32) -> (i32, i32) {
    %c0_i32 = arith.constant 0 : i32
    %c0_i32_0 = arith.constant 0 : i32
    %c0_i32_1 = arith.constant 0 : i32
    return %c0_i32, %c0_i32_0 : i32, i32
  }
  func.func @transform_5(%arg0: i32) -> (i32, i32) {
    %c0_i32 = arith.constant 0 : i32
    %c0_i32_0 = arith.constant 0 : i32
    %c0_i32_1 = arith.constant 0 : i32
    return %c0_i32, %c0_i32_0 : i32, i32
  }
  func.func @transform_6(%arg0: i32) -> (i32, i32) {
    %c0_i32 = arith.constant 0 : i32
    %c0_i32_0 = arith.constant 0 : i32
    %c0_i32_1 = arith.constant 0 : i32
    return %c0_i32, %c0_i32_0 : i32, i32
  }
  func.func @transform_7(%arg0: i32) -> (i32, i32) {
    %c0_i32 = arith.constant 0 : i32
    %c0_i32_0 = arith.constant 0 : i32
    %c0_i32_1 = arith.constant 0 : i32
    return %c0_i32, %c0_i32_0 : i32, i32
  }
  func.func @transform_8(%arg0: i32) -> (i32, i32, i32, i32) {
    %c0_i32 = arith.constant 0 : i32
    %c0_i32_0 = arith.constant 0 : i32
    %c0_i32_1 = arith.constant 0 : i32
    %c0_i32_2 = arith.constant 0 : i32
    %c0_i32_3 = arith.constant 0 : i32
    return %c0_i32, %c0_i32_0, %c0_i32_1, %c0_i32_2 : i32, i32, i32, i32
  }
  func.func @transform_9(%arg0: i32) -> (i32, i32, i32, i32) {
    %c0_i32 = arith.constant 0 : i32
    %c0_i32_0 = arith.constant 0 : i32
    %c0_i32_1 = arith.constant 0 : i32
    %c0_i32_2 = arith.constant 0 : i32
    %c0_i32_3 = arith.constant 0 : i32
    return %c0_i32, %c0_i32_0, %c0_i32_1, %c0_i32_2 : i32, i32, i32, i32
  }
  func.func @transform_10(%arg0: i32) -> (i32, i32, i32, i32) {
    %c0_i32 = arith.constant 0 : i32
    %c0_i32_0 = arith.constant 0 : i32
    %c0_i32_1 = arith.constant 0 : i32
    %c0_i32_2 = arith.constant 0 : i32
    %c0_i32_3 = arith.constant 0 : i32
    return %c0_i32, %c0_i32_0, %c0_i32_1, %c0_i32_2 : i32, i32, i32, i32
  }
  func.func @transform_11(%arg0: i32) -> (i32, i32) {
    %c0_i32 = arith.constant 0 : i32
    %c0_i32_0 = arith.constant 0 : i32
    %c0_i32_1 = arith.constant 0 : i32
    return %c0_i32, %c0_i32_0 : i32, i32
  }
  func.func @transform_12(%arg0: i32) -> (i32, i32) {
    %c0_i32 = arith.constant 0 : i32
    %c0_i32_0 = arith.constant 0 : i32
    %c0_i32_1 = arith.constant 0 : i32
    return %c0_i32, %c0_i32_0 : i32, i32
  }
  func.func @transform_13(%arg0: i32) -> (i32, i32) {
    %c0_i32 = arith.constant 0 : i32
    %c0_i32_0 = arith.constant 0 : i32
    %c0_i32_1 = arith.constant 0 : i32
    return %c0_i32, %c0_i32_0 : i32, i32
  }
  func.func @transform_14(%arg0: i32) -> (i32, i32, i32) {
    %c0_i32 = arith.constant 0 : i32
    %c0_i32_0 = arith.constant 0 : i32
    %c0_i32_1 = arith.constant 0 : i32
    %c0_i32_2 = arith.constant 0 : i32
    return %c0_i32, %c0_i32_0, %c0_i32_1 : i32, i32, i32
  }
  func.func @transform_15(%arg0: i32) -> (i32, i32) {
    %c0_i32 = arith.constant 0 : i32
    %c0_i32_0 = arith.constant 0 : i32
    %c0_i32_1 = arith.constant 0 : i32
    return %c0_i32, %c0_i32_0 : i32, i32
  }
  func.func @transform_16(%arg0: i32) -> (i32, i32, i32) {
    %c0_i32 = arith.constant 0 : i32
    %c0_i32_0 = arith.constant 0 : i32
    %c0_i32_1 = arith.constant 0 : i32
    %c0_i32_2 = arith.constant 0 : i32
    return %c0_i32, %c0_i32_0, %c0_i32_1 : i32, i32, i32
  }
  func.func @transform_17(%arg0: i32) -> (i32, i32) {
    %c0_i32 = arith.constant 0 : i32
    %c0_i32_0 = arith.constant 0 : i32
    %c0_i32_1 = arith.constant 0 : i32
    return %c0_i32, %c0_i32_0 : i32, i32
  }
  func.func @transform_18(%arg0: i32) -> (i32, i32) {
    %c0_i32 = arith.constant 0 : i32
    %c0_i32_0 = arith.constant 0 : i32
    %c0_i32_1 = arith.constant 0 : i32
    return %c0_i32, %c0_i32_0 : i32, i32
  }
  func.func @transform_19(%arg0: i32) -> (i32, i32) {
    %c0_i32 = arith.constant 0 : i32
    %c0_i32_0 = arith.constant 0 : i32
    %c0_i32_1 = arith.constant 0 : i32
    return %c0_i32, %c0_i32_0 : i32, i32
  }
  func.func @transform_20(%arg0: i32) -> (i32, i32, i32) {
    %c0_i32 = arith.constant 0 : i32
    %c0_i32_0 = arith.constant 0 : i32
    %c0_i32_1 = arith.constant 0 : i32
    %c0_i32_2 = arith.constant 0 : i32
    return %c0_i32, %c0_i32_0, %c0_i32_1 : i32, i32, i32
  }
  func.func @transform_21(%arg0: i32) -> (i32, i32) {
    %c0_i32 = arith.constant 0 : i32
    %c0_i32_0 = arith.constant 0 : i32
    %c0_i32_1 = arith.constant 0 : i32
    return %c0_i32, %c0_i32_0 : i32, i32
  }
  func.func @transform_22(%arg0: i32) -> (i32, i32) {
    %c0_i32 = arith.constant 0 : i32
    %c0_i32_0 = arith.constant 0 : i32
    %c0_i32_1 = arith.constant 0 : i32
    return %c0_i32, %c0_i32_0 : i32, i32
  }
  func.func @transform_23(%arg0: i32) -> (i32, i32) {
    %c0_i32 = arith.constant 0 : i32
    %c0_i32_0 = arith.constant 0 : i32
    %c0_i32_1 = arith.constant 0 : i32
    return %c0_i32, %c0_i32_0 : i32, i32
  }
  func.func @transform_24(%arg0: i32) -> (i32, i32) {
    %c0_i32 = arith.constant 0 : i32
    %c0_i32_0 = arith.constant 0 : i32
    %c0_i32_1 = arith.constant 0 : i32
    return %c0_i32, %c0_i32_0 : i32, i32
  }
  func.func @transform_25(%arg0: i32) -> (i32, i32, i32) {
    %c0_i32 = arith.constant 0 : i32
    %c0_i32_0 = arith.constant 0 : i32
    %c0_i32_1 = arith.constant 0 : i32
    return %arg0, %c0_i32, %c0_i32_0 : i32, i32, i32
  }
}

</mosaic_0001>

<bundles_post_ra>
// kernel: bert_cnn_forward.1
= control target key start
LH: loop header
LB: loop body
LE: loop exit
PB: predicated region body
PF: predicated region fallthrough
CT: control target
= control target key end

     0   :  { %s8614_s0 = inlined_call_operand.vmem [shape: s32[2,8,1], index: 0, kind: input, shape index: {}]   ;;  %s8615_s1 = inlined_call_operand.vmem [shape: s32[2,8,1], index: 1, kind: input, shape index: {}]   ;;  %s8616_s2 = inlined_call_operand.vmem [shape: f32[2,1,8], index: 2, kind: input, shape index: {}]   ;;  %s8617_s3 = inlined_call_operand.vmem [shape: f32[128,32], index: 3, kind: input, shape index: {}]   ;;  %s8618_s4 = inlined_call_operand.vmem [shape: f32[2,32], index: 4, kind: input, shape index: {}]   ;;  %s8619_s5 = inlined_call_operand.vmem [shape: f32[8,32], index: 5, kind: input, shape index: {}]   ;;  %s8620_s6 = inlined_call_operand.vmem [shape: f32[1,32], index: 6, kind: input, shape index: {}]   ;;  %s8621_s7 = inlined_call_operand.vmem [shape: f32[1,32], index: 7, kind: input, shape index: {}]   ;;  %s8622_s8 = inlined_call_operand.vmem [shape: f32[2,12,32,8], index: 8, kind: input, shape index: {}]   ;;  %s8623_s9 = inlined_call_operand.vmem [shape: f32[2,12,1,8], index: 9, kind: input, shape index: {}]   ;;  %s8624_s10 = inlined_call_operand.vmem [shape: f32[2,4,8,32], index: 10, kind: input, shape index: {}]   ;;  %s8625_s11 = inlined_call_operand.vmem [shape: f32[2,32], index: 11, kind: input, shape index: {}]   ;;  %s8626_s12 = inlined_call_operand.vmem [shape: f32[2,32], index: 12, kind: input, shape index: {}]   ;;  %s8627_s13 = inlined_call_operand.vmem [shape: f32[2,32], index: 13, kind: input, shape index: {}]   ;;  %s8628_s14 = inlined_call_operand.vmem [shape: f32[2,32,64], index: 14, kind: input, shape index: {}]   ;;  %s8629_s15 = inlined_call_operand.vmem [shape: f32[2,64], index: 15, kind: input, shape index: {}]   ;;  %s8630_s16 = inlined_call_operand.vmem [shape: f32[2,64,32], index: 16, kind: input, shape index: {}]   ;;  %s8631_s17 = inlined_call_operand.vmem [shape: f32[2,32], index: 17, kind: input, shape index: {}]   ;;  %s8632_s18 = inlined_call_operand.vmem [shape: f32[2,32], index: 18, kind: input, shape index: {}]   ;;  %s8633_s19 = inlined_call_operand.vmem [shape: f32[2,32], index: 19, kind: input, shape index: {}]   ;;  %s8634_s20 = inlined_call_operand.vmem [shape: f32[4,32,192], index: 20, kind: input, shape index: {}]   ;;  %s8635_s21 = inlined_call_operand.vmem [shape: f32[1,192], index: 21, kind: input, shape index: {}]   ;;  %s8636_s22 = inlined_call_operand.vmem [shape: f32[8,192], index: 22, kind: input, shape index: {}]   ;;  %s8637_s23 = inlined_call_operand.vmem [shape: f32[192,2], index: 23, kind: input, shape index: {}]   ;;  %s8638_s24 = inlined_call_operand.vmem [shape: f32[1,2], index: 24, kind: input, shape index: {}]   ;;  %s8639_s25 = inlined_call_operand.hbm [shape: f32[2,1,2], index: 25, kind: output, shape index: {}]  }
   0x1   :  { %8655 = sst [smem:[#allocation13_spill]] %s8614_s0 }
   0x2   :  { %8656 = sst [smem:[#allocation14_spill]] %s8615_s1 }
   0x3   :  { %8657 = sst [smem:[#allocation15_spill]] %s8616_s2 }
   0x4   :  { %8658 = sst [smem:[#allocation16_spill]] %s8617_s3 }
   0x5   :  { %8659 = sst [smem:[#allocation17_spill]] %s8618_s4 }
   0x6   :  { %8660 = sst [smem:[#allocation18_spill]] %s8619_s5 }
   0x7   :  { %8661 = sst [smem:[#allocation19_spill]] %s8620_s6 }
   0x8   :  { %8662 = sst [smem:[#allocation20_spill]] %s8621_s7 }
   0x9   :  { %8663 = sst [smem:[#allocation21_spill]] %s8622_s8 }
   0xa   :  { %8664 = sst [smem:[#allocation22_spill]] %s8623_s9 }
   0xb   :  { %8665 = sst [smem:[#allocation23_spill]] %s8624_s10 }
   0xc   :  { %8666 = sst [smem:[#allocation24_spill]] %s8625_s11 }
   0xd   :  { %8667 = sst [smem:[#allocation25_spill]] %s8639_s25 }
   0xe   :  { %30 = vsyncpa [#allocation3], 0 }
   0xf   :  { %32 = vsyncpa [#allocation3 + $0x1], 0  ;;  %s7373_s29 = smov 0   ;;  %s7375_s2 = smov 0  }
  0x10   :  { %s7377_s6 = smov 0   ;;  %s7379_s30 = smov 0  }
  0x11 LB: > { %8668 = sst [smem:[#allocation5_spill]] %s7223_s29  ;;  %s7394_s7 = sadd.s32 4294967295, %s7235_s30   ;;  %s7235_s30 = sphi %s7379_s30, %s8696_s30   ;;  %s7231_s6 = sphi %s7377_s6, %s8698_s6   ;;  %s7227_s2 = sphi %s7375_s2, %s8700_s2   ;;  %s7223_s29 = sphi %s7373_s29, %s8699_s29  }
  0x12   : > { %8669 = sst [smem:[#allocation6_spill]] %s7231_s6  ;;  %s5886_s3 = sadd.s32 4294967294, %s7235_s30  }
  0x13   : > { %8670 = sst [smem:[#allocation7_spill]] %s7235_s30  ;;  %s7398_s26 = sadd.s32 1, %s7235_s30  }
  0x14   : > { %8671 = sst [smem:[#allocation8_spill]] %s7394_s7  ;;  %s585_s1 = sadd.s32 1, %s7231_s6 }
  0x15   : > { %8672 = sst [smem:[#allocation9_spill]] %s7398_s26  ;;  %s582_s8 = ssub.s32 %s7235_s30, %s7398_s26 }
  0x16   : > { %p595_p0 = scmp.ne.s32.totalorder %s7231_s6, %s7227_s2  ;;  %p583_p1 = scmp.eq.s32.totalorder %s582_s8, 0 }
  0x17   : > { %p596_p2 = scmp.eq.s32.totalorder %s7394_s7, 1  ;;  %p601_p3 = scmp.ne.s32.totalorder %s7227_s2, %s7223_s29 }
  0x18   : > { %p602_p4 = scmp.eq.s32.totalorder %s5886_s3, 1  ;;  %p5889_p7 = scmp.ge.s32.totalorder %s7235_s30, 1 }
  0x19   : > { %s7409_s27 = scalar_select %p583_p1, %s7231_s6, %s585_s1  }
  0x1a   : > { %p7411_p5 = por %p596_p2, %p595_p0  ;;  %p7415_p6 = por %p602_p4, %p601_p3 }
  0x1b   : > { %8673 = sst [smem:[#allocation10_spill]] %s7409_s27  ;;  %p706_p8 = scmp.lt.s32.totalorder %s7235_s30, 3 }
  0x1c   : > { %s8674_s4 = scalar_select %p7411_p5, 1, 0 }
  0x1d   : > { %s8676_s28 = scalar_select %p7415_p6, 1, 0 }
  0x1e   : > { %8675 = sst [smem:[#allocation11_spill]] %s8674_s4  ;;  %p707_p9 = pnand %p5889_p7, %p706_p8 }
  0x1f   : > { %8677 = sst [smem:[#allocation12_spill]] %s8676_s28  ;;  %p779_p10 = scmp.lt.s32.totalorder (!%p707_p9), %s7394_s7, 1  ;;  %v7237_v3 = vmov (!%p707_p9), 0   ;;  %v7238_v4 = vmov (!%p707_p9), 0.0|0.0   ;;  %vm7239_vm1 = vmmov (!%p707_p9), 0   ;;  %v7240_v16 = vmov (!%p707_p9), 0.0  }
  0x20   : > { %710 = sbr.rel (%p707_p9) target bundleno = 6131 (0x17f3), region = 120  ;;  %s8678_s0 = sld [smem:[#allocation16_spill]] (!%p707_p9)  ;;  %7118 = vset.pattern.permute.xlu0 (!%p707_p9), %v7237_v3  ;;  %6796 = vmatprep.subr.bf16.mxu0 (!%p707_p9), %v7238_v4  ;;  %v791_v30 = vlaneseq (!%p707_p9)  ;;  %v7241_v33 = vmov (!%p707_p9), 1.0   ;;  %vm907_vm4 = vcmask (!%p707_p9), 261120   ;;  %vm1914_vm5 = vcmask (!%p707_p9), 64512  }
  0x21   : > { %6826 = vmatprep.subr.bf16.mxu1 (!%p707_p9), %v7238_v4  ;;  %s8679_s28 = sld [smem:[#allocation14_spill]] (!%p707_p9)  ;;  %s8680_s4 = sld [smem:[#allocation13_spill]] (!%p707_p9)  ;;  %6349 = vmatprep.mubr.msk.f32.mxu0 (!%p707_p9), %vm7239_vm1, %v7240_v16  ;;  %vm3025_vm7 = vcmask (!%p707_p9), 523264   ;;  %vm5327_vm9 = vcmask (!%p707_p9), 1046528   ;;  %vm5486_vm10 = vcmask (!%p707_p9), 1045504   ;;  %vm5574_vm11 = vcmask (!%p707_p9), 1044480  }
  0x22   : > { %6371 = vmatprep.mubr.msk.f32.mxu1 (!%p707_p9), %vm7239_vm1, %v7240_v16  ;;  %v792_v31 = vand.u32 (!%p707_p9), 127, %v791_v30  ;;  %s8682_s3 = sld [smem:[#allocation18_spill]] (!%p707_p9)  ;;  %s8683_s25 = sld [smem:[#allocation21_spill]] (!%p707_p9)  ;;  %vm5784_vm12 = vcmask (!%p707_p9), 8192  }
  0x23   : > { %s8684_s6 = sld [smem:[#allocation19_spill]] (!%p707_p9)  ;;  %s8686_s27 = sld [smem:[#allocation22_spill]] (!%p707_p9) }
  0x24   : > { %s8688_s10 = sld [smem:[#allocation23_spill]] (!%p707_p9)  ;;  %s8689_s11 = sld [smem:[#allocation24_spill]] (!%p707_p9) }
  0x25   : > { %s777_s1 = sand.u32 (!%p707_p9), 1, %s7227_s2  }
  0x26   : > { %v799_v0 = vld [vmem:[%s8678_s0] sm:$0xff] (!%p707_p9)  ;;  %v800_v1 = vld [vmem:[%s8678_s0 + $0x8] sm:$0xff] (!%p707_p9)  ;;  %v801_v2 = vld [vmem:[%s8678_s0 + $0x10] sm:$0xff] (!%p707_p9) }
  0x27   : > { %v6797_v5 = vpack.c.bf16 %v800_v1, %v799_v0  ;;  %v802_v6 = vld [vmem:[%s8678_s0 + $0x18] sm:$0xff]  ;;  %s7436_s9 = scalar_select %p779_p10, %s7394_s7, 1  ;;  %v803_v8 = vld [vmem:[%s8678_s0 + $0x20] sm:$0xff]  ;;  %v804_v9 = vld [vmem:[%s8678_s0 + $0x28] sm:$0xff] }
  0x28   : > { %v6800_v7 = vpack.c.bf16 %v802_v6, %v801_v2  ;;  %v6803_v12 = vpack.c.bf16 %v804_v9, %v803_v8  ;;  %v805_v14 = vld [vmem:[%s8678_s0 + $0x30] sm:$0xff]  ;;  %v806_v15 = vld [vmem:[%s8678_s0 + $0x38] sm:$0xff]  ;;  %v807_v18 = vld [vmem:[%s8678_s0 + $0x40] sm:$0xff] }
  0x29   : > { %6798 = vmatpush3.bf16.msra.mxu0 %v6797_v5  ;;  %s5890_s5 = sshll.u32 %s7436_s9, 3  ;;  %v6806_v17 = vpack.c.bf16 %v806_v15, %v805_v14  ;;  %v808_v19 = vld [vmem:[%s8678_s0 + $0x48] sm:$0xff]  ;;  %v809_v21 = vld [vmem:[%s8678_s0 + $0x50] sm:$0xff]  ;;  %v810_v22 = vld [vmem:[%s8678_s0 + $0x58] sm:$0xff] }
  0x2a   : > { %6799 = vmatprep.subr.bf16.mxu0 %v7238_v4  ;;  %s786_s29 = scalar_lea.vmem %s8679_s28, %s5890_s5  ;;  %s782_s7 = scalar_lea.vmem %s8680_s4, %s5890_s5  ;;  %v6809_v20 = vpack.c.bf16 %v808_v19, %v807_v18  ;;  %v6812_v23 = vpack.c.bf16 %v810_v22, %v809_v21  ;;  %v811_v24 = vld [vmem:[%s8678_s0 + $0x60] sm:$0xff]  ;;  %v812_v25 = vld [vmem:[%s8678_s0 + $0x68] sm:$0xff]  ;;  %v813_v27 = vld [vmem:[%s8678_s0 + $0x70] sm:$0xff] }
  0x2b   : > { %v815_v10 = vld [vmem:[%s786_s29] sm:$0xff]  ;;  %v6815_v26 = vpack.c.bf16 %v812_v25, %v811_v24  ;;  %v814_v28 = vld [vmem:[%s8678_s0 + $0x78] sm:$0xff]  ;;  %s8681_s28 = sld [smem:[#allocation17_spill]]  ;;  %v940_v50 = vld [vmem:[%s8683_s25 + $0x8] sm:$0xff]  ;;  %s8685_s5 = sld [smem:[#allocation20_spill]] }
  0x2c   : > { %v790_v11 = vld [vmem:[%s782_s7] sm:$0xff]  ;;  %vm816_vm0 = vcmp.gt.s32.totalorder %v815_v10, 0  ;;  %v6818_v29 = vpack.c.bf16 %v814_v28, %v813_v27  ;;  %v944_v53 = vld [vmem:[%s8683_s25 + $0x28] sm:$0xff]  ;;  %v941_v55 = vld [vmem:[%s8683_s25 + $0x10] sm:$0xff]  ;;  %s778_s29 = scalar_lea.vmem [#allocation2], %s777_s1  ;;  %s8692_s4 = sld [smem:[#allocation25_spill]] }
  0x2d   : > { %794 = vperm.xlu0 %7118, %v790_v11   ;;  %6801 = vmatpush3.bf16.msra.mxu0 %v6800_v7  ;;  %v819_v13 = vsel %vm816_vm0, 1, %v7237_v3  ;;  %v903_v39 = vld [vmem:[%s8682_s3] sm:$0xff]  ;;  %v942_v56 = vld [vmem:[%s8683_s25 + $0x18] sm:$0xff]  ;;  %v945_v57 = vld [vmem:[%s8683_s25 + $0x30] sm:$0xff]  ;;  %s5810_s0 = sshll.u32 %s778_s29, 4  ;;  %s8573_s0 = int_to_ptr.vmem [resolvable:$true] %s5810_s0 }
  0x2e   : > { %6802 = vmatprep.subr.bf16.mxu0 %v7238_v4  ;;  %v939_v49 = vld [vmem:[%s8683_s25] sm:$0xff]  ;;  %v6824_v58 = vpack.c.bf16 %v942_v56, %v941_v55  ;;  %v946_v59 = vld [vmem:[%s8683_s25 + $0x38] sm:$0xff]  ;;  %v948_v5 = vld [vmem:[%s8683_s25 + $0x48] sm:$0xff] }
  0x2f   : > { %v943_v51 = vld [vmem:[%s8683_s25 + $0x20] sm:$0xff]  ;;  %v6821_v52 = vpack.c.bf16 %v940_v50, %v939_v49  ;;  %v6830_v60 = vpack.c.bf16 %v946_v59, %v945_v57  ;;  %v956_v7 = vld [vmem:[%s8683_s25 + $0x88] sm:$0xff]  ;;  %v950_v14 = vld [vmem:[%s8683_s25 + $0x58] sm:$0xff] }
  0x30   : > { %v6827_v54 = vpack.c.bf16 %v944_v53, %v943_v51  ;;  %v5896_v1 = vld [vmem:[%s8684_s6] ss:$0 sm:$0xff]  ;;  %v957_v15 = vld [vmem:[%s8683_s25 + $0x90] sm:$0xff]  ;;  %v952_v21 = vld [vmem:[%s8683_s25 + $0x68] sm:$0xff]  ;;  %s8687_s6 = sld [smem:[#allocation15_spill]] }
  0x31   : > { %821 = vperm.xlu0 %7118, %v819_v13   ;;  %6804 = vmatpush3.bf16.msra.mxu0 %v6803_v12  ;;  %v5893_v35 = vld [vmem:[%s8681_s28 + $0x1] ss:$0 sm:$0xff]  ;;  %v5894_v36 = vld [vmem:[%s8681_s28] ss:$0 sm:$0xff]  ;;  %v949_v12 = vld [vmem:[%s8683_s25 + $0x50] sm:$0xff] }
  0x32   : > { %6805 = vmatprep.subr.bf16.mxu0 %v7238_v4  ;;  %6828 = vmatpush3.bf16.msra.mxu1 %v6827_v54  ;;  %v947_v2 = vld [vmem:[%s8683_s25 + $0x40] sm:$0xff]  ;;  %v6836_v18 = vpack.c.bf16 %v950_v14, %v949_v12  ;;  %v954_v27 = vld [vmem:[%s8683_s25 + $0x78] sm:$0xff]  ;;  %v965_v28 = vld [vmem:[%s8683_s25 + $0xd0] sm:$0xff] }
  0x33   : > { %6829 = vmatprep.subr.bf16.mxu1 %v7238_v4  ;;  %v955_v6 = vld [vmem:[%s8683_s25 + $0x80] sm:$0xff]  ;;  %v6833_v10 = vpack.c.bf16 %v948_v5, %v947_v2  ;;  %v980_v49 = vld [vmem:[%s8683_s25 + $0x148] sm:$0xff]  ;;  %v970_v53 = vld [vmem:[%s8683_s25 + $0xf8] sm:$0xff] }
  0x34   : > { %v5897_v8 = vld [vmem:[%s8685_s5] ss:$0 sm:$0xff]  ;;  %v6845_v11 = vpack.c.bf16 %v956_v7, %v955_v6  ;;  %v981_v54 = vld [vmem:[%s8683_s25 + $0x150] sm:$0xff]  ;;  %v982_v55 = vld [vmem:[%s8683_s25 + $0x158] sm:$0xff] }
  0x35   : > { %6807 = vmatpush3.bf16.msra.mxu0 %v6806_v17  ;;  %v958_v17 = vld [vmem:[%s8683_s25 + $0x98] sm:$0xff]  ;;  %v963_v22 = vld [vmem:[%s8683_s25 + $0xc0] sm:$0xff]  ;;  %v6884_v57 = vpack.c.bf16 %v982_v55, %v981_v54  ;;  %v976_v59 = vld [vmem:[%s8683_s25 + $0x128] sm:$0xff] }
  0x36   : > { %6808 = vmatprep.subr.bf16.mxu0 %v7238_v4  ;;  %6831 = vmatpush3.bf16.msra.mxu1 %v6830_v60  ;;  %v6848_v19 = vpack.c.bf16 %v958_v17, %v957_v15  ;;  %v986_v5 = vld [vmem:[%s8683_s25 + $0x178] sm:$0xff]  ;;  %v5898_v15 = vld [vmem:[%s8686_s27] ss:$0 sm:$0xff]  ;;  %s789_s26 = scalar_lea.vmem %s8687_s6, %s7436_s9  ;;  %s8690_s9 = sld [smem:[#allocation8_spill]] }
  0x37   : > { %6832 = vmatprep.subr.bf16.mxu1 %v7238_v4  ;;  %v936_v55 = vld [vmem:[%s789_s26] sm:$0x1]  ;;  %s5798_s6 = scalar_lea.sflag [#allocation3], %s777_s1  ;;  %s7173_s26 = scalar_lea.vmem %s8573_s0, 16 }
  0x38   : > { %p7174_p11 = scmp.ne.s32.totalorder %s8573_s0, %s7173_s26 }
  0x39   : > { %6810 = vmatpush3.bf16.msra.mxu0 %v6809_v20  ;;  %v951_v20 = vld [vmem:[%s8683_s25 + $0x60] sm:$0xff] }
  0x3a   : > { %6811 = vmatprep.subr.bf16.mxu0 %v7238_v4  ;;  %v6839_v24 = vpack.c.bf16 %v952_v21, %v951_v20  ;;  %p7175_p12 = pnand %p7174_p11, %p7411_p5 }
  0x3c   : > { %s6101_s8 = sshll.u32 %s8690_s9, 4  ;;  %p7176_p13 = pneg %p7175_p12 }
  0x3d   : > { %6813 = vmatpush3.bf16.msra.mxu0 %v6812_v23  ;;  %v964_v23 = vld [vmem:[%s8683_s25 + $0xc8] sm:$0xff]  ;;  %s8571_s5 = scalar_lea.hbm %s8692_s4, %s6101_s8  ;;  %s7242_s9 = smov [#allocation2]  }
  0x3e   : > { %6814 = vmatprep.subr.bf16.mxu0 %v7238_v4  ;;  %v6857_v25 = vpack.c.bf16 %v964_v23, %v963_v22 }
  0x41   : > { %6816 = vmatpush3.bf16.msra.mxu0 %v6815_v26  ;;  %v953_v26 = vld [vmem:[%s8683_s25 + $0x70] sm:$0xff] }
  0x42   : > { %6817 = vmatprep.subr.bf16.mxu0 %v7238_v4 }
  0x45   : > { %6819 = vmatpush3.bf16.msra.mxu0 %v6818_v29  ;;  %v966_v29 = vld [vmem:[%s8683_s25 + $0xd8] sm:$0xff] }
  0x46   : > { %6820 = vmatprep.subr.bf16.mxu0 %v7238_v4 }
  0xac   : > { %v795_v32 = vpop.permute.xlu0 %794 }
  0xad   : > { %vm796_vm2 = vcmp.eq.s32.totalorder %v792_v31, %v795_v32  ;;  %v6842_v31 = vpack.c.bf16 %v954_v27, %v953_v26  ;;  %v6860_v32 = vpack.c.bf16 %v966_v29, %v965_v28  ;;  %v5899_v28 = vld [vmem:[%s8686_s27 + $0x1] ss:$0 sm:$0xff] }
  0xae   : > { %6350 = vmatmul.mubr.msk.f32.vlgmr.msra.gmra.mrb[0].mxu0 %vm796_vm2, %v7241_v33 }
  0xaf   : > { %6360 = vmatprep.mubr.msk.f32.mxu0 %vm7239_vm1, %v7240_v16  ;;  %6822 = vmatpush3.bf16.msra.mxu0 %v6821_v52  ;;  %v969_v52 = vld [vmem:[%s8683_s25 + $0xf0] sm:$0xff] }
  0xb0   : > { %v822_v34 = vpop.permute.xlu0 %821  ;;  %6823 = vmatprep.subr.bf16.mxu0 %v7238_v4  ;;  %v6866_v56 = vpack.c.bf16 %v970_v53, %v969_v52 }
  0xb1   : > { %vm823_vm3 = vcmp.eq.s32.totalorder %v822_v34, 1  ;;  %v959_v34 = vld [vmem:[%s8683_s25 + $0xa0] sm:$0xff] }
  0xb2   : > { %v832_v37 = vsel %vm823_vm3, %v5893_v35, %v5894_v36  ;;  %v960_v35 = vld [vmem:[%s8683_s25 + $0xa8] sm:$0xff]  ;;  %v971_v36 = vld [vmem:[%s8683_s25 + $0x100] sm:$0xff] }
  0xb3   : > { %6825 = vmatpush3.bf16.msra.mxu0 %v6824_v58  ;;  %v975_v58 = vld [vmem:[%s8683_s25 + $0x120] sm:$0xff] }
  0xb4   : > { %6844 = vmatprep.subr.bf16.mxu0 %v7238_v4  ;;  %v6875_v60 = vpack.c.bf16 %v976_v59, %v975_v58 }
 0x181   : > { %v899_v38 = vpop.f32.mrb[0].mxu0 }
 0x182   : > { %v900_v40 = vadd.f32 %v899_v38, %v832_v37  ;;  %v6351_v41 = vpop.f32.mrb[1].mxu0  ;;  %v972_v37 = vld [vmem:[%s8683_s25 + $0x108] sm:$0xff]  ;;  %v6851_v38 = vpack.c.bf16 %v960_v35, %v959_v34  ;;  %v5904_v34 = vld [vmem:[%s8686_s27 + $0x6] ss:$0 sm:$0xff] }
 0x183   : > { %v962_v41 = vld [vmem:[%s8683_s25 + $0xb8] sm:$0xff] }
 0x184   : > { %v904_v42 = vadd.f32 %v903_v39, %v900_v40  ;;  %v6869_v39 = vpack.c.bf16 %v972_v37, %v971_v36  ;;  %v961_v40 = vld [vmem:[%s8683_s25 + $0xb0] sm:$0xff]  ;;  %v5900_v36 = vld [vmem:[%s8686_s27 + $0x2] ss:$0 sm:$0xff] }
 0x186   : > { %v908_v43 = vsel %vm907_vm4, %v904_v42, 0.0 }
 0x187   : > { %909 = vadd.xlane.f32.xlu1 %v908_v43  ;;  %v974_v43 = vld [vmem:[%s8683_s25 + $0x118] sm:$0xff] }
 0x214   : > { %v910_v44 = vpop.xlane.xlu1 %909 }
 0x215   : > { %v912_v45 = vmul.f32 0.03125, %v910_v44  ;;  %v6854_v44 = vpack.c.bf16 %v962_v41, %v961_v40 }
 0x217   : > { %v913_v46 = vsub.f32 %v904_v42, %v912_v45  ;;  %v973_v42 = vld [vmem:[%s8683_s25 + $0x110] sm:$0xff] }
 0x218   : > { %v6872_v45 = vpack.c.bf16 %v974_v43, %v973_v42  ;;  %v5901_v43 = vld [vmem:[%s8686_s27 + $0x3] ss:$0 sm:$0xff] }
 0x219   : > { %v914_v47 = vmul.f32 %v913_v46, %v913_v46 }
 0x21b   : > { %v915_v48 = vsel %vm907_vm4, %v914_v47, 0.0  ;;  %v968_v47 = vld [vmem:[%s8683_s25 + $0xe8] sm:$0xff] }
 0x21c   : > { %916 = vadd.xlane.f32.xlu1 %v915_v48  ;;  %v979_v48 = vld [vmem:[%s8683_s25 + $0x140] sm:$0xff] }
 0x21d   : > { %v6881_v51 = vpack.c.bf16 %v980_v49, %v979_v48  ;;  %v5907_v49 = vld [vmem:[%s8686_s27 + $0x9] ss:$0 sm:$0xff] }
 0x2a9   : > { %v917_v61 = vpop.xlane.xlu1 %916 }
 0x2aa   : > { %v918_v62 = vmul.f32 0.03125, %v917_v61  ;;  %v977_v61 = vld [vmem:[%s8683_s25 + $0x130] sm:$0xff] }
 0x2ac   : > { %v919_v63 = vadd.f32 1e-12, %v918_v62  ;;  %v978_v62 = vld [vmem:[%s8683_s25 + $0x138] sm:$0xff] }
 0x2ae   : > { %7119 = vrsqrt.f32 %v919_v63  ;;  %v6878_v63 = vpack.c.bf16 %v978_v62, %v977_v61 }
 0x2b8   : > { %v7120_v0 = vpop.eup %7119 }
 0x2b9   : > { %v921_v3 = vmul.f32 %v7120_v0, %v913_v46  ;;  %v967_v46 = vld [vmem:[%s8683_s25 + $0xe0] sm:$0xff] }
 0x2ba   : > { %v6863_v50 = vpack.c.bf16 %v968_v47, %v967_v46  ;;  %v983_v0 = vld [vmem:[%s8683_s25 + $0x160] sm:$0xff] }
 0x2bb   : > { %v928_v9 = vmul.f32 %v5896_v1, %v921_v3  ;;  %v984_v1 = vld [vmem:[%s8683_s25 + $0x168] sm:$0xff]  ;;  %v985_v3 = vld [vmem:[%s8683_s25 + $0x170] sm:$0xff] }
 0x2bc   : > { %v6887_v2 = vpack.c.bf16 %v984_v1, %v983_v0  ;;  %v6890_v6 = vpack.c.bf16 %v986_v5, %v985_v3 }
 0x2bd   : > { %v7558_v13 = vadd.f32 %v5897_v8, %v928_v9 }
 0x2bf   : > { %6361 = vmatmul.mubr.msk.f32.vlgmr.msra.gmra.mrb[2].mxu0 %vm907_vm4, %v7558_v13  ;;  %6372 = vmatmul.mubr.msk.f32.vlgmr.msra.gmra.mrb[0].mxu1 %vm907_vm4, %v7558_v13 }
 0x2c0   : > { %6834 = vmatpush3.bf16.msra.mxu1 %v6833_v10  ;;  %6846 = vmatpush3.bf16.msra.mxu0 %v6845_v11  ;;  %v5902_v11 = vld [vmem:[%s8686_s27 + $0x4] ss:$0 sm:$0xff] }
 0x2c1   : > { %6835 = vmatprep.subr.bf16.mxu1 %v7238_v4  ;;  %6847 = vmatprep.subr.bf16.mxu0 %v7238_v4 }
 0x2c2   : > { %6382 = vmatprep.mubr.msk.f32.mxu1 %vm7239_vm1, %v7240_v16  ;;  %6404 = vmatprep.mubr.msk.f32.mxu0 %vm7239_vm1, %v7240_v16 }
 0x2c4   : > { %6837 = vmatpush3.bf16.msra.mxu1 %v6836_v18  ;;  %6849 = vmatpush3.bf16.msra.mxu0 %v6848_v19 }
 0x2c5   : > { %6838 = vmatprep.subr.bf16.mxu1 %v7238_v4  ;;  %6856 = vmatprep.subr.bf16.mxu0 %v7238_v4 }
 0x2c7   : > { %6383 = vmatmul.mubr.msk.f32.vlgmr.msra.gmra.mrb[2].mxu1 %vm907_vm4, %v7558_v13  ;;  %6405 = vmatmul.mubr.msk.f32.vlgmr.msra.gmra.mrb[4].mxu0 %vm907_vm4, %v7558_v13 }
 0x2c8   : > { %6840 = vmatpush3.bf16.msra.mxu1 %v6839_v24  ;;  %6858 = vmatpush3.bf16.msra.mxu0 %v6857_v25  ;;  %v5903_v25 = vld [vmem:[%s8686_s27 + $0x5] ss:$0 sm:$0xff] }
 0x2c9   : > { %6841 = vmatprep.subr.bf16.mxu1 %v7238_v4  ;;  %6859 = vmatprep.subr.bf16.mxu0 %v7238_v4 }
 0x2ca   : > { %6393 = vmatprep.mubr.msk.f32.mxu1 %vm7239_vm1, %v7240_v16  ;;  %6426 = vmatprep.mubr.msk.f32.mxu0 %vm7239_vm1, %v7240_v16 }
 0x2cc   : > { %6843 = vmatpush3.bf16.msra.mxu1 %v6842_v31  ;;  %6861 = vmatpush3.bf16.msra.mxu0 %v6860_v32 }
 0x2cd   : > { %6850 = vmatprep.subr.bf16.mxu1 %v7238_v4  ;;  %6868 = vmatprep.subr.bf16.mxu0 %v7238_v4 }
 0x2cf   : > { %6394 = vmatmul.mubr.msk.f32.vlgmr.msra.gmra.mrb[4].mxu1 %vm907_vm4, %v7558_v13  ;;  %6427 = vmatmul.mubr.msk.f32.vlgmr.msra.gmra.mrb[6].mxu0 %vm907_vm4, %v7558_v13 }
 0x2d0   : > { %6852 = vmatpush3.bf16.msra.mxu1 %v6851_v38  ;;  %6870 = vmatpush3.bf16.msra.mxu0 %v6869_v39  ;;  %v5906_v38 = vld [vmem:[%s8686_s27 + $0x8] ss:$0 sm:$0xff]  ;;  %v5905_v39 = vld [vmem:[%s8686_s27 + $0x7] ss:$0 sm:$0xff] }
 0x2d1   : > { %6853 = vmatprep.subr.bf16.mxu1 %v7238_v4  ;;  %6871 = vmatprep.subr.bf16.mxu0 %v7238_v4 }
 0x2d2   : > { %6415 = vmatprep.mubr.msk.f32.mxu1 %vm7239_vm1, %v7240_v16  ;;  %6448 = vmatprep.mubr.msk.f32.mxu0 %vm7239_vm1, %v7240_v16 }
 0x2d4   : > { %6855 = vmatpush3.bf16.msra.mxu1 %v6854_v44  ;;  %6873 = vmatpush3.bf16.msra.mxu0 %v6872_v45 }
 0x2d5   : > { %6862 = vmatprep.subr.bf16.mxu1 %v7238_v4  ;;  %6880 = vmatprep.subr.bf16.mxu0 %v7238_v4 }
 0x2d7   : > { %6416 = vmatmul.mubr.msk.f32.vlgmr.msra.gmra.mrb[6].mxu1 %vm907_vm4, %v7558_v13  ;;  %6449 = vmatmul.mubr.msk.f32.vlgmr.msra.gmra.mrb[8].mxu0 %vm907_vm4, %v7558_v13 }
 0x2d8   : > { %6864 = vmatpush3.bf16.msra.mxu1 %v6863_v50  ;;  %6882 = vmatpush3.bf16.msra.mxu0 %v6881_v51 }
 0x2d9   : > { %6865 = vmatprep.subr.bf16.mxu1 %v7238_v4  ;;  %6883 = vmatprep.subr.bf16.mxu0 %v7238_v4 }
 0x2da   : > { %6437 = vmatprep.mubr.msk.f32.mxu1 %vm7239_vm1, %v7240_v16  ;;  %6470 = vmatprep.mubr.msk.f32.mxu0 %vm7239_vm1, %v7240_v16 }
 0x2dc   : > { %6867 = vmatpush3.bf16.msra.mxu1 %v6866_v56  ;;  %6885 = vmatpush3.bf16.msra.mxu0 %v6884_v57  ;;  %v937_v56 = vsub.f32 1.0, %v936_v55  ;;  %v7794_v57 = vshrl.u32 %v791_v30, 7 }
 0x2dd   : > { %6874 = vmatprep.subr.bf16.mxu1 %v7238_v4  ;;  %6484 = vmatprep.subr.mxu0 %v7240_v16 }
 0x2de   : > { %v938_v58 = vmul.f32 -10000.0, %v937_v56  ;;  %v2226_v59 = vsub.s32 0, %v7794_v57 }
 0x2df   : > { %6438 = vmatmul.mubr.msk.f32.vlgmr.msra.gmra.mrb[8].mxu1 %vm907_vm4, %v7558_v13  ;;  %6471 = vmatmul.mubr.msk.f32.vlgmr.msra.gmra.mrb[10].mxu0 %vm907_vm4, %v7558_v13 }
 0x2e0   : > { %6876 = vmatpush3.bf16.msra.mxu1 %v6875_v60  ;;  %6459 = vmatprep.mubr.msk.f32.mxu1 %vm7239_vm1, %v7240_v16  ;;  %v7799_v60 = vrot.slane %v938_v58, %v2226_v59 }
 0x2e1   : > { %6877 = vmatprep.subr.bf16.mxu1 %v7238_v4  ;;  %6486 = vmatprep.mubr.msk.f32.mxu0 %vm7239_vm1, %v7240_v16 }
 0x2e4   : > { %6879 = vmatpush3.bf16.msra.mxu1 %v6878_v63 }
 0x2e5   : > { %6886 = vmatprep.subr.bf16.mxu1 %v7238_v4 }
 0x2e7   : > { %6460 = vmatmul.mubr.msk.f32.vlgmr.msra.gmra.mrb[10].mxu1 %vm907_vm4, %v7558_v13 }
 0x2e8   : > { %6888 = vmatpush3.bf16.msra.mxu1 %v6887_v2  ;;  %6481 = vmatprep.mubr.msk.f32.mxu1 %vm7239_vm1, %v7240_v16 }
 0x2e9   : > { %6889 = vmatprep.subr.bf16.mxu1 %v7238_v4 }
 0x2ec   : > { %6891 = vmatpush3.bf16.msra.mxu1 %v6890_v6 }
 0x2ed   : > { %6499 = vmatprep.subr.mxu1 %v7240_v16 }
 0x2ef   : > { %6482 = vmatmul.mubr.msk.f32.vlgmr.msra.gmra.mrb[12].mxu1 %vm907_vm4, %v7558_v13 }
 0x2f0   : > { %6501 = vmatprep.mubr.msk.f32.mxu1 %vm7239_vm1, %v7240_v16 }
 0x392   : > { %v1140_v7 = vpop.f32.mrb[2].mxu0  ;;  %v1210_v8 = vpop.f32.mrb[0].mxu1 }
 0x393   : > { %v6362_v9 = vpop.f32.mrb[3].mxu0  ;;  %v6373_v10 = vpop.f32.mrb[1].mxu1  ;;  %v1141_v20 = vadd.f32 %v5898_v15, %v1140_v7  ;;  %v1211_v35 = vadd.f32 %v5899_v28, %v1210_v8 }
 0x39a   : > { %v1280_v12 = vpop.f32.mrb[2].mxu1  ;;  %v1420_v14 = vpop.f32.mrb[4].mxu0 }
 0x39b   : > { %v1421_v17 = vadd.f32 %v5902_v11, %v1420_v14  ;;  %v6384_v18 = vpop.f32.mrb[3].mxu1  ;;  %v6406_v19 = vpop.f32.mrb[5].mxu0  ;;  %v1281_v40 = vadd.f32 %v5900_v36, %v1280_v12 }
 0x39d   : > { %6485 = vmatpush3.xpose.msk.msra.mxu0 %vm1914_vm5, %v1421_v17 }
 0x39e   : > { %6489 = vmatprep.subr.mxu0 %v7240_v16 }
 0x3a0   : > { %6487 = vmatmul.mubr.msk.f32.vlgmr.msra.gmra.mrb[12].mxu0 %vm1914_vm5, %v1141_v20 }
 0x3a1   : > { %6491 = vmatprep.mubr.msk.f32.mxu0 %vm7239_vm1, %v7240_v16 }
 0x3a2   : > { %v1350_v21 = vpop.f32.mrb[4].mxu1  ;;  %v1560_v22 = vpop.f32.mrb[6].mxu0 }
 0x3a3   : > { %v6395_v23 = vpop.f32.mrb[5].mxu1  ;;  %v6428_v24 = vpop.f32.mrb[7].mxu0  ;;  %v1561_v37 = vadd.f32 %v5904_v34, %v1560_v22  ;;  %v1351_v48 = vadd.f32 %v5901_v43, %v1350_v21  ;;  %v5908_v43 = vld [vmem:[%s8686_s27 + $0xa] ss:$0 sm:$0xff] }
 0x3aa   : > { %v1490_v26 = vpop.f32.mrb[6].mxu1  ;;  %v1700_v27 = vpop.f32.mrb[8].mxu0 }
 0x3ab   : > { %v1491_v29 = vadd.f32 %v5903_v25, %v1490_v26  ;;  %v6417_v31 = vpop.f32.mrb[7].mxu1  ;;  %v6450_v32 = vpop.f32.mrb[9].mxu0  ;;  %v1701_v44 = vadd.f32 %v5906_v38, %v1700_v27 }
 0x3ad   : > { %6490 = vmatpush3.xpose.msk.msra.mxu0 %vm1914_vm5, %v1491_v29 }
 0x3ae   : > { %6494 = vmatprep.subr.mxu0 %v7240_v16 }
 0x3b0   : > { %6492 = vmatmul.mubr.msk.f32.vlgmr.msra.gmra.mrb[14].mxu0 %vm1914_vm5, %v1211_v35 }
 0x3b1   : > { %6495 = vmatpush3.xpose.msk.msra.mxu0 %vm1914_vm5, %v1561_v37  ;;  %6496 = vmatprep.mubr.msk.f32.mxu0 %vm7239_vm1, %v7240_v16 }
 0x3b2   : > { %v1630_v41 = vpop.f32.mrb[8].mxu1  ;;  %v7768_v42 = vpop.f32.mrb[10].mxu0  ;;  %6504 = vmatprep.subr.mxu0 %v7240_v16 }
 0x3b3   : > { %v1631_v45 = vadd.f32 %v5905_v39, %v1630_v41  ;;  %v6439_v46 = vpop.f32.mrb[9].mxu1  ;;  %v6472_v47 = vpop.f32.mrb[11].mxu0 }
 0x3b4   : > { %6497 = vmatmul.mubr.msk.f32.vlgmr.msra.gmra.mrb[16].mxu0 %vm1914_vm5, %v1281_v40  ;;  %v1841_v46 = vadd.f32 %v5908_v43, %v7768_v42 }
 0x3b5   : > { %6500 = vmatpush3.xpose.msk.msra.mxu1 %vm1914_vm5, %v1631_v45  ;;  %6505 = vmatpush3.msra.mxu0 %v1701_v44 }
 0x3b6   : > { %6509 = vmatprep.subr.mxu1 %v7240_v16  ;;  %6506 = vmatprep.mubr.msk.f32.mxu0 %vm7239_vm1, %v7240_v16 }
 0x3b7   : > { %6514 = vmatprep.subr.mxu0 %v7240_v16 }
 0x3b8   : > { %6502 = vmatmul.mubr.msk.f32.vlgmr.msra.gmra.mrb[14].mxu1 %vm1914_vm5, %v1351_v48 }
 0x3b9   : > { %6511 = vmatprep.mubr.msk.f32.mxu1 %vm7239_vm1, %v7240_v16 }
 0x3ba   : > { %v1770_v50 = vpop.f32.mrb[10].mxu1 }
 0x3bb   : > { %v1771_v51 = vadd.f32 %v5907_v49, %v1770_v50  ;;  %v6461_v52 = vpop.f32.mrb[11].mxu1  ;;  %v5909_v50 = vld [vmem:[%s8686_s27 + $0xb] ss:$0 sm:$0xff] }
 0x3bd   : > { %6510 = vmatpush3.msra.mxu1 %v1771_v51 }
 0x3be   : > { %6519 = vmatprep.subr.mxu1 %v7240_v16 }
 0x3c2   : > { %v7787_v53 = vpop.f32.mrb[12].mxu1 }
 0x3c3   : > { %v6483_v54 = vpop.f32.mrb[13].mxu1  ;;  %v1911_v52 = vadd.f32 %v5909_v50, %v7787_v53  ;;  %v2569_v53 = vld [vmem:[%s8688_s10] sm:$0xff] }
 0x473   : > { %v1987_v61 = vpop.f32.mrb[12].mxu0 }
 0x474   : > { %v2219_v62 = vmul.f32 0.35355338, %v1987_v61  ;;  %v6488_v63 = vpop.f32.mrb[13].mxu0  ;;  %v2570_v61 = vld [vmem:[%s8688_s10 + $0x8] sm:$0xff] }
 0x476   : > { %v2229_v0 = vadd.f32 %v7799_v60, %v2219_v62  ;;  %v2571_v62 = vld [vmem:[%s8688_s10 + $0x10] sm:$0xff] }
 0x478   : > { %v2233_v1 = vsel %vm1914_vm5, %v2229_v0, -inf }
 0x479   : > { %2234 = vmax.xlane.f32.xlu0 %v2233_v1  ;;  %v2572_v1 = vld [vmem:[%s8688_s10 + $0x18] sm:$0xff] }
 0x483   : > { %v2063_v2 = vpop.f32.mrb[14].mxu0 }
 0x484   : > { %v2220_v3 = vmul.f32 0.35355338, %v2063_v2  ;;  %v6493_v5 = vpop.f32.mrb[15].mxu0 }
 0x486   : > { %v2230_v30 = vadd.f32 %v7799_v60, %v2220_v3 }
 0x487   : > { %v2139_v6 = vpop.f32.mrb[16].mxu0 }
 0x488   : > { %v2221_v7 = vmul.f32 0.35355338, %v2139_v6  ;;  %v6498_v8 = vpop.f32.mrb[17].mxu0  ;;  %v2236_v9 = vsel %vm1914_vm5, %v2230_v30, -inf }
 0x489   : > { %2237 = vmax.xlane.f32.xlu1 %v2236_v9 }
 0x48a   : > { %v2231_v10 = vadd.f32 %v7799_v60, %v2221_v7 }
 0x48b   : > { %v2215_v11 = vpop.f32.mrb[14].mxu1 }
 0x48c   : > { %v2222_v12 = vmul.f32 0.35355338, %v2215_v11  ;;  %v6503_v14 = vpop.f32.mrb[15].mxu1  ;;  %v2239_v15 = vsel %vm1914_vm5, %v2231_v10, -inf }
 0x48d   : > { %2240 = vmax.xlane.f32.xlu1 %v2239_v15 }
 0x48e   : > { %v2232_v17 = vadd.f32 %v7799_v60, %v2222_v12 }
 0x490   : > { %v2242_v18 = vsel %vm1914_vm5, %v2232_v17, -inf }
 0x491   : > { %2243 = vmax.xlane.f32.xlu1 %v2242_v18 }
 0x506   : > { %v2235_v19 = vpop.xlane.xlu0 %2234 }
 0x507   : > { %v2245_v20 = vsub.f32 %v2229_v0, %v2235_v19 }
 0x509   : > { %v2249_v21 = vmul.f32 1.442695, %v2245_v20 }
 0x50b   : > { %7121 = vpow2.f32 %v2249_v21 }
 0x515   : > { %v7122_v22 = vpop.eup %7121 }
 0x516   : > { %v2238_v23 = vpop.xlane.xlu1 %2237  ;;  %v2257_v24 = vsel %vm1914_vm5, %v7122_v22, 0.0 }
 0x517   : > { %v2246_v25 = vsub.f32 %v2230_v30, %v2238_v23  ;;  %2258 = vadd.xlane.f32.xlu1 %v2257_v24  ;;  %v5938_v23 = vld [vmem:[%s8689_s11] ss:$0 sm:$0xff] }
 0x519   : > { %v2251_v26 = vmul.f32 1.442695, %v2246_v25 }
 0x51a   : > { %v2241_v27 = vpop.xlane.xlu1 %2240 }
 0x51b   : > { %7123 = vpow2.f32 %v2251_v26  ;;  %v2247_v28 = vsub.f32 %v2231_v10, %v2241_v27 }
 0x51d   : > { %v2253_v29 = vmul.f32 1.442695, %v2247_v28 }
 0x51e   : > { %v2244_v31 = vpop.xlane.xlu1 %2243 }
 0x51f   : > { %7125 = vpow2.f32 %v2253_v29  ;;  %v2248_v32 = vsub.f32 %v2232_v17, %v2244_v31 }
 0x521   : > { %v2255_v34 = vmul.f32 1.442695, %v2248_v32 }
 0x523   : > { %7127 = vpow2.f32 %v2255_v34 }
 0x525   : > { %v7124_v35 = vpop.eup %7123 }
 0x526   : > { %v2260_v36 = vsel %vm1914_vm5, %v7124_v35, 0.0 }
 0x527   : > { %2261 = vadd.xlane.f32.xlu1 %v2260_v36  ;;  %v2904_v36 = vld [vmem:[%s8628_s14] sm:$0xff] }
 0x529   : > { %v7126_v37 = vpop.eup %7125 }
 0x52a   : > { %v2263_v38 = vsel %vm1914_vm5, %v7126_v37, 0.0 }
 0x52b   : > { %2264 = vadd.xlane.f32.xlu1 %v2263_v38 }
 0x52d   : > { %v7128_v39 = vpop.eup %7127 }
 0x52e   : > { %v2266_v40 = vsel %vm1914_vm5, %v7128_v39, 0.0 }
 0x52f   : > { %2267 = vadd.xlane.f32.xlu1 %v2266_v40 }
 0x5a4   : > { %v2259_v41 = vpop.xlane.xlu1 %2258 }
 0x5a5   : > { %7129 = vrcp.f32 %v2259_v41 }
 0x5af   : > { %v7130_v44 = vpop.eup %7129 }
 0x5b0   : > { %v2273_v45 = vmul.f32 %v7130_v44, %v7122_v22 }
 0x5b2   : > { %6507 = vmatmul.mubr.msk.f32.vlgmr.msra.gmra.mrb[18].mxu0 %vm1914_vm5, %v2273_v45 }
 0x5b3   : > { %6515 = vmatpush3.msra.mxu0 %v1841_v46  ;;  %6516 = vmatprep.mubr.msk.f32.mxu0 %vm7239_vm1, %v7240_v16  ;;  %v5939_v46 = vld [vmem:[%s8626_s12] ss:$0 sm:$0xff] }
 0x5b4   : > { %v2262_v47 = vpop.xlane.xlu1 %2261  ;;  %6524 = vmatprep.subr.mxu0 %v7240_v16 }
 0x5b5   : > { %7131 = vrcp.f32 %v2262_v47 }
 0x5b8   : > { %v2265_v48 = vpop.xlane.xlu1 %2264 }
 0x5b9   : > { %7133 = vrcp.f32 %v2265_v48  ;;  %v5940_v48 = vld [vmem:[%s8627_s13] ss:$0 sm:$0xff] }
 0x5bc   : > { %v2268_v49 = vpop.xlane.xlu1 %2267 }
 0x5bd   : > { %7135 = vrcp.f32 %v2268_v49 }
 0x5bf   : > { %v7132_v51 = vpop.eup %7131 }
 0x5c0   : > { %v2274_v42 = vmul.f32 %v7132_v51, %v7124_v35  ;;  %v3012_v51 = vld [vmem:[%s8630_s16] sm:$0xff] }
 0x5c2   : > { %6512 = vmatmul.mubr.msk.f32.vlgmr.msra.gmra.mrb[16].mxu1 %vm1914_vm5, %v2274_v42  ;;  %v3013_v42 = vld [vmem:[%s8630_s16 + $0x8] sm:$0xff] }
 0x5c3   : > { %v7134_v54 = vpop.eup %7133  ;;  %6520 = vmatpush3.msra.mxu1 %v1911_v52  ;;  %6521 = vmatprep.mubr.msk.f32.mxu1 %vm7239_vm1, %v7240_v16  ;;  %v6899_v52 = vpack.c.bf16 %v3013_v42, %v3012_v51  ;;  %v5949_v51 = vld [vmem:[%s8683_s25 + $0x190] sm:$0xff]  ;;  %v5950_v42 = vld [vmem:[%s8683_s25 + $0x198] sm:$0xff] }
 0x5c4   : > { %v2275_v55 = vmul.f32 %v7134_v54, %v7126_v37  ;;  %6529 = vmatprep.subr.mxu1 %v7240_v16  ;;  %v2905_v37 = vld [vmem:[%s8628_s14 + $0x8] sm:$0xff]  ;;  %v3014_v54 = vld [vmem:[%s8630_s16 + $0x10] sm:$0xff] }
 0x5c5   : > { %v6893_v38 = vpack.c.bf16 %v2905_v37, %v2904_v36 }
 0x5c6   : > { %6517 = vmatmul.mubr.msk.f32.vlgmr.msra.gmra.mrb[20].mxu0 %vm1914_vm5, %v2275_v55  ;;  %v3015_v55 = vld [vmem:[%s8630_s16 + $0x18] sm:$0xff] }
 0x5c7   : > { %v7136_v56 = vpop.eup %7135  ;;  %6526 = vmatprep.mubr.msk.f32.mxu0 %vm7239_vm1, %v7240_v16  ;;  %6525 = vmatpush3.msra.mxu0 %v2569_v53  ;;  %v3017_v53 = vld [vmem:[%s8630_s16 + $0x28] sm:$0xff] }
 0x5c8   : > { %v2276_v58 = vmul.f32 %v7136_v56, %v7128_v39  ;;  %6534 = vmatprep.subr.mxu0 %v7240_v16  ;;  %v2907_v39 = vld [vmem:[%s8628_s14 + $0x18] sm:$0xff]  ;;  %v6902_v56 = vpack.c.bf16 %v3015_v55, %v3014_v54  ;;  %v6914_v54 = vpack.c.bf16 %v5950_v42, %v5949_v51  ;;  %v5989_v42 = vld [vmem:[%s8683_s25 + $0x2d0] sm:$0xff] }
 0x5c9   : > { %v5958_v55 = vld [vmem:[%s8683_s25 + $0x1d8] sm:$0xff] }
 0x5ca   : > { %6522 = vmatmul.mubr.msk.f32.vlgmr.msra.gmra.mrb[18].mxu1 %vm1914_vm5, %v2276_v58  ;;  %v3016_v58 = vld [vmem:[%s8630_s16 + $0x20] sm:$0xff]  ;;  %v5978_v51 = vld [vmem:[%s8683_s25 + $0x278] sm:$0xff] }
 0x5cb   : > { %6531 = vmatprep.mubr.msk.f32.mxu1 %vm7239_vm1, %v7240_v16  ;;  %6530 = vmatpush3.msra.mxu1 %v2570_v61  ;;  %v6905_v61 = vpack.c.bf16 %v3017_v53, %v3016_v58 }
 0x5cc   : > { %6539 = vmatprep.subr.mxu1 %v7240_v16 }
 0x685   : > { %v2346_v63 = vpop.f32.mrb[18].mxu0 }
 0x686   : > { %v6508_v0 = vpop.f32.mrb[19].mxu0  ;;  %6527 = vmatmul.mubr.msk.f32.vlgmr.msra.gmra.mrb[22].mxu0 %vm1914_vm5, %v2346_v63  ;;  %v3019_v63 = vld [vmem:[%s8630_s16 + $0x38] sm:$0xff] }
 0x687   : > { %6535 = vmatpush3.msra.mxu0 %v2571_v62  ;;  %6536 = vmatprep.mubr.msk.f32.mxu0 %vm7239_vm1, %v7240_v16  ;;  %v3018_v62 = vld [vmem:[%s8630_s16 + $0x30] sm:$0xff] }
 0x688   : > { %6892 = vmatprep.subr.bf16.mxu0 %v7238_v4  ;;  %v6908_v0 = vpack.c.bf16 %v3019_v63, %v3018_v62  ;;  %v5945_v63 = vld [vmem:[%s8632_s18] ss:$0 sm:$0xff] }
 0x695   : > { %v2419_v2 = vpop.f32.mrb[16].mxu1 }
 0x696   : > { %v6513_v3 = vpop.f32.mrb[17].mxu1  ;;  %6532 = vmatmul.mubr.msk.f32.vlgmr.msra.gmra.mrb[20].mxu1 %vm1914_vm5, %v2419_v2 }
 0x697   : > { %6540 = vmatpush3.msra.mxu1 %v2572_v1  ;;  %6541 = vmatprep.mubr.msk.f32.mxu1 %vm7239_vm1, %v7240_v16  ;;  %v5941_v1 = vld [vmem:[%s8629_s15] ss:$0 sm:$0xff] }
 0x698   : > { %6898 = vmatprep.subr.bf16.mxu1 %v7238_v4 }
 0x699   : > { %v2492_v5 = vpop.f32.mrb[20].mxu0 }
 0x69a   : > { %v6518_v30 = vpop.f32.mrb[21].mxu0  ;;  %6537 = vmatmul.mubr.msk.f32.vlgmr.msra.gmra.mrb[24].mxu0 %vm1914_vm5, %v2492_v5 }
 0x69b   : > { %6552 = vmatprep.mubr.msk.f32.mxu0 %vm7239_vm1, %v7240_v16  ;;  %6894 = vmatpush3.bf16.msra.mxu0 %v6893_v38 }
 0x69c   : > { %6895 = vmatprep.subr.bf16.mxu0 %v7238_v4 }
 0x69d   : > { %v2565_v6 = vpop.f32.mrb[18].mxu1 }
 0x69e   : > { %v6523_v7 = vpop.f32.mrb[19].mxu1  ;;  %6542 = vmatmul.mubr.msk.f32.vlgmr.msra.gmra.mrb[22].mxu1 %vm1914_vm5, %v2565_v6 }
 0x69f   : > { %6571 = vmatprep.mubr.msk.f32.mxu1 %vm7239_vm1, %v7240_v16  ;;  %6900 = vmatpush3.bf16.msra.mxu1 %v6899_v52  ;;  %v5957_v52 = vld [vmem:[%s8683_s25 + $0x1d0] sm:$0xff] }
 0x6a0   : > { %6901 = vmatprep.subr.bf16.mxu1 %v7238_v4 }
 0x6a3   : > { %6903 = vmatpush3.bf16.msra.mxu1 %v6902_v56  ;;  %v6926_v56 = vpack.c.bf16 %v5958_v55, %v5957_v52  ;;  %v5990_v52 = vld [vmem:[%s8683_s25 + $0x2d8] sm:$0xff] }
 0x6a4   : > { %6904 = vmatprep.subr.bf16.mxu1 %v7238_v4  ;;  %v6974_v55 = vpack.c.bf16 %v5990_v52, %v5989_v42 }
 0x6a7   : > { %6906 = vmatpush3.bf16.msra.mxu1 %v6905_v61 }
 0x6a8   : > { %6907 = vmatprep.subr.bf16.mxu1 %v7238_v4 }
 0x6ab   : > { %6909 = vmatpush3.bf16.msra.mxu1 %v6908_v0  ;;  %v5951_v0 = vld [vmem:[%s8683_s25 + $0x1a0] sm:$0xff] }
 0x6ac   : > { %6922 = vmatprep.subr.bf16.mxu1 %v7238_v4 }
 0x759   : > { %v2642_v8 = vpop.f32.mrb[22].mxu0 }
 0x75a   : > { %v6528_v9 = vpop.f32.mrb[23].mxu0  ;;  %v2865_v11 = vsel %vm907_vm4, %v2642_v8, 0.0 }
 0x769   : > { %v2715_v10 = vpop.f32.mrb[20].mxu1 }
 0x76a   : > { %v2866_v12 = vsel %vm907_vm4, %v2715_v10, 0.0  ;;  %v6533_v14 = vpop.f32.mrb[21].mxu1 }
 0x76b   : > { %v2867_v15 = vadd.f32 %v2866_v12, %v2865_v11 }
 0x76d   : > { %v2788_v17 = vpop.f32.mrb[24].mxu0 }
 0x76e   : > { %v2868_v18 = vsel %vm907_vm4, %v2788_v17, 0.0  ;;  %v6538_v19 = vpop.f32.mrb[25].mxu0 }
 0x76f   : > { %v2869_v20 = vadd.f32 %v2868_v18, %v2867_v15 }
 0x771   : > { %v2861_v21 = vpop.f32.mrb[22].mxu1 }
 0x772   : > { %v2870_v22 = vsel %vm907_vm4, %v2861_v21, 0.0  ;;  %v6543_v24 = vpop.f32.mrb[23].mxu1 }
 0x773   : > { %v2871_v25 = vadd.f32 %v2870_v22, %v2869_v20 }
 0x775   : > { %v2877_v26 = vadd.f32 %v5938_v23, %v2871_v25 }
 0x777   : > { %v2878_v27 = vadd.f32 %v2877_v26, %v7558_v13  ;;  %v2906_v13 = vld [vmem:[%s8628_s14 + $0x10] sm:$0xff] }
 0x778   : > { %v6896_v40 = vpack.c.bf16 %v2907_v39, %v2906_v13 }
 0x779   : > { %v2881_v28 = vsel %vm907_vm4, %v2878_v27, 0.0 }
 0x77a   : > { %2882 = vadd.xlane.f32.xlu1 %v2881_v28  ;;  %6897 = vmatpush3.bf16.msra.mxu0 %v6896_v40 }
 0x77b   : > { %6910 = vmatprep.subr.bf16.mxu0 %v7238_v4 }
 0x807   : > { %v2883_v29 = vpop.xlane.xlu1 %2882 }
 0x808   : > { %v2884_v31 = vmul.f32 0.03125, %v2883_v29 }
 0x80a   : > { %v2885_v32 = vsub.f32 %v2878_v27, %v2884_v31 }
 0x80c   : > { %v2886_v34 = vmul.f32 %v2885_v32, %v2885_v32 }
 0x80e   : > { %v2887_v35 = vsel %vm907_vm4, %v2886_v34, 0.0  ;;  %v5943_v34 = vld [vmem:[%s8631_s17] ss:$0 sm:$0xff] }
 0x80f   : > { %2888 = vadd.xlane.f32.xlu0 %v2887_v35 }
 0x89c   : > { %v2889_v41 = vpop.xlane.xlu0 %2888 }
 0x89d   : > { %v2890_v43 = vmul.f32 0.03125, %v2889_v41 }
 0x89f   : > { %v2891_v44 = vadd.f32 1e-12, %v2890_v43 }
 0x8a1   : > { %7137 = vrsqrt.f32 %v2891_v44 }
 0x8ab   : > { %v7138_v45 = vpop.eup %7137 }
 0x8ac   : > { %v2893_v47 = vmul.f32 %v7138_v45, %v2885_v32  ;;  %v5947_v45 = vld [vmem:[%s8683_s25 + $0x180] sm:$0xff] }
 0x8ae   : > { %v2898_v49 = vmul.f32 %v5939_v46, %v2893_v47  ;;  %v5948_v46 = vld [vmem:[%s8683_s25 + $0x188] sm:$0xff]  ;;  %v5955_v47 = vld [vmem:[%s8683_s25 + $0x1c0] sm:$0xff] }
 0x8b0   : > { %v2903_v50 = vadd.f32 %v5940_v48, %v2898_v49  ;;  %v6911_v48 = vpack.c.bf16 %v5948_v46, %v5947_v45  ;;  %v5956_v49 = vld [vmem:[%s8683_s25 + $0x1c8] sm:$0xff]  ;;  %v5987_v46 = vld [vmem:[%s8683_s25 + $0x2c0] sm:$0xff] }
 0x8b1   : > { %v5976_v45 = vld [vmem:[%s8683_s25 + $0x268] sm:$0xff] }
 0x8b2   : > { %6553 = vmatmul.mubr.msk.f32.vlgmr.msra.gmra.mrb[26].mxu0 %vm907_vm4, %v2903_v50 }
 0x8b3   : > { %6582 = vmatprep.mubr.msk.f32.mxu0 %vm7239_vm1, %v7240_v16  ;;  %6912 = vmatpush3.bf16.msra.mxu0 %v6911_v48 }
 0x8b4   : > { %6913 = vmatprep.subr.bf16.mxu0 %v7238_v4 }
 0x8b7   : > { %6915 = vmatpush3.bf16.msra.mxu0 %v6914_v54 }
 0x8b8   : > { %6916 = vmatprep.subr.bf16.mxu0 %v7238_v4 }
 0x985   : > { %v2982_v2 = vpop.f32.mrb[26].mxu0 }
 0x986   : > { %v2983_v3 = vadd.f32 %v5941_v1, %v2982_v2  ;;  %v6554_v5 = vpop.f32.mrb[27].mxu0  ;;  %v5952_v2 = vld [vmem:[%s8683_s25 + $0x1a8] sm:$0xff] }
 0x987   : > { %v5964_v5 = vld [vmem:[%s8683_s25 + $0x208] sm:$0xff] }
 0x988   : > { %v2987_v30 = vmul.f32 0.70710677, %v2983_v3  ;;  %v2986_v29 = vmul.f32 0.5, %v2983_v3  ;;  %v5963_v3 = vld [vmem:[%s8683_s25 + $0x200] sm:$0xff] }
 0x98a   : > { %v2990_v6 = vand.u32 2147483647, %v2987_v30  ;;  %vm2988_vm6 = vcmp.lt.f32.partialorder %v2987_v30, 0.0  ;;  %v5946_v30 = vld [vmem:[%s8633_s19] ss:$0 sm:$0xff] }
 0x98b   : > { %v2989_v27 = vsel %vm2988_vm6, -1.0, %v7241_v33 }
 0x98c   : > { %v2991_v7 = vmul.f32 0.3275911, %v2990_v6  ;;  %v3003_v9 = vsub.f32 0.0, %v2990_v6 }
 0x98e   : > { %v2992_v8 = vadd.f32 1.0, %v2991_v7  ;;  %v3004_v11 = vmul.f32 %v3003_v9, %v2990_v6  ;;  %v6917_v7 = vpack.c.bf16 %v5952_v2, %v5951_v0  ;;  %v5953_v9 = vld [vmem:[%s8683_s25 + $0x1b0] sm:$0xff]  ;;  %v5991_v0 = vld [vmem:[%s8683_s25 + $0x2e0] sm:$0xff] }
 0x990   : > { %7139 = vrcp.f32 %v2992_v8  ;;  %v3005_v15 = vmul.f32 1.442695, %v3004_v11  ;;  %v6935_v8 = vpack.c.bf16 %v5964_v5, %v5963_v3  ;;  %v5954_v11 = vld [vmem:[%s8683_s25 + $0x1b8] sm:$0xff]  ;;  %v5993_v3 = vld [vmem:[%s8683_s25 + $0x2f0] sm:$0xff] }
 0x991   : > { %v5994_v5 = vld [vmem:[%s8683_s25 + $0x2f8] sm:$0xff] }
 0x992   : > { %7141 = vpow2.f32 %v3005_v15  ;;  %v6920_v15 = vpack.c.bf16 %v5954_v11, %v5953_v9  ;;  %v6011_v11 = vld [vmem:[%s8686_s27 + $0x10] ss:$0 sm:$0xff] }
 0x99a   : > { %v7140_v10 = vpop.eup %7139 }
 0x99b   : > { %v2994_v12 = vmul.f32 1.0614054, %v7140_v10 }
 0x99c   : > { %v7142_v24 = vpop.eup %7141 }
 0x99d   : > { %v2995_v14 = vadd.f32 -1.4531521, %v2994_v12  ;;  %v5965_v12 = vld [vmem:[%s8683_s25 + $0x210] sm:$0xff] }
 0x99f   : > { %v2996_v17 = vmul.f32 %v7140_v10, %v2995_v14  ;;  %v5966_v14 = vld [vmem:[%s8683_s25 + $0x218] sm:$0xff] }
 0x9a1   : > { %v2997_v18 = vadd.f32 1.4214138, %v2996_v17  ;;  %v6938_v17 = vpack.c.bf16 %v5966_v14, %v5965_v12 }
 0x9a3   : > { %v2998_v19 = vmul.f32 %v7140_v10, %v2997_v18  ;;  %v5959_v18 = vld [vmem:[%s8683_s25 + $0x1e0] sm:$0xff] }
 0x9a5   : > { %v2999_v20 = vadd.f32 -0.28449672, %v2998_v19  ;;  %v5960_v19 = vld [vmem:[%s8683_s25 + $0x1e8] sm:$0xff] }
 0x9a7   : > { %v3000_v21 = vmul.f32 %v7140_v10, %v2999_v20  ;;  %v5971_v20 = vld [vmem:[%s8683_s25 + $0x240] sm:$0xff] }
 0x9a9   : > { %v3001_v22 = vadd.f32 0.2548296, %v3000_v21  ;;  %v5972_v21 = vld [vmem:[%s8683_s25 + $0x248] sm:$0xff] }
 0x9ab   : > { %v3002_v23 = vmul.f32 %v7140_v10, %v3001_v22  ;;  %v6929_v22 = vpack.c.bf16 %v5960_v19, %v5959_v18 }
 0x9ad   : > { %v3007_v25 = vmul.f32 %v7142_v24, %v3002_v23  ;;  %v6947_v23 = vpack.c.bf16 %v5972_v21, %v5971_v20  ;;  %v5961_v24 = vld [vmem:[%s8683_s25 + $0x1f0] sm:$0xff] }
 0x9ae   : > { %v6013_v21 = vld [vmem:[%s8686_s27 + $0x12] ss:$0 sm:$0xff] }
 0x9af   : > { %v3008_v26 = vsub.f32 1.0, %v3007_v25  ;;  %v5962_v25 = vld [vmem:[%s8683_s25 + $0x1f8] sm:$0xff] }
 0x9b1   : > { %v3009_v28 = vmul.f32 %v3008_v26, %v2989_v27  ;;  %v5973_v26 = vld [vmem:[%s8683_s25 + $0x250] sm:$0xff]  ;;  %v5974_v27 = vld [vmem:[%s8683_s25 + $0x258] sm:$0xff] }
 0x9b3   : > { %v3010_v31 = vadd.f32 1.0, %v3009_v28  ;;  %v6932_v28 = vpack.c.bf16 %v5962_v25, %v5961_v24  ;;  %v6009_v24 = vld [vmem:[%s8686_s27 + $0xe] ss:$0 sm:$0xff] }
 0x9b5   : > { %v3011_v32 = vmul.f32 %v3010_v31, %v2986_v29  ;;  %v6950_v29 = vpack.c.bf16 %v5974_v27, %v5973_v26  ;;  %v5967_v31 = vld [vmem:[%s8683_s25 + $0x220] sm:$0xff] }
 0x9b7   : > { %6572 = vmatmul.mubr.msk.f32.vlgmr.msra.gmra.mrb[24].mxu1 %vm3025_vm7, %v3011_v32  ;;  %v5968_v32 = vld [vmem:[%s8683_s25 + $0x228] sm:$0xff] }
 0x9b8   : > { %6604 = vmatprep.mubr.msk.f32.mxu1 %vm7239_vm1, %v7240_v16 }
 0xa8a   : > { %v3095_v35 = vpop.f32.mrb[24].mxu1 }
 0xa8b   : > { %v3096_v36 = vadd.f32 %v5943_v34, %v3095_v35  ;;  %v6573_v37 = vpop.f32.mrb[25].mxu1  ;;  %v5979_v34 = vld [vmem:[%s8683_s25 + $0x280] sm:$0xff]  ;;  %v5980_v35 = vld [vmem:[%s8683_s25 + $0x288] sm:$0xff] }
 0xa8c   : > { %v6959_v37 = vpack.c.bf16 %v5980_v35, %v5979_v34  ;;  %v6008_v35 = vld [vmem:[%s8686_s27 + $0xd] ss:$0 sm:$0xff] }
 0xa8d   : > { %v3099_v38 = vadd.f32 %v3096_v36, %v2903_v50  ;;  %v6923_v50 = vpack.c.bf16 %v5956_v49, %v5955_v47  ;;  %v6941_v36 = vpack.c.bf16 %v5968_v32, %v5967_v31  ;;  %v5988_v47 = vld [vmem:[%s8683_s25 + $0x2c8] sm:$0xff]  ;;  %v6015_v31 = vld [vmem:[%s8686_s27 + $0x14] ss:$0 sm:$0xff] }
 0xa8e   : > { %v6971_v49 = vpack.c.bf16 %v5988_v47, %v5987_v46 }
 0xa8f   : > { %v3102_v13 = vsel %vm907_vm4, %v3099_v38, 0.0  ;;  %6924 = vmatpush3.bf16.msra.mxu1 %v6923_v50  ;;  %v5977_v50 = vld [vmem:[%s8683_s25 + $0x270] sm:$0xff] }
 0xa90   : > { %3103 = vadd.xlane.f32.xlu1 %v3102_v13  ;;  %6925 = vmatprep.subr.bf16.mxu1 %v7238_v4  ;;  %v5970_v13 = vld [vmem:[%s8683_s25 + $0x238] sm:$0xff]  ;;  %v6956_v54 = vpack.c.bf16 %v5978_v51, %v5977_v50 }
 0xa93   : > { %6927 = vmatpush3.bf16.msra.mxu1 %v6926_v56  ;;  %v5983_v56 = vld [vmem:[%s8683_s25 + $0x2a0] sm:$0xff] }
 0xa94   : > { %6934 = vmatprep.subr.bf16.mxu1 %v7238_v4 }
 0xb1d   : > { %v3104_v39 = vpop.xlane.xlu1 %3103 }
 0xb1e   : > { %v3105_v40 = vmul.f32 0.03125, %v3104_v39  ;;  %v5981_v39 = vld [vmem:[%s8683_s25 + $0x290] sm:$0xff] }
 0xb20   : > { %v3106_v41 = vsub.f32 %v3099_v38, %v3105_v40  ;;  %v5969_v38 = vld [vmem:[%s8683_s25 + $0x230] sm:$0xff]  ;;  %v5982_v40 = vld [vmem:[%s8683_s25 + $0x298] sm:$0xff] }
 0xb22   : > { %v3107_v43 = vmul.f32 %v3106_v41, %v3106_v41 }
 0xb24   : > { %v3108_v44 = vsel %vm907_vm4, %v3107_v43, 0.0  ;;  %v6962_v43 = vpack.c.bf16 %v5982_v40, %v5981_v39  ;;  %v6014_v40 = vld [vmem:[%s8686_s27 + $0x13] ss:$0 sm:$0xff] }
 0xb25   : > { %3109 = vadd.xlane.f32.xlu0 %v3108_v44  ;;  %v5975_v44 = vld [vmem:[%s8683_s25 + $0x260] sm:$0xff] }
 0xb26   : > { %v6953_v48 = vpack.c.bf16 %v5976_v45, %v5975_v44  ;;  %v6010_v44 = vld [vmem:[%s8686_s27 + $0xf] ss:$0 sm:$0xff] }
 0xbb2   : > { %v3110_v58 = vpop.xlane.xlu0 %3109 }
 0xbb3   : > { %v3111_v53 = vmul.f32 0.03125, %v3110_v58  ;;  %v5984_v58 = vld [vmem:[%s8683_s25 + $0x2a8] sm:$0xff] }
 0xbb5   : > { %v3112_v61 = vadd.f32 1e-12, %v3111_v53  ;;  %v6965_v53 = vpack.c.bf16 %v5984_v58, %v5983_v56 }
 0xbb7   : > { %7143 = vrsqrt.f32 %v3112_v61  ;;  %v5985_v61 = vld [vmem:[%s8683_s25 + $0x2b0] sm:$0xff] }
 0xbc1   : > { %v7144_v62 = vpop.eup %7143 }
 0xbc2   : > { %v3114_v1 = vmul.f32 %v7144_v62, %v3106_v41  ;;  %v6944_v41 = vpack.c.bf16 %v5970_v13, %v5969_v38  ;;  %v5986_v62 = vld [vmem:[%s8683_s25 + $0x2b8] sm:$0xff] }
 0xbc4   : > { %v3119_v6 = vmul.f32 %v5945_v63, %v3114_v1  ;;  %v6968_v63 = vpack.c.bf16 %v5986_v62, %v5985_v61  ;;  %v5992_v1 = vld [vmem:[%s8683_s25 + $0x2e8] sm:$0xff] }
 0xbc5   : > { %v6977_v2 = vpack.c.bf16 %v5992_v1, %v5991_v0 }
 0xbc6   : > { %v7985_v10 = vadd.f32 %v5946_v30, %v3119_v6  ;;  %v6980_v30 = vpack.c.bf16 %v5994_v5, %v5993_v3 }
 0xbc8   : > { %6583 = vmatmul.mubr.msk.f32.vlgmr.msra.gmra.mrb[28].mxu0 %vm907_vm4, %v7985_v10  ;;  %6605 = vmatmul.mubr.msk.f32.vlgmr.msra.gmra.mrb[26].mxu1 %vm907_vm4, %v7985_v10 }
 0xbc9   : > { %6918 = vmatpush3.bf16.msra.mxu0 %v6917_v7  ;;  %6936 = vmatpush3.bf16.msra.mxu1 %v6935_v8 }
 0xbca   : > { %6919 = vmatprep.subr.bf16.mxu0 %v7238_v4  ;;  %6937 = vmatprep.subr.bf16.mxu1 %v7238_v4 }
 0xbcb   : > { %6593 = vmatprep.mubr.msk.f32.mxu0 %vm7239_vm1, %v7240_v16  ;;  %6626 = vmatprep.mubr.msk.f32.mxu1 %vm7239_vm1, %v7240_v16 }
 0xbcd   : > { %6921 = vmatpush3.bf16.msra.mxu0 %v6920_v15  ;;  %6939 = vmatpush3.bf16.msra.mxu1 %v6938_v17  ;;  %v6007_v15 = vld [vmem:[%s8686_s27 + $0xc] ss:$0 sm:$0xff] }
 0xbce   : > { %6928 = vmatprep.subr.bf16.mxu0 %v7238_v4  ;;  %6946 = vmatprep.subr.bf16.mxu1 %v7238_v4 }
 0xbd0   : > { %6594 = vmatmul.mubr.msk.f32.vlgmr.msra.gmra.mrb[30].mxu0 %vm907_vm4, %v7985_v10  ;;  %6627 = vmatmul.mubr.msk.f32.vlgmr.msra.gmra.mrb[28].mxu1 %vm907_vm4, %v7985_v10 }
 0xbd1   : > { %6930 = vmatpush3.bf16.msra.mxu0 %v6929_v22  ;;  %6948 = vmatpush3.bf16.msra.mxu1 %v6947_v23 }
 0xbd2   : > { %6931 = vmatprep.subr.bf16.mxu0 %v7238_v4  ;;  %6949 = vmatprep.subr.bf16.mxu1 %v7238_v4 }
 0xbd3   : > { %6615 = vmatprep.mubr.msk.f32.mxu0 %vm7239_vm1, %v7240_v16  ;;  %6648 = vmatprep.mubr.msk.f32.mxu1 %vm7239_vm1, %v7240_v16 }
 0xbd5   : > { %6933 = vmatpush3.bf16.msra.mxu0 %v6932_v28  ;;  %6951 = vmatpush3.bf16.msra.mxu1 %v6950_v29  ;;  %v6012_v29 = vld [vmem:[%s8686_s27 + $0x11] ss:$0 sm:$0xff] }
 0xbd6   : > { %6940 = vmatprep.subr.bf16.mxu0 %v7238_v4  ;;  %6958 = vmatprep.subr.bf16.mxu1 %v7238_v4 }
 0xbd8   : > { %6616 = vmatmul.mubr.msk.f32.vlgmr.msra.gmra.mrb[32].mxu0 %vm907_vm4, %v7985_v10  ;;  %6649 = vmatmul.mubr.msk.f32.vlgmr.msra.gmra.mrb[30].mxu1 %vm907_vm4, %v7985_v10 }
 0xbd9   : > { %6942 = vmatpush3.bf16.msra.mxu0 %v6941_v36  ;;  %6960 = vmatpush3.bf16.msra.mxu1 %v6959_v37 }
 0xbda   : > { %6943 = vmatprep.subr.bf16.mxu0 %v7238_v4  ;;  %6961 = vmatprep.subr.bf16.mxu1 %v7238_v4 }
 0xbdb   : > { %6637 = vmatprep.mubr.msk.f32.mxu0 %vm7239_vm1, %v7240_v16  ;;  %6670 = vmatprep.mubr.msk.f32.mxu1 %vm7239_vm1, %v7240_v16 }
 0xbdd   : > { %6945 = vmatpush3.bf16.msra.mxu0 %v6944_v41  ;;  %6963 = vmatpush3.bf16.msra.mxu1 %v6962_v43 }
 0xbde   : > { %6952 = vmatprep.subr.bf16.mxu0 %v7238_v4  ;;  %6970 = vmatprep.subr.bf16.mxu1 %v7238_v4 }
 0xbe0   : > { %6638 = vmatmul.mubr.msk.f32.vlgmr.msra.gmra.mrb[34].mxu0 %vm907_vm4, %v7985_v10  ;;  %6671 = vmatmul.mubr.msk.f32.vlgmr.msra.gmra.mrb[32].mxu1 %vm907_vm4, %v7985_v10 }
 0xbe1   : > { %6954 = vmatpush3.bf16.msra.mxu0 %v6953_v48  ;;  %6972 = vmatpush3.bf16.msra.mxu1 %v6971_v49  ;;  %v6016_v49 = vld [vmem:[%s8686_s27 + $0x15] ss:$0 sm:$0xff] }
 0xbe2   : > { %6955 = vmatprep.subr.bf16.mxu0 %v7238_v4  ;;  %6973 = vmatprep.subr.bf16.mxu1 %v7238_v4 }
 0xbe3   : > { %6659 = vmatprep.mubr.msk.f32.mxu0 %vm7239_vm1, %v7240_v16  ;;  %6692 = vmatprep.mubr.msk.f32.mxu1 %vm7239_vm1, %v7240_v16 }
 0xbe5   : > { %6957 = vmatpush3.bf16.msra.mxu0 %v6956_v54  ;;  %6975 = vmatpush3.bf16.msra.mxu1 %v6974_v55 }
 0xbe6   : > { %6964 = vmatprep.subr.bf16.mxu0 %v7238_v4  ;;  %6706 = vmatprep.subr.mxu1 %v7240_v16 }
 0xbe8   : > { %6660 = vmatmul.mubr.msk.f32.vlgmr.msra.gmra.mrb[36].mxu0 %vm907_vm4, %v7985_v10  ;;  %6693 = vmatmul.mubr.msk.f32.vlgmr.msra.gmra.mrb[34].mxu1 %vm907_vm4, %v7985_v10 }
 0xbe9   : > { %6966 = vmatpush3.bf16.msra.mxu0 %v6965_v53  ;;  %6681 = vmatprep.mubr.msk.f32.mxu0 %vm7239_vm1, %v7240_v16 }
 0xbea   : > { %6967 = vmatprep.subr.bf16.mxu0 %v7238_v4  ;;  %6708 = vmatprep.mubr.msk.f32.mxu1 %vm7239_vm1, %v7240_v16 }
 0xbed   : > { %6969 = vmatpush3.bf16.msra.mxu0 %v6968_v63 }
 0xbee   : > { %6976 = vmatprep.subr.bf16.mxu0 %v7238_v4 }
 0xbf0   : > { %6682 = vmatmul.mubr.msk.f32.vlgmr.msra.gmra.mrb[38].mxu0 %vm907_vm4, %v7985_v10 }
 0xbf1   : > { %6978 = vmatpush3.bf16.msra.mxu0 %v6977_v2  ;;  %6703 = vmatprep.mubr.msk.f32.mxu0 %vm7239_vm1, %v7240_v16 }
 0xbf2   : > { %6979 = vmatprep.subr.bf16.mxu0 %v7238_v4 }
 0xbf5   : > { %6981 = vmatpush3.bf16.msra.mxu0 %v6980_v30 }
 0xbf6   : > { %6716 = vmatprep.subr.mxu0 %v7240_v16 }
 0xbf8   : > { %6704 = vmatmul.mubr.msk.f32.vlgmr.msra.gmra.mrb[40].mxu0 %vm907_vm4, %v7985_v10 }
 0xbf9   : > { %6718 = vmatprep.mubr.msk.f32.mxu0 %vm7239_vm1, %v7240_v16 }
 0xc9b   : > { %v3328_v6 = vpop.f32.mrb[28].mxu0  ;;  %v3468_v7 = vpop.f32.mrb[26].mxu1 }
 0xc9c   : > { %v6584_v8 = vpop.f32.mrb[29].mxu0  ;;  %v6606_v9 = vpop.f32.mrb[27].mxu1  ;;  %v3329_v20 = vadd.f32 %v6007_v15, %v3328_v6  ;;  %v3469_v28 = vadd.f32 %v6009_v24, %v3468_v7 }
 0xca3   : > { %v3398_v12 = vpop.f32.mrb[30].mxu0  ;;  %v3608_v14 = vpop.f32.mrb[28].mxu1 }
 0xca4   : > { %v3609_v17 = vadd.f32 %v6011_v11, %v3608_v14  ;;  %v6595_v18 = vpop.f32.mrb[31].mxu0  ;;  %v6628_v19 = vpop.f32.mrb[29].mxu1  ;;  %v3399_v39 = vadd.f32 %v6008_v35, %v3398_v12 }
 0xca6   : > { %6707 = vmatpush3.xpose.msk.msra.mxu1 %vm1914_vm5, %v3609_v17 }
 0xca7   : > { %6711 = vmatprep.subr.mxu1 %v7240_v16 }
 0xca9   : > { %6709 = vmatmul.mubr.msk.f32.vlgmr.msra.gmra.mrb[36].mxu1 %vm1914_vm5, %v3329_v20 }
 0xcaa   : > { %6713 = vmatprep.mubr.msk.f32.mxu1 %vm7239_vm1, %v7240_v16 }
 0xcab   : > { %v3538_v22 = vpop.f32.mrb[32].mxu0  ;;  %v3748_v23 = vpop.f32.mrb[30].mxu1 }
 0xcac   : > { %v3749_v25 = vadd.f32 %v6013_v21, %v3748_v23  ;;  %v6617_v26 = vpop.f32.mrb[33].mxu0  ;;  %v6650_v27 = vpop.f32.mrb[31].mxu1  ;;  %v3539_v48 = vadd.f32 %v6010_v44, %v3538_v22 }
 0xcae   : > { %6717 = vmatpush3.xpose.msk.msra.mxu0 %vm1914_vm5, %v3749_v25 }
 0xcaf   : > { %6726 = vmatprep.subr.mxu0 %v7240_v16 }
 0xcb1   : > { %6719 = vmatmul.mubr.msk.f32.vlgmr.msra.gmra.mrb[42].mxu0 %vm1914_vm5, %v3469_v28 }
 0xcb2   : > { %6728 = vmatprep.mubr.msk.f32.mxu0 %vm7239_vm1, %v7240_v16 }
 0xcb3   : > { %v3678_v32 = vpop.f32.mrb[34].mxu0  ;;  %v3888_v34 = vpop.f32.mrb[32].mxu1 }
 0xcb4   : > { %v3679_v36 = vadd.f32 %v6012_v29, %v3678_v32  ;;  %v3889_v37 = vadd.f32 %v6015_v31, %v3888_v34  ;;  %v6639_v38 = vpop.f32.mrb[35].mxu0  ;;  %v6672_v13 = vpop.f32.mrb[33].mxu1 }
 0xcb5   : > { %v6017_v13 = vld [vmem:[%s8686_s27 + $0x16] ss:$0 sm:$0xff] }
 0xcb6   : > { %6712 = vmatpush3.xpose.msk.msra.mxu1 %vm1914_vm5, %v3679_v36  ;;  %6727 = vmatpush3.msra.mxu0 %v3889_v37 }
 0xcb7   : > { %6721 = vmatprep.subr.mxu1 %v7240_v16  ;;  %6736 = vmatprep.subr.mxu0 %v7240_v16 }
 0xcb9   : > { %6714 = vmatmul.mubr.msk.f32.vlgmr.msra.gmra.mrb[38].mxu1 %vm1914_vm5, %v3399_v39 }
 0xcba   : > { %6723 = vmatprep.mubr.msk.f32.mxu1 %vm7239_vm1, %v7240_v16 }
 0xcbb   : > { %v3818_v41 = vpop.f32.mrb[36].mxu0  ;;  %v8200_v43 = vpop.f32.mrb[34].mxu1 }
 0xcbc   : > { %v3819_v45 = vadd.f32 %v6014_v40, %v3818_v41  ;;  %v6661_v46 = vpop.f32.mrb[37].mxu0  ;;  %v6694_v47 = vpop.f32.mrb[35].mxu1  ;;  %v4029_v41 = vadd.f32 %v6017_v13, %v8200_v43  ;;  %v6018_v43 = vld [vmem:[%s8686_s27 + $0x17] ss:$0 sm:$0xff] }
 0xcbe   : > { %6722 = vmatpush3.xpose.msk.msra.mxu1 %vm1914_vm5, %v3819_v45 }
 0xcbf   : > { %6731 = vmatprep.subr.mxu1 %v7240_v16 }
 0xcc1   : > { %6724 = vmatmul.mubr.msk.f32.vlgmr.msra.gmra.mrb[40].mxu1 %vm1914_vm5, %v3539_v48 }
 0xcc2   : > { %6733 = vmatprep.mubr.msk.f32.mxu1 %vm7239_vm1, %v7240_v16 }
 0xcc3   : > { %v3958_v50 = vpop.f32.mrb[38].mxu0 }
 0xcc4   : > { %v3959_v51 = vadd.f32 %v6016_v49, %v3958_v50  ;;  %v6683_v42 = vpop.f32.mrb[39].mxu0 }
 0xcc6   : > { %6732 = vmatpush3.msra.mxu1 %v3959_v51 }
 0xcc7   : > { %6741 = vmatprep.subr.mxu1 %v7240_v16 }
 0xccb   : > { %v8214_v52 = vpop.f32.mrb[40].mxu0 }
 0xccc   : > { %v6705_v54 = vpop.f32.mrb[41].mxu0  ;;  %v4099_v50 = vadd.f32 %v6018_v43, %v8214_v52  ;;  %v6044_v52 = vld [vmem:[%s8688_s10 + $0x28] sm:$0xff] }
 0xccd   : > { %v6043_v54 = vld [vmem:[%s8688_s10 + $0x20] sm:$0xff] }
 0xd7c   : > { %v4174_v55 = vpop.f32.mrb[36].mxu1 }
 0xd7d   : > { %v4406_v56 = vmul.f32 0.35355338, %v4174_v55  ;;  %v6710_v58 = vpop.f32.mrb[37].mxu1  ;;  %v6045_v55 = vld [vmem:[%s8688_s10 + $0x30] sm:$0xff] }
 0xd7f   : > { %v4410_v53 = vadd.f32 %v4406_v56, %v7799_v60 }
 0xd81   : > { %v4414_v61 = vsel %vm1914_vm5, %v4410_v53, -inf }
 0xd82   : > { %4415 = vmax.xlane.f32.xlu1 %v4414_v61 }
 0xd84   : > { %v4326_v62 = vpop.f32.mrb[42].mxu0 }
 0xd85   : > { %v4408_v63 = vmul.f32 0.35355338, %v4326_v62  ;;  %v6720_v0 = vpop.f32.mrb[43].mxu0  ;;  %v6046_v62 = vld [vmem:[%s8688_s10 + $0x38] sm:$0xff]  ;;  %s7177_s10 = sshll.u32 %s7242_s9, 4  ;;  %s7178_s10 = int_to_ptr.vmem [resolvable:$false] %s7177_s10 }
 0xd86   : > { %p7180_p0 = scmp.lt.s32.totalorder %s8573_s0, %s7178_s10 }
 0xd87   : > { %v4412_v1 = vadd.f32 %v4408_v63, %v7799_v60 }
 0xd89   : > { %v4420_v2 = vsel %vm1914_vm5, %v4412_v1, -inf }
 0xd8a   : > { %4421 = vmax.xlane.f32.xlu1 %v4420_v2 }
 0xd8c   : > { %v4250_v3 = vpop.f32.mrb[38].mxu1 }
 0xd8d   : > { %v4407_v5 = vmul.f32 0.35355338, %v4250_v3  ;;  %v6715_v30 = vpop.f32.mrb[39].mxu1 }
 0xd8f   : > { %v4411_v6 = vadd.f32 %v4407_v5, %v7799_v60 }
 0xd91   : > { %v4417_v7 = vsel %vm1914_vm5, %v4411_v6, -inf }
 0xd92   : > { %4418 = vmax.xlane.f32.xlu0 %v4417_v7 }
 0xd94   : > { %v4402_v8 = vpop.f32.mrb[40].mxu1 }
 0xd95   : > { %v4409_v9 = vmul.f32 0.35355338, %v4402_v8  ;;  %v6725_v11 = vpop.f32.mrb[41].mxu1 }
 0xd97   : > { %v4413_v12 = vadd.f32 %v4409_v9, %v7799_v60 }
 0xd99   : > { %v4423_v14 = vsel %vm1914_vm5, %v4413_v12, -inf }
 0xd9a   : > { %4424 = vmax.xlane.f32.xlu0 %v4423_v14 }
 0xe0f   : > { %v4416_v15 = vpop.xlane.xlu1 %4415 }
 0xe10   : > { %v4426_v17 = vsub.f32 %v4410_v53, %v4416_v15 }
 0xe12   : > { %v4430_v18 = vmul.f32 1.442695, %v4426_v17 }
 0xe14   : > { %7145 = vpow2.f32 %v4430_v18 }
 0xe17   : > { %v4422_v19 = vpop.xlane.xlu1 %4421 }
 0xe18   : > { %v4428_v20 = vsub.f32 %v4412_v1, %v4422_v19  ;;  %v6051_v19 = vld [vmem:[%s8689_s11 + $0x1] ss:$0 sm:$0xff]  ;;  %s7179_s11 = scalar_lea.vmem %s7178_s10, 32 }
 0xe19   : > { %p7181_p1 = scmp.lt.s32.totalorder %s7179_s11, %s7173_s26 }
 0xe1a   : > { %v4434_v21 = vmul.f32 1.442695, %v4428_v20 }
 0xe1b   : > { %p7182_p2 = por %p7181_p1, %p7180_p0 }
 0xe1c   : > { %7147 = vpow2.f32 %v4434_v21 }
 0xe1d   : > { %p7183_p3 = pnand %p7182_p2, %p7176_p13 }
 0xe1e   : > { %v7146_v22 = vpop.eup %7145 }
 0xe1f   : > { %v4419_v23 = vpop.xlane.xlu0 %4418  ;;  %v4438_v24 = vsel %vm1914_vm5, %v7146_v22, 0.0 }
 0xe20   : > { %v4427_v25 = vsub.f32 %v4411_v6, %v4419_v23  ;;  %4439 = vadd.xlane.f32.xlu1 %v4438_v24 }
 0xe22   : > { %v4432_v26 = vmul.f32 1.442695, %v4427_v25 }
 0xe24   : > { %7149 = vpow2.f32 %v4432_v26 }
 0xe26   : > { %v7148_v60 = vpop.eup %7147 }
 0xe27   : > { %v4425_v27 = vpop.xlane.xlu0 %4424  ;;  %v4444_v28 = vsel %vm1914_vm5, %v7148_v60, 0.0 }
 0xe28   : > { %v4429_v29 = vsub.f32 %v4413_v12, %v4425_v27  ;;  %4445 = vadd.xlane.f32.xlu1 %v4444_v28 }
 0xe2a   : > { %v4436_v31 = vmul.f32 1.442695, %v4429_v29  ;;  %v6054_v29 = vld [vmem:[%s8628_s14 + $0x20] sm:$0xff] }
 0xe2c   : > { %7151 = vpow2.f32 %v4436_v31  ;;  %v6055_v31 = vld [vmem:[%s8628_s14 + $0x28] sm:$0xff] }
 0xe2e   : > { %v7150_v32 = vpop.eup %7149 }
 0xe2f   : > { %v4441_v34 = vsel %vm1914_vm5, %v7150_v32, 0.0 }
 0xe30   : > { %4442 = vadd.xlane.f32.xlu0 %v4441_v34  ;;  %v6057_v34 = vld [vmem:[%s8628_s14 + $0x38] sm:$0xff] }
 0xe36   : > { %v7152_v35 = vpop.eup %7151 }
 0xe37   : > { %v4447_v36 = vsel %vm1914_vm5, %v7152_v35, 0.0 }
 0xe38   : > { %4448 = vadd.xlane.f32.xlu0 %v4447_v36 }
 0xead   : > { %v4440_v37 = vpop.xlane.xlu1 %4439 }
 0xeae   : > { %7153 = vrcp.f32 %v4440_v37 }
 0xeb5   : > { %v4446_v38 = vpop.xlane.xlu1 %4445 }
 0xeb6   : > { %7155 = vrcp.f32 %v4446_v38 }
 0xeb8   : > { %v7154_v39 = vpop.eup %7153 }
 0xeb9   : > { %v4454_v40 = vmul.f32 %v7154_v39, %v7146_v22  ;;  %v6052_v39 = vld [vmem:[%s8626_s12 + $0x1] ss:$0 sm:$0xff] }
 0xebb   : > { %6729 = vmatmul.mubr.msk.f32.vlgmr.msra.gmra.mrb[44].mxu0 %vm1914_vm5, %v4454_v40 }
 0xebc   : > { %6737 = vmatpush3.msra.mxu0 %v4029_v41  ;;  %6738 = vmatprep.mubr.msk.f32.mxu0 %vm7239_vm1, %v7240_v16  ;;  %v6053_v41 = vld [vmem:[%s8627_s13 + $0x1] ss:$0 sm:$0xff] }
 0xebd   : > { %v4443_v44 = vpop.xlane.xlu0 %4442  ;;  %6746 = vmatprep.subr.mxu0 %v7240_v16 }
 0xebe   : > { %7157 = vrcp.f32 %v4443_v44 }
 0xec0   : > { %v7156_v45 = vpop.eup %7155 }
 0xec1   : > { %v4456_v46 = vmul.f32 %v7156_v45, %v7148_v60 }
 0xec3   : > { %6739 = vmatmul.mubr.msk.f32.vlgmr.msra.gmra.mrb[46].mxu0 %vm1914_vm5, %v4456_v46  ;;  %v6060_v46 = vld [vmem:[%s8630_s16 + $0x40] sm:$0xff] }
 0xec4   : > { %6748 = vmatprep.mubr.msk.f32.mxu0 %vm7239_vm1, %v7240_v16  ;;  %6747 = vmatpush3.msra.mxu0 %v6043_v54 }
 0xec5   : > { %v4449_v47 = vpop.xlane.xlu0 %4448  ;;  %6756 = vmatprep.subr.mxu0 %v7240_v16 }
 0xec6   : > { %7159 = vrcp.f32 %v4449_v47  ;;  %v6061_v47 = vld [vmem:[%s8630_s16 + $0x48] sm:$0xff] }
 0xec7   : > { %v6989_v43 = vpack.c.bf16 %v6061_v47, %v6060_v46  ;;  %v6076_v47 = vld [vmem:[%s8634_s20 + $0x60] sm:$0xff] }
 0xec8   : > { %v7158_v48 = vpop.eup %7157 }
 0xec9   : > { %v4455_v49 = vmul.f32 %v7158_v48, %v7150_v32  ;;  %v6983_v32 = vpack.c.bf16 %v6055_v31, %v6054_v29  ;;  %v6062_v48 = vld [vmem:[%s8630_s16 + $0x50] sm:$0xff] }
 0xecb   : > { %6734 = vmatmul.mubr.msk.f32.vlgmr.msra.gmra.mrb[42].mxu1 %vm1914_vm5, %v4455_v49  ;;  %v6063_v49 = vld [vmem:[%s8630_s16 + $0x58] sm:$0xff] }
 0xecc   : > { %6742 = vmatpush3.msra.mxu1 %v4099_v50  ;;  %6743 = vmatprep.mubr.msk.f32.mxu1 %vm7239_vm1, %v7240_v16  ;;  %v6992_v50 = vpack.c.bf16 %v6063_v49, %v6062_v48  ;;  %v5309_v49 = vld [vmem:[%s8634_s20 + $0x8] sm:$0xff] }
 0xecd   : > { %6751 = vmatprep.subr.mxu1 %v7240_v16 }
 0xed0   : > { %v7160_v51 = vpop.eup %7159 }
 0xed1   : > { %v4457_v42 = vmul.f32 %v7160_v51, %v7152_v35  ;;  %v6064_v51 = vld [vmem:[%s8630_s16 + $0x60] sm:$0xff] }
 0xed3   : > { %6744 = vmatmul.mubr.msk.f32.vlgmr.msra.gmra.mrb[44].mxu1 %vm1914_vm5, %v4457_v42  ;;  %v6065_v42 = vld [vmem:[%s8630_s16 + $0x68] sm:$0xff] }
 0xed4   : > { %6753 = vmatprep.mubr.msk.f32.mxu1 %vm7239_vm1, %v7240_v16  ;;  %6752 = vmatpush3.msra.mxu1 %v6044_v52  ;;  %v6995_v54 = vpack.c.bf16 %v6065_v42, %v6064_v51  ;;  %v6066_v52 = vld [vmem:[%s8630_s16 + $0x70] sm:$0xff]  ;;  %v5686_v42 = vld [vmem:[%s8637_s23] sm:$0xff] }
 0xed5   : > { %6761 = vmatprep.subr.mxu1 %v7240_v16 }
 0xf8e   : > { %v4527_v56 = vpop.f32.mrb[44].mxu0 }
 0xf8f   : > { %v6730_v58 = vpop.f32.mrb[45].mxu0  ;;  %6749 = vmatmul.mubr.msk.f32.vlgmr.msra.gmra.mrb[48].mxu0 %vm1914_vm5, %v4527_v56 }
 0xf90   : > { %6757 = vmatpush3.msra.mxu0 %v6045_v55  ;;  %6758 = vmatprep.mubr.msk.f32.mxu0 %vm7239_vm1, %v7240_v16  ;;  %v6067_v55 = vld [vmem:[%s8630_s16 + $0x78] sm:$0xff]  ;;  %v6058_v58 = vld [vmem:[%s8629_s15 + $0x1] ss:$0 sm:$0xff] }
 0xf91   : > { %6982 = vmatprep.subr.bf16.mxu0 %v7238_v4  ;;  %v6998_v56 = vpack.c.bf16 %v6067_v55, %v6066_v52  ;;  %v5688_v52 = vld [vmem:[%s8637_s23 + $0x10] sm:$0xff] }
 0xf96   : > { %v4673_v53 = vpop.f32.mrb[46].mxu0 }
 0xf97   : > { %v6740_v61 = vpop.f32.mrb[47].mxu0  ;;  %6759 = vmatmul.mubr.msk.f32.vlgmr.msra.gmra.mrb[50].mxu0 %vm1914_vm5, %v4673_v53 }
 0xf98   : > { %6774 = vmatprep.mubr.msk.f32.mxu0 %vm7239_vm1, %v7240_v16  ;;  %6984 = vmatpush3.bf16.msra.mxu0 %v6983_v32 }
 0xf99   : > { %6985 = vmatprep.subr.bf16.mxu0 %v7238_v4 }
 0xf9e   : > { %v4600_v63 = vpop.f32.mrb[42].mxu1 }
 0xf9f   : > { %v6735_v0 = vpop.f32.mrb[43].mxu1  ;;  %6754 = vmatmul.mubr.msk.f32.vlgmr.msra.gmra.mrb[46].mxu1 %vm1914_vm5, %v4600_v63 }
 0xfa0   : > { %6762 = vmatpush3.msra.mxu1 %v6046_v62  ;;  %6763 = vmatprep.mubr.msk.f32.mxu1 %vm7239_vm1, %v7240_v16 }
 0xfa1   : > { %6988 = vmatprep.subr.bf16.mxu1 %v7238_v4 }
 0xfa6   : > { %v4746_v1 = vpop.f32.mrb[44].mxu1 }
 0xfa7   : > { %v6745_v2 = vpop.f32.mrb[45].mxu1  ;;  %6764 = vmatmul.mubr.msk.f32.vlgmr.msra.gmra.mrb[48].mxu1 %vm1914_vm5, %v4746_v1 }
 0xfa8   : > { %6793 = vmatprep.mubr.msk.f32.mxu1 %vm7239_vm1, %v7240_v16  ;;  %6990 = vmatpush3.bf16.msra.mxu1 %v6989_v43  ;;  %v6078_v43 = vld [vmem:[%s8634_s20 + $0x70] sm:$0xff] }
 0xfa9   : > { %6991 = vmatprep.subr.bf16.mxu1 %v7238_v4  ;;  %v7006_v48 = vpack.c.bf16 %v6078_v43, %v6076_v47  ;;  %v6094_v47 = vld [vmem:[%s8634_s20 + $0xd8] sm:$0xff] }
 0xfac   : > { %6993 = vmatpush3.bf16.msra.mxu1 %v6992_v50  ;;  %v5311_v50 = vld [vmem:[%s8634_s20 + $0x18] sm:$0xff] }
 0xfad   : > { %6994 = vmatprep.subr.bf16.mxu1 %v7238_v4  ;;  %v7008_v51 = vpack.c.bf16 %v5311_v50, %v5309_v49  ;;  %v6091_v49 = vld [vmem:[%s8634_s20 + $0xc0] sm:$0xff]  ;;  %v6093_v50 = vld [vmem:[%s8634_s20 + $0xd0] sm:$0xff] }
 0xfb0   : > { %6996 = vmatpush3.bf16.msra.mxu1 %v6995_v54  ;;  %v5687_v54 = vld [vmem:[%s8637_s23 + $0x8] sm:$0xff] }
 0xfb1   : > { %6997 = vmatprep.subr.bf16.mxu1 %v7238_v4  ;;  %v7033_v55 = vpack.c.bf16 %v5687_v54, %v5686_v42  ;;  %v5488_v42 = vrot.slane %v7240_v16, 2  ;;  %v6096_v54 = vld [vmem:[%s8634_s20 + $0xe8] sm:$0xff] }
 0xfb4   : > { %6999 = vmatpush3.bf16.msra.mxu1 %v6998_v56  ;;  %v5689_v56 = vld [vmem:[%s8637_s23 + $0x18] sm:$0xff] }
 0xfb5   : > { %7032 = vmatprep.subr.bf16.mxu1 %v7238_v4 }
0x1062   : > { %v4824_v3 = vpop.f32.mrb[48].mxu0 }
0x1063   : > { %v6750_v5 = vpop.f32.mrb[49].mxu0  ;;  %v5047_v8 = vsel %vm907_vm4, %v4824_v3, 0.0 }
0x106a   : > { %v4970_v30 = vpop.f32.mrb[50].mxu0 }
0x106b   : > { %v6760_v6 = vpop.f32.mrb[51].mxu0  ;;  %v5050_v14 = vsel %vm907_vm4, %v4970_v30, 0.0 }
0x1072   : > { %v4897_v7 = vpop.f32.mrb[46].mxu1 }
0x1073   : > { %v5048_v9 = vsel %vm907_vm4, %v4897_v7, 0.0  ;;  %v6755_v11 = vpop.f32.mrb[47].mxu1 }
0x1074   : > { %v5049_v12 = vadd.f32 %v5048_v9, %v5047_v8 }
0x1076   : > { %v5051_v15 = vadd.f32 %v5050_v14, %v5049_v12 }
0x107a   : > { %v5043_v17 = vpop.f32.mrb[48].mxu1 }
0x107b   : > { %v5052_v18 = vsel %vm907_vm4, %v5043_v17, 0.0  ;;  %v6765_v20 = vpop.f32.mrb[49].mxu1 }
0x107c   : > { %v5053_v21 = vadd.f32 %v5052_v18, %v5051_v15 }
0x107e   : > { %v5059_v22 = vadd.f32 %v6051_v19, %v5053_v21 }
0x1080   : > { %v5060_v23 = vadd.f32 %v5059_v22, %v7985_v10  ;;  %v6056_v10 = vld [vmem:[%s8628_s14 + $0x30] sm:$0xff] }
0x1081   : > { %v6986_v35 = vpack.c.bf16 %v6057_v34, %v6056_v10 }
0x1082   : > { %v5063_v24 = vsel %vm907_vm4, %v5060_v23, 0.0 }
0x1083   : > { %5064 = vadd.xlane.f32.xlu1 %v5063_v24  ;;  %6987 = vmatpush3.bf16.msra.mxu0 %v6986_v35 }
0x1110   : > { %v5065_v25 = vpop.xlane.xlu1 %5064 }
0x1111   : > { %v5066_v26 = vmul.f32 0.03125, %v5065_v25 }
0x1113   : > { %v5067_v60 = vsub.f32 %v5060_v23, %v5066_v26 }
0x1115   : > { %v5068_v27 = vmul.f32 %v5067_v60, %v5067_v60 }
0x1117   : > { %v5069_v28 = vsel %vm907_vm4, %v5068_v27, 0.0 }
0x1118   : > { %5070 = vadd.xlane.f32.xlu0 %v5069_v28 }
0x11a5   : > { %v5071_v36 = vpop.xlane.xlu0 %5070 }
0x11a6   : > { %v5072_v37 = vmul.f32 0.03125, %v5071_v36 }
0x11a8   : > { %v5073_v38 = vadd.f32 1e-12, %v5072_v37  ;;  %v6073_v37 = vld [vmem:[%s8634_s20 + $0x48] sm:$0xff] }
0x11aa   : > { %7161 = vrsqrt.f32 %v5073_v38  ;;  %v6075_v38 = vld [vmem:[%s8634_s20 + $0x58] sm:$0xff] }
0x11b4   : > { %v7162_v13 = vpop.eup %7161 }
0x11b5   : > { %v5075_v40 = vmul.f32 %v7162_v13, %v5067_v60  ;;  %v6068_v60 = vld [vmem:[%s8631_s17 + $0x1] ss:$0 sm:$0xff]  ;;  %v7000_v13 = vpack.c.bf16 %v6075_v38, %v6073_v37  ;;  %v6084_v38 = vld [vmem:[%s8634_s20 + $0x90] sm:$0xff] }
0x11b6   : > { %v6082_v37 = vld [vmem:[%s8634_s20 + $0x80] sm:$0xff] }
0x11b7   : > { %v5080_v44 = vmul.f32 %v6052_v39, %v5075_v40  ;;  %v6072_v39 = vld [vmem:[%s8634_s20 + $0x40] sm:$0xff]  ;;  %v6074_v40 = vld [vmem:[%s8634_s20 + $0x50] sm:$0xff]  ;;  %7001 = vmatprep.subr.bf16.mxu0 %v7000_v13  ;;  %v6087_v13 = vld [vmem:[%s8634_s20 + $0xa8] sm:$0xff] }
0x11b9   : > { %v5085_v45 = vadd.f32 %v6053_v41, %v5080_v44  ;;  %v7002_v41 = vpack.c.bf16 %v6074_v40, %v6072_v39  ;;  %v6077_v44 = vld [vmem:[%s8634_s20 + $0x68] sm:$0xff]  ;;  %v6089_v39 = vld [vmem:[%s8634_s20 + $0xb8] sm:$0xff]  ;;  %v7018_v40 = vpack.c.bf16 %v6084_v38, %v6082_v37 }
0x11bb   : > { %6775 = vmatmul.mubr.msk.f32.vlgmr.msra.gmra.mrb[52].mxu0 %vm907_vm4, %v5085_v45 }
0x11bc   : > { %5397 = vmatprep.mubr.f32.mxu0 %v7240_v16  ;;  %7003 = vmatpush1.bf16.msra.mxu0 %v7002_v41  ;;  %v7020_v41 = vpack.c.bf16 %v6089_v39, %v6087_v13 }
0x128e   : > { %v5165_v53 = vpop.f32.mrb[52].mxu0 }
0x128f   : > { %v5166_v61 = vadd.f32 %v6058_v58, %v5165_v53  ;;  %v6776_v62 = vpop.f32.mrb[53].mxu0  ;;  %v7036_v58 = vpack.c.bf16 %v5689_v56, %v5688_v52  ;;  %v5690_v53 = vld [vmem:[%s8637_s23 + $0x20] sm:$0xff]  ;;  %v6098_v52 = vld [vmem:[%s8634_s20 + $0xf8] sm:$0xff] }
0x1290   : > { %v7028_v56 = vpack.c.bf16 %v6098_v52, %v6096_v54 }
0x1291   : > { %v5170_v63 = vmul.f32 0.70710677, %v5166_v61  ;;  %v5169_v24 = vmul.f32 0.5, %v5166_v61  ;;  %v5691_v61 = vld [vmem:[%s8637_s23 + $0x28] sm:$0xff] }
0x1292   : > { %v7039_v62 = vpack.c.bf16 %v5691_v61, %v5690_v53  ;;  %v6097_v53 = vld [vmem:[%s8634_s20 + $0xf0] sm:$0xff] }
0x1293   : > { %v5173_v0 = vand.u32 2147483647, %v5170_v63  ;;  %vm5171_vm8 = vcmp.lt.f32.partialorder %v5170_v63, 0.0  ;;  %v5692_v63 = vld [vmem:[%s8637_s23 + $0x30] sm:$0xff] }
0x1294   : > { %v5172_v22 = vsel %vm5171_vm8, -1.0, %v7241_v33 }
0x1295   : > { %v5174_v1 = vmul.f32 0.3275911, %v5173_v0  ;;  %v5186_v3 = vsub.f32 0.0, %v5173_v0 }
0x1297   : > { %v5175_v2 = vadd.f32 1.0, %v5174_v1  ;;  %v5187_v30 = vmul.f32 %v5186_v3, %v5173_v0  ;;  %v5693_v0 = vld [vmem:[%s8637_s23 + $0x38] sm:$0xff]  ;;  %v5695_v3 = vld [vmem:[%s8637_s23 + $0x48] sm:$0xff] }
0x1298   : > { %v7042_v1 = vpack.c.bf16 %v5693_v0, %v5692_v63  ;;  %v5576_v0 = vrot.slane %v7240_v16, 3 }
0x1299   : > { %7163 = vrcp.f32 %v5175_v2  ;;  %v5188_v8 = vmul.f32 1.442695, %v5187_v30  ;;  %v5694_v2 = vld [vmem:[%s8637_s23 + $0x40] sm:$0xff]  ;;  %v5696_v30 = vld [vmem:[%s8637_s23 + $0x50] sm:$0xff] }
0x129b   : > { %7165 = vpow2.f32 %v5188_v8  ;;  %v5698_v8 = vld [vmem:[%s8637_s23 + $0x60] sm:$0xff] }
0x12a3   : > { %v7164_v5 = vpop.eup %7163 }
0x12a4   : > { %v5177_v6 = vmul.f32 1.0614054, %v7164_v5 }
0x12a5   : > { %v7166_v19 = vpop.eup %7165 }
0x12a6   : > { %v5178_v7 = vadd.f32 -1.4531521, %v5177_v6  ;;  %v5697_v6 = vld [vmem:[%s8637_s23 + $0x58] sm:$0xff] }
0x12a8   : > { %v5179_v9 = vmul.f32 %v7164_v5, %v5178_v7  ;;  %v7048_v7 = vpack.c.bf16 %v5697_v6, %v5696_v30  ;;  %v5703_v30 = vld [vmem:[%s8637_s23 + $0x88] sm:$0xff] }
0x12aa   : > { %v5180_v11 = vadd.f32 1.4214138, %v5179_v9  ;;  %v5699_v9 = vld [vmem:[%s8637_s23 + $0x68] sm:$0xff] }
0x12ac   : > { %v5181_v12 = vmul.f32 %v7164_v5, %v5180_v11  ;;  %v7051_v11 = vpack.c.bf16 %v5699_v9, %v5698_v8  ;;  %v5705_v8 = vld [vmem:[%s8637_s23 + $0x98] sm:$0xff] }
0x12ae   : > { %v5182_v14 = vadd.f32 -0.28449672, %v5181_v12 }
0x12b0   : > { %v5183_v15 = vmul.f32 %v7164_v5, %v5182_v14 }
0x12b2   : > { %v5184_v17 = vadd.f32 0.2548296, %v5183_v15 }
0x12b4   : > { %v5185_v18 = vmul.f32 %v7164_v5, %v5184_v17  ;;  %v7045_v5 = vpack.c.bf16 %v5695_v3, %v5694_v2  ;;  %v5700_v2 = vld [vmem:[%s8637_s23 + $0x70] sm:$0xff]  ;;  %v5701_v3 = vld [vmem:[%s8637_s23 + $0x78] sm:$0xff] }
0x12b6   : > { %v5190_v20 = vmul.f32 %v7166_v19, %v5185_v18  ;;  %v6070_v18 = vld [vmem:[%s8632_s18 + $0x1] ss:$0 sm:$0xff] }
0x12b8   : > { %v5191_v21 = vsub.f32 1.0, %v5190_v20  ;;  %v6071_v20 = vld [vmem:[%s8633_s19 + $0x1] ss:$0 sm:$0xff] }
0x12ba   : > { %v5192_v23 = vmul.f32 %v5191_v21, %v5172_v22  ;;  %v5308_v22 = vld [vmem:[%s8634_s20] sm:$0xff] }
0x12bc   : > { %v5193_v25 = vadd.f32 1.0, %v5192_v23  ;;  %v5310_v23 = vld [vmem:[%s8634_s20 + $0x10] sm:$0xff] }
0x12be   : > { %v5194_v26 = vmul.f32 %v5193_v25, %v5169_v24  ;;  %v5329_v25 = vrot.slane %v7240_v16, 1 }
0x12c0   : > { %6794 = vmatmul.mubr.msk.f32.vlgmr.msra.gmra.mrb[50].mxu1 %vm3025_vm7, %v5194_v26  ;;  %v5313_v26 = vld [vmem:[%s8634_s20 + $0x28] sm:$0xff] }
0x12c1   : > { %7034 = vmatpush1.bf16.msra.mxu1 %v7033_v55  ;;  %v7026_v55 = vpack.c.bf16 %v6093_v50, %v6091_v49 }
0x12c2   : > { %7035 = vmatprep.subr.bf16.mxu1 %v7238_v4 }
0x12c5   : > { %7037 = vmatpush1.bf16.msra.mxu1 %v7036_v58  ;;  %v6095_v58 = vld [vmem:[%s8634_s20 + $0xe0] sm:$0xff] }
0x12c6   : > { %7038 = vmatprep.subr.bf16.mxu1 %v7238_v4 }
0x12c9   : > { %7040 = vmatpush1.bf16.msra.mxu1 %v7039_v62  ;;  %v7030_v62 = vpack.c.bf16 %v6097_v53, %v6095_v58 }
0x12ca   : > { %7041 = vmatprep.subr.bf16.mxu1 %v7238_v4 }
0x12cd   : > { %7043 = vmatpush1.bf16.msra.mxu1 %v7042_v1 }
0x12ce   : > { %7044 = vmatprep.subr.bf16.mxu1 %v7238_v4 }
0x12d1   : > { %7046 = vmatpush1.bf16.msra.mxu1 %v7045_v5  ;;  %v7054_v5 = vpack.c.bf16 %v5701_v3, %v5700_v2 }
0x12d2   : > { %7047 = vmatprep.subr.bf16.mxu1 %v7238_v4 }
0x12d5   : > { %7049 = vmatpush1.bf16.msra.mxu1 %v7048_v7  ;;  %v5704_v7 = vld [vmem:[%s8637_s23 + $0x90] sm:$0xff] }
0x12d6   : > { %7050 = vmatprep.subr.bf16.mxu1 %v7238_v4  ;;  %v7060_v9 = vpack.c.bf16 %v5705_v8, %v5704_v7 }
0x12d9   : > { %7052 = vmatpush1.bf16.msra.mxu1 %v7051_v11  ;;  %v5706_v11 = vld [vmem:[%s8637_s23 + $0xa0] sm:$0xff] }
0x12da   : > { %7053 = vmatprep.subr.bf16.mxu1 %v7238_v4 }
0x12dd   : > { %7055 = vmatpush1.bf16.msra.mxu1 %v7054_v5 }
0x12de   : > { %7056 = vmatprep.subr.bf16.mxu1 %v7238_v4 }
0x1393   : > { %v5278_v27 = vpop.f32.mrb[50].mxu1 }
0x1394   : > { %v5279_v28 = vadd.f32 %v6068_v60, %v5278_v27  ;;  %v6795_v29 = vpop.f32.mrb[51].mxu1  ;;  %v5315_v60 = vld [vmem:[%s8634_s20 + $0x38] sm:$0xff] }
0x1395   : > { %v7012_v29 = vpack.c.bf16 %v5315_v60, %v5313_v26  ;;  %v5669_v26 = vld [vmem:[%s8636_s22] sm:$0xff] }
0x1396   : > { %v5282_v31 = vadd.f32 %v5279_v28, %v5085_v45  ;;  %v6079_v45 = vld [vmem:[%s8634_s20 + $0x78] sm:$0xff]  ;;  %v7010_v28 = vpack.c.bf16 %v5310_v23, %v5308_v22 }
0x1397   : > { %v7004_v46 = vpack.c.bf16 %v6079_v45, %v6077_v44  ;;  %v6086_v44 = vld [vmem:[%s8634_s20 + $0xa0] sm:$0xff]  ;;  %v6088_v45 = vld [vmem:[%s8634_s20 + $0xb0] sm:$0xff] }
0x1398   : > { %v5285_v32 = vsel %vm907_vm4, %v5282_v31, 0.0  ;;  %v7022_v43 = vpack.c.bf16 %v6088_v45, %v6086_v44 }
0x1399   : > { %5286 = vadd.xlane.f32.xlu1 %v5285_v32  ;;  %7005 = vmatprep.subr.bf16.mxu0 %v7004_v46  ;;  %v5314_v32 = vld [vmem:[%s8634_s20 + $0x30] sm:$0xff]  ;;  %v6092_v46 = vld [vmem:[%s8634_s20 + $0xc8] sm:$0xff] }
0x139a   : > { %7007 = vmatpush1.bf16.msra.mxu0 %v7006_v48  ;;  %v7024_v48 = vpack.c.bf16 %v6094_v47, %v6092_v46 }
0x139b   : > { %7009 = vmatprep.subr.bf16.mxu0 %v7008_v51 }
0x1426   : > { %v5287_v10 = vpop.xlane.xlu1 %5286 }
0x1427   : > { %v5288_v34 = vmul.f32 0.03125, %v5287_v10 }
0x1429   : > { %v8346_v33 = vsub.f32 %v5282_v31, %v5288_v34  ;;  %v5312_v31 = vld [vmem:[%s8634_s20 + $0x20] sm:$0xff]  ;;  %v6083_v34 = vld [vmem:[%s8634_s20 + $0x88] sm:$0xff] }
0x142b   : > { %v5290_v35 = vmul.f32 %v8346_v33, %v8346_v33 }
0x142d   : > { %v5291_v36 = vsel %vm907_vm4, %v5290_v35, 0.0  ;;  %v7014_v35 = vpack.c.bf16 %v5314_v32, %v5312_v31 }
0x142e   : > { %5292 = vadd.xlane.f32.xlu0 %v5291_v36 }
0x14bb   : > { %v5293_v12 = vpop.xlane.xlu0 %5292 }
0x14bc   : > { %v5294_v14 = vmul.f32 0.03125, %v5293_v12  ;;  %v5707_v12 = vld [vmem:[%s8637_s23 + $0xa8] sm:$0xff] }
0x14be   : > { %v5295_v15 = vadd.f32 1e-12, %v5294_v14  ;;  %v7063_v14 = vpack.c.bf16 %v5707_v12, %v5706_v11 }
0x14c0   : > { %7167 = vrsqrt.f32 %v5295_v15  ;;  %v5708_v15 = vld [vmem:[%s8637_s23 + $0xb0] sm:$0xff] }
0x14ca   : > { %v7168_v17 = vpop.eup %7167 }
0x14cb   : > { %v5297_v19 = vmul.f32 %v7168_v17, %v8346_v33  ;;  %v6085_v33 = vld [vmem:[%s8634_s20 + $0x98] sm:$0xff] }
0x14cc   : > { %v7016_v36 = vpack.c.bf16 %v6085_v33, %v6083_v34  ;;  %v5709_v17 = vld [vmem:[%s8637_s23 + $0xb8] sm:$0xff] }
0x14cd   : > { %v5302_v21 = vmul.f32 %v6070_v18, %v5297_v19  ;;  %v7066_v18 = vpack.c.bf16 %v5709_v17, %v5708_v15  ;;  %v5653_v19 = vld [vmem:[%s8635_s21] sm:$0x3] }
0x14cf   : > { %v5307_v24 = vadd.f32 %v6071_v20, %v5302_v21  ;;  %v5661_v20 = vsub.s32 1, %v7794_v57  ;;  %v5658_v21 = vrot.slane %v5653_v19, %v2226_v59 }
0x14d1   : > { %v5328_v27 = vrot.slane %v5307_v24, 1  ;;  %v5487_v51 = vrot.slane %v5307_v24, 2  ;;  %v5575_v63 = vrot.slane %v5307_v24, 3  ;;  %v5662_v22 = vrot.slane %v5653_v19, %v5661_v20 }
0x14d3   : > { %v5330_v10 = vsel %vm5327_vm9, %v5328_v27, %v5329_v25  ;;  %v5489_v61 = vsel %vm5486_vm10, %v5487_v51, %v5488_v42  ;;  %v5577_v1 = vsel %vm5574_vm11, %v5575_v63, %v5576_v0  ;;  %v5670_v27 = vld [vmem:[%s8636_s22 + $0x8] sm:$0xff] }
0x14d4   : > { %6080 = vmatmul.mubr.msk.f32.vlgmr.msra.gmra.mrb[54].mxu0 %vm907_vm4, %v5330_v10 }
0x14d5   : > { %7011 = vmatpush1.bf16.msra.mxu0 %v7010_v28  ;;  %5470 = vmatprep.mubr.f32.mxu0 %v7240_v16 }
0x14d6   : > { %7013 = vmatprep.subr.bf16.mxu0 %v7012_v29 }
0x14d9   : > { %7015 = vmatpush1.bf16.msra.mxu0 %v7014_v35 }
0x14da   : > { %7017 = vmatprep.subr.bf16.mxu0 %v7016_v36 }
0x14dc   : > { %6081 = vmatmul.mubr.msk.f32.vlgmr.msra.gmra.mrb[54].mxu0 %vm907_vm4, %v5307_v24 }
0x14dd   : > { %7019 = vmatpush1.bf16.msra.mxu0 %v7018_v40  ;;  %5556 = vmatprep.mubr.f32.mxu0 %v7240_v16 }
0x14de   : > { %7021 = vmatprep.subr.bf16.mxu0 %v7020_v41  ;;  %v5710_v41 = vld [vmem:[%s8638_s24] sm:$0x1] }
0x14e1   : > { %7023 = vmatpush1.bf16.msra.mxu0 %v7022_v43 }
0x14e2   : > { %7025 = vmatprep.subr.bf16.mxu0 %v7024_v48 }
0x14e4   : > { %6090 = vmatmul.mubr.msk.f32.vlgmr.msra.gmra.mrb[54].mxu0 %vm907_vm4, %v5489_v61 }
0x14e5   : > { %7027 = vmatpush1.bf16.msra.mxu0 %v7026_v55  ;;  %5644 = vmatprep.mubr.f32.mxu0 %v7240_v16  ;;  %v5702_v16 = vld [vmem:[%s8637_s23 + $0x80] sm:$0xff] }
0x14e6   : > { %7029 = vmatprep.subr.bf16.mxu0 %v7028_v56  ;;  %v7057_v6 = vpack.c.bf16 %v5703_v30, %v5702_v16 }
0x14e8   : > { %7058 = vmatpush1.bf16.msra.mxu1 %v7057_v6 }
0x14e9   : > { %7031 = vmatpush1.bf16.msra.mxu0 %v7030_v62  ;;  %7059 = vmatprep.subr.bf16.mxu1 %v7238_v4 }
0x14ec   : > { %6099 = vmatmul.mubr.msk.f32.vlgmr.msra.gmra.mrb[54].mxu0 %vm907_vm4, %v5577_v1  ;;  %7061 = vmatpush1.bf16.msra.mxu1 %v7060_v9 }
0x14ed   : > { %7062 = vmatprep.subr.bf16.mxu1 %v7238_v4 }
0x14f0   : > { %7064 = vmatpush1.bf16.msra.mxu1 %v7063_v14 }
0x14f1   : > { %7065 = vmatprep.subr.bf16.mxu1 %v7238_v4 }
0x14f4   : > { %7067 = vmatpush1.bf16.msra.mxu1 %v7066_v18 }
0x15bf   : > { %v5646_v23 = vpop.f32.mrb[54].mxu0 }
0x15c0   : > { %v5665_v24 = vadd.f32 %v5658_v21, %v5646_v23  ;;  %v5648_v25 = vpop.f32.mrb[55].mxu0 }
0x15c1   : > { %v5666_v60 = vadd.f32 %v5662_v22, %v5648_v25 }
0x15c2   : > { %v5667_v4 = vmax.f32 %v5665_v24, 0.0 }
0x15c3   : > { %v5668_v28 = vmax.f32 %v5666_v60, 0.0 }
0x15c4   : > { %v5671_v29 = vmul.f32 %v5669_v26, %v5667_v4 }
0x15c5   : > { %v5672_v31 = vmul.f32 %v5670_v27, %v5668_v28 }
0x15c6   : > { %v5673_v32 = vrot.slane %v5671_v29, 4 }
0x15c7   : > { %v5679_v57 = vsel %vm3025_vm7, %v5672_v31, -inf }
0x15c8   : > { %v5674_v59 = vmax.f32 %v5671_v29, %v5673_v32  ;;  %v5680_v10 = vrot.slane %v5679_v57, 4 }
0x15ca   : > { %v5675_v34 = vrot.slane %v5674_v59, 2  ;;  %v5681_v33 = vmax.f32 %v5679_v57, %v5680_v10 }
0x15cc   : > { %v5676_v35 = vmax.f32 %v5674_v59, %v5675_v34  ;;  %v5682_v36 = vrot.slane %v5681_v33, 2 }
0x15ce   : > { %v5683_v37 = vmax.f32 %v5681_v33, %v5682_v36  ;;  %v5677_v38 = vrot.slane %v5676_v35, 1 }
0x15d0   : > { %v5684_v13 = vrot.slane %v5683_v37, 1  ;;  %v5678_v40 = vmax.f32 %v5676_v35, %v5677_v38 }
0x15d2   : > { %v5685_v39 = vmax.f32 %v5683_v37, %v5684_v13 }
0x15d4   : > { %6100 = vmatprep.mubr.msk.f32.mxu1 %vm3025_vm7, %v5685_v39 }
0x15d5   : > { %5779 = vmatmul.mubr.f32.vlgmr.msra.gmra.mrb[52].mxu1 %v5678_v40 }
0x16a8   : > { %v5780_v44 = vpop.f32.mrb[52].mxu1 }
0x16a9   : > { %v5781_v45 = vadd.f32 %v5780_v44, %v5710_v41  ;;  %v5782_v46 = vpop.f32.mrb[53].mxu1 }
0x16ab   : > { %v5785_v47 = vsel %vm5784_vm12, %v5781_v45, -inf }
0x16ac   : > { %5786 = vmax.xlane.f32.xlu1 %v5785_v47 }
0x1739   : > { %v5787_v43 = vpop.xlane.xlu1 %5786 }
0x173a   : > { %v5788_v48 = vsub.f32 %v5781_v45, %v5787_v43 }
0x173c   : > { %v5789_v49 = vmul.f32 1.442695, %v5788_v48 }
0x173e   : > { %7169 = vpow2.f32 %v5789_v49 }
0x1748   : > { %v7170_v50 = vpop.eup %7169 }
0x1749   : > { %v5791_v51 = vsel %vm5784_vm12, %v7170_v50, 0.0 }
0x174a   : > { %5792 = vadd.xlane.f32.xlu0 %v5791_v51 }
0x17d7   : > { %v5793_v42 = vpop.xlane.xlu0 %5792 }
0x17d8   : > { %7171 = vrcp.f32 %v5793_v42 }
0x17e2   : > { %v7172_v54 = vpop.eup %7171 }
0x17e3   : > { %v5795_v52 = vmul.f32 %v7172_v54, %v7170_v50 }
0x17e5   : > { %5796 = vst.msk [vmem:[%s778_s29] sm:$0x1] %vm5784_vm12, %v5795_v52 }
0x17e6   : > { %7186 = shalt.err (!%p7183_p3)
}
0x17e7   : > { %s7187_s1 = scalar_lea.hbm %s8571_s5, 16  ;;  %s7191_s30 = scalar_lea.hbm %s8692_s4, 32 }
0x17e8   : > { %p7188_p4 = scmp.ne.s32.totalorder %s8571_s5, %s7187_s1  ;;  %p7192_p9 = scmp.lt.u32.totalorder %s8571_s5, %s8692_s4 }
0x17e9   : > { %p7193_p10 = scmp.lt.u32.totalorder %s7191_s30, %s7187_s1  ;;  %p7195_p12 = scmp.lt.u32.totalorder %s7187_s1, %s8571_s5 }
0x17ea   : > { %p7189_p7 = pnand %p7188_p4, %p7411_p5 }
0x17eb   : > { %p7194_p11 = por %p7193_p10, %p7192_p9 }
0x17ec   : > { %p7190_p8 = pneg %p7189_p7 }
0x17ed   : > { %p7196_p13 = por %p7195_p12, %p7194_p11 }
0x17ef   : > { %p7197_p0 = pnand %p7196_p13, %p7190_p8 }
0x17f1   : > { %7200 = shalt.err (!%p7197_p0)
}
0x17f2   : > { %7074 = dma.vmem_to_hbm [thread:$0]  (%p7411_p5), %s8573_s0, 16, %s8571_s5, %s5798_s6  }
0x17f3 PF: > { %s8693_s11 = sld [smem:[#allocation7_spill]]  ;;  %s8694_s26 = sld [smem:[#allocation5_spill]] }
0x17f9   : > { %p7080_p1 = scmp.ge.s32.totalorder %s8693_s11, 2  ;;  %s5822_s8 = sand.u32 1, %s8694_s26  }
0x17fa   : > { %s5823_s29 = scalar_lea.sflag [#allocation3], %s5822_s8 }
0x17fb   : > { %p7077_p2 = pnand %p7080_p1, %p7415_p6 }
0x17fd   : > { %7218 = dma.done.wait (!%p7077_p2), %s5823_s29, 16  }
0x17fe   : > { %7220 = vsyncadd (!%p7077_p2), %s5823_s29, 4294967280  ;;  %s8696_s30 = sld [smem:[#allocation9_spill]]  ;;  %s8697_s1 = sld [smem:[#allocation6_spill]] }
0x17ff   : > { %s8698_s6 = sld [smem:[#allocation10_spill]]  ;;  %s8699_s29 = smov %s7227_s2 }
0x1804   : > { %p35_p3 = scmp.ge.s32.totalorder %s8696_s30, 4   ;;  %s8700_s2 = smov %s8697_s1 }
0x1806   :  { %37 = sbr.rel (!%p35_p3) target bundleno = 17 (0x11), region = 169 }
0x180d   :  { %5827 = vsyncpa [#allocation3], 1 }
0x180e   :  { %5829 = vsyncpa [#allocation3 + $0x1], 1 }

</bundles_post_ra>
